<compile_context>
chip_gen: v7x
topology: tpu7x:2x2x1
jax: 0.10.0
libtpu: 0.0.40
codegen_flags: <defaults>
</compile_context>

<pallas_src>
import functools

import jax
import jax.numpy as jnp
from jax import lax
from jax.experimental import pallas as pl
from jax.experimental.pallas import tpu as pltpu

_R0 = 8      # sublane-aligned origin of the (H, W) interior in the conv scratch
_C0 = 128    # lane-aligned origin (both >= conv padding)
_CH = 8      # channels reduced per step (one f32 sublane group)


def _spatial_attention_kernel(x_ref, w_ref, o_ref,
                              sum_ref, max_ref, pada_ref, padm_ref, *,
                              ksize, pad, H, W, C, tc, needs_mask):
    # x_ref    : (1, tc, H*W) lane-dense VMEM block (one batch, one channel tile)
    # w_ref    : (2*k*k,) f32 SMEM; [0:kk] = avg weights / C, [kk:2kk] = max weights
    # o_ref    : (1, 1, H, W) output block (written on the last channel tile)
    # sum_ref / max_ref : (8, H*W) f32 dense running channel-sum / channel-max rows
    # pada_ref / padm_ref : (_R0+H+pad, _C0+W+pad) f32 zero-padded conv scratch maps
    HW = H * W
    kk = ksize * ksize
    f32 = jnp.float32
    c_idx = pl.program_id(1)
    n_c = pl.num_programs(1)

    @pl.when(c_idx == 0)
    def _init():
        sum_ref[...] = jnp.zeros_like(sum_ref)
        max_ref[...] = jnp.full_like(max_ref, -jnp.inf)

    # Number of valid channels in this tile (only needed when tc does not divide C:
    # the partial last block's out-of-range rows hold unspecified data -> mask them).
    if needs_mask:
        valid = jnp.minimum(C - c_idx * tc, tc)

    def masked(chunk, off, nch):
        if not needs_mask:
            return chunk, chunk
        ch_id = lax.broadcasted_iota(jnp.int32, (nch, HW), 0) + off
        keep = ch_id < valid
        return jnp.where(keep, chunk, 0.0), jnp.where(keep, chunk, -jnp.inf)

    n_full = tc // _CH
    rem = tc % _CH

    # ---- streamed, lane-dense channel reduction: 8 channels per step ----
    if n_full > 0:
        def body(i, carry):
            s, m = carry
            off = pl.multiple_of(i * _CH, _CH)
            chunk = x_ref[0, pl.ds(off, _CH), :].astype(f32)     # (8, HW)
            cs, cm = masked(chunk, off, _CH)
            return s + cs, jnp.maximum(m, cm)

        s, m = lax.fori_loop(0, n_full, body, (sum_ref[...], max_ref[...]),
                             unroll=min(n_full, 4))
        sum_ref[...] = s
        max_ref[...] = m

    if rem > 0:
        # Only happens when tc == C and C is not a multiple of 8 (single-tile case).
        off = n_full * _CH
        chunk = x_ref[0, pl.ds(off, rem), :].astype(f32)          # (rem, HW)
        cs, cm = masked(chunk, off, rem)
        sum_ref[0:1, :] = sum_ref[0:1, :] + jnp.sum(cs, axis=0, keepdims=True)
        max_ref[0:1, :] = jnp.maximum(max_ref[0:1, :],
                                      jnp.max(cm, axis=0, keepdims=True))

    # ---- last channel tile: finalize maps, KxK conv, sigmoid, store ----
    @pl.when(c_idx == n_c - 1)
    def _conv_store():
        # Collapse the 8 accumulator rows into the two (1, HW) reduced maps.
        a_flat = jnp.sum(sum_ref[...], axis=0, keepdims=True)     # channel sum
        m_flat = jnp.max(max_ref[...], axis=0, keepdims=True)     # channel max

        # Zero the padded conv scratch (border must be 0) and relayout the two
        # tiny reduced maps into its (H, W) interior, row by row.
        pada_ref[...] = jnp.zeros_like(pada_ref)
        padm_ref[...] = jnp.zeros_like(padm_ref)
        for y in range(H):
            pada_ref[_R0 + y:_R0 + y + 1, _C0:_C0 + W] = a_flat[:, y * W:(y + 1) * W]
            padm_ref[_R0 + y:_R0 + y + 1, _C0:_C0 + W] = m_flat[:, y * W:(y + 1) * W]

        a_full = pada_ref[...]
        m_full = padm_ref[...]
        r_lo = _R0 - pad                 # top-left of the padded window frame
        c_lo = _C0 - pad
        Hp = H + 2 * pad

        # Hoisted lane-direction (j) shifts: one (Hp, W) shifted copy of each map
        # per column tap (K slices per map instead of K*K).
        a_cols = [a_full[r_lo:r_lo + Hp, c_lo + j:c_lo + j + W] for j in range(ksize)]
        m_cols = [m_full[r_lo:r_lo + Hp, c_lo + j:c_lo + j + W] for j in range(ksize)]

        # 2*K independent accumulator chains (avg / max split per row tap).
        parts = []
        for i in range(ksize):
            b_a = w_ref[i * ksize] * a_cols[0]
            b_m = w_ref[kk + i * ksize] * m_cols[0]
            for j in range(1, ksize):
                b_a = b_a + w_ref[i * ksize + j] * a_cols[j]
                b_m = b_m + w_ref[kk + i * ksize + j] * m_cols[j]
            b = b_a + b_m                          # (Hp, W)
            parts.append(b[i:i + H, :])            # sublane-direction slice only

        # Tree sum keeps the final add chain shallow.
        while len(parts) > 1:
            nxt = [parts[t] + parts[t + 1] for t in range(0, len(parts) - 1, 2)]
            if len(parts) % 2:
                nxt.append(parts[-1])
            parts = nxt

        o_ref[0, 0] = jax.nn.sigmoid(parts[0]).astype(o_ref.dtype)


def _vmem_budgets():
    """(per-input-block byte budget, vmem_limit_bytes), generation-aware."""
    cap = None
    try:
        cap = getattr(pltpu.get_tpu_info(), "vmem_capacity_bytes", None)
    except Exception:
        cap = None
    if cap is not None and cap >= 100 * 1024 * 1024:   # v5e / v6e: 128 MiB VMEM
        return 12 * 1024 * 1024, 64 * 1024 * 1024
    # v7x (64 MiB VMEM) or unknown: stay conservative.
    return 8 * 1024 * 1024, 44 * 1024 * 1024


def _pick_channel_tile(C, itemsize, HW, budget_bytes):
    """Channel tile: C itself if it fits, else the largest multiple of 8 under budget."""
    if C * HW * itemsize <= budget_bytes:
        return C
    tc = (budget_bytes // (HW * itemsize)) // _CH * _CH
    tc = max(tc, _CH)
    return min(tc, C)


def spatial_attention(x, conv_weight, kernel_size=7):
    """x: (B, C, H, W); conv_weight: (1, 2, k, k). Returns (B, 1, H, W)."""
    assert kernel_size in (3, 7), "kernel size must be 3 or 7"
    pad = 3 if kernel_size == 7 else 1
    B, C, H, W = x.shape
    HW = H * W

    # Kernel accumulates the channel *sum*; fold 1/C into the avg-half weights.
    w = conv_weight.astype(jnp.float32).reshape(2, kernel_size * kernel_size)
    w = w * jnp.array([[1.0 / C], [1.0]], dtype=jnp.float32)
    w_flat = w.reshape(-1)                          # (2*k*k,) lives in SMEM

    block_budget, vmem_limit = _vmem_budgets()
    tc = _pick_channel_tile(C, x.dtype.itemsize, HW, block_budget)
    nc = pl.cdiv(C, tc)
    needs_mask = (C % tc) != 0

    x_flat = x.reshape(B, C, HW)                    # free, contiguous metadata change

    kernel = functools.partial(
        _spatial_attention_kernel,
        ksize=kernel_size, pad=pad, H=H, W=W, C=C, tc=tc, needs_mask=needs_mask,
    )

    pad_rows = _R0 + H + pad
    pad_cols = _C0 + W + pad

    return pl.pallas_call(
        kernel,
        out_shape=jax.ShapeDtypeStruct((B, 1, H, W), x.dtype),
        grid=(B, nc),
        in_specs=[
            pl.BlockSpec((1, tc, HW), lambda b, c: (b, c, 0)),
            pl.BlockSpec(memory_space=pltpu.MemorySpace.SMEM),
        ],
        out_specs=pl.BlockSpec((1, 1, H, W), lambda b, c: (b, 0, 0, 0)),
        scratch_shapes=[
            pltpu.VMEM((_CH, HW), jnp.float32),              # running channel-sum rows
            pltpu.VMEM((_CH, HW), jnp.float32),              # running channel-max rows
            pltpu.VMEM((pad_rows, pad_cols), jnp.float32),   # zero-padded "avg" map
            pltpu.VMEM((pad_rows, pad_cols), jnp.float32),   # zero-padded "max" map
        ],
        compiler_params=pltpu.CompilerParams(
            dimension_semantics=("parallel", "arbitrary"),
            vmem_limit_bytes=vmem_limit,
        ),
    )(x_flat, w_flat)


def spatial_attention_ref(x, conv_weight, kernel_size=7):
    """Plain-JAX reference mirroring the PyTorch forward."""
    pad = 3 if kernel_size == 7 else 1
    avg = jnp.mean(x, axis=1, keepdims=True)
    mx = jnp.max(x, axis=1, keepdims=True)
    xc = jnp.concatenate([avg, mx], axis=1)
    out = jax.lax.conv_general_dilated(
        xc, conv_weight, window_strides=(1, 1),
        padding=[(pad, pad), (pad, pad)],
        dimension_numbers=("NCHW", "OIHW", "NCHW"),
    )
    return jax.nn.sigmoid(out)


if __name__ == "__main__":
    key = jax.random.PRNGKey(0)
    kx, kw = jax.random.split(key)

    B, C, H, W = 2, 4, 16, 16
    kernel_size = 7

    x = jax.random.normal(kx, (B, C, H, W), dtype=jnp.float32)
    # Deterministic synthetic weights for Conv2d(2, 1, 7, bias=False): (O=1, I=2, 7, 7)
    conv_weight = 0.1 * jax.random.normal(
        kw, (1, 2, kernel_size, kernel_size), dtype=jnp.float32
    )

    out = jax.block_until_ready(spatial_attention(x, conv_weight, kernel_size))
    ref = spatial_attention_ref(x, conv_weight, kernel_size)

    assert out.shape == (B, 1, H, W)
    assert jnp.allclose(out, ref, atol=1e-5, rtol=1e-5), "mismatch vs reference"

    print("KERNEL_OK")
</pallas_src>

<mosaic_0001>
module attributes {stable_mosaic.version = 11 : i64} {
  func.func @_spatial_attention_kernel(%arg0: i32, %arg1: i32, %arg2: memref<1x4x256xf32, #tpu.memory_space<vmem>>, %arg3: memref<98xf32, #tpu.memory_space<smem>>, %arg4: memref<1x1x16x16xf32, #tpu.memory_space<vmem>>, %arg5: memref<8x256xf32, #tpu.memory_space<vmem>>, %arg6: memref<8x256xf32, #tpu.memory_space<vmem>>, %arg7: memref<27x147xf32, #tpu.memory_space<vmem>>, %arg8: memref<27x147xf32, #tpu.memory_space<vmem>>) attributes {dimension_semantics = [#tpu.dimension_semantics<parallel>, #tpu.dimension_semantics<arbitrary>], iteration_bounds = array<i64: 2, 1>, scalar_prefetch = 0 : i64, scratch_operands = 4 : i64, tpu.core_type = #tpu.core_type<tc>, window_params = [{transform_indices = @transform_0, window_bounds = array<i64: 1, 4, 256>}, {transform_indices = @transform_1, window_bounds = array<i64: 98>}, {transform_indices = @transform_2, window_bounds = array<i64: 1, 1, 16, 16>}]} {
    %c0_i32 = arith.constant 0 : i32
    %0 = arith.cmpi eq, %arg1, %c0_i32 : i32
    %1 = arith.extui %0 : i1 to i32
    %c0_i32_0 = arith.constant 0 : i32
    %2 = arith.cmpi ne, %1, %c0_i32_0 : i32
    scf.if %2 {
      %cst_14 = arith.constant 0.000000e+00 : f32
      %18 = vector.broadcast %cst_14 : f32 to vector<8x256xf32>
      %c0_15 = arith.constant 0 : index
      %c0_16 = arith.constant 0 : index
      %19 = vector.load %arg5[%c0_15, %c0_16] : memref<8x256xf32, #tpu.memory_space<vmem>>, vector<8x256xf32>
      tpu.vector_store %arg5[%c0_15, %c0_16], %18 {strides = array<i32>} : memref<8x256xf32, #tpu.memory_space<vmem>>, vector<8x256xf32>,
      %cst_17 = arith.constant 0xFF800000 : f32
      %20 = vector.broadcast %cst_17 : f32 to vector<8x256xf32>
      %c0_18 = arith.constant 0 : index
      %c0_19 = arith.constant 0 : index
      %21 = vector.load %arg6[%c0_18, %c0_19] : memref<8x256xf32, #tpu.memory_space<vmem>>, vector<8x256xf32>
      tpu.vector_store %arg6[%c0_18, %c0_19], %20 {strides = array<i32>} : memref<8x256xf32, #tpu.memory_space<vmem>>, vector<8x256xf32>,
    } else {
    }
    %c0 = arith.constant 0 : index
    %c0_1 = arith.constant 0 : index
    %c0_2 = arith.constant 0 : index
    %3 = vector.load %arg2[%c0, %c0_1, %c0_2] : memref<1x4x256xf32, #tpu.memory_space<vmem>>, vector<1x4x256xf32>
    %4 = vector.shape_cast %3 : vector<1x4x256xf32> to vector<4x256xf32>
    %c0_3 = arith.constant 0 : index
    %c0_4 = arith.constant 0 : index
    %5 = vector.load %arg5[%c0_3, %c0_4] : memref<8x256xf32, #tpu.memory_space<vmem>>, vector<1x256xf32>
    %cst = arith.constant dense<0.000000e+00> : vector<256xf32>
    %6 = vector.multi_reduction <add>, %4, %cst [0] : vector<4x256xf32> to vector<256xf32>
    %7 = vector.shape_cast %6 : vector<256xf32> to vector<1x256xf32>
    %8 = arith.addf %5, %7 : vector<1x256xf32>
    %c0_5 = arith.constant 0 : index
    %c0_6 = arith.constant 0 : index
    %9 = vector.load %arg5[%c0_5, %c0_6] : memref<8x256xf32, #tpu.memory_space<vmem>>, vector<1x256xf32>
    tpu.vector_store %arg5[%c0_5, %c0_6], %8 {strides = array<i32>} : memref<8x256xf32, #tpu.memory_space<vmem>>, vector<1x256xf32>,
    %c0_7 = arith.constant 0 : index
    %c0_8 = arith.constant 0 : index
    %10 = vector.load %arg6[%c0_7, %c0_8] : memref<8x256xf32, #tpu.memory_space<vmem>>, vector<1x256xf32>
    %cst_9 = arith.constant dense<0xFF800000> : vector<256xf32>
    %11 = vector.multi_reduction <maximumf>, %4, %cst_9 [0] : vector<4x256xf32> to vector<256xf32>
    %12 = vector.shape_cast %11 : vector<256xf32> to vector<1x256xf32>
    %13 = arith.maximumf %10, %12 : vector<1x256xf32>
    %c0_10 = arith.constant 0 : index
    %c0_11 = arith.constant 0 : index
    %14 = vector.load %arg6[%c0_10, %c0_11] : memref<8x256xf32, #tpu.memory_space<vmem>>, vector<1x256xf32>
    tpu.vector_store %arg6[%c0_10, %c0_11], %13 {strides = array<i32>} : memref<8x256xf32, #tpu.memory_space<vmem>>, vector<1x256xf32>,
    %c0_i32_12 = arith.constant 0 : i32
    %15 = arith.cmpi eq, %arg1, %c0_i32_12 : i32
    %16 = arith.extui %15 : i1 to i32
    %c0_i32_13 = arith.constant 0 : i32
    %17 = arith.cmpi ne, %16, %c0_i32_13 : i32
    scf.if %17 {
      %c0_14 = arith.constant 0 : index
      %c0_15 = arith.constant 0 : index
      %18 = vector.load %arg5[%c0_14, %c0_15] : memref<8x256xf32, #tpu.memory_space<vmem>>, vector<8x256xf32>
      %cst_16 = arith.constant dense<0.000000e+00> : vector<256xf32>
      %19 = vector.multi_reduction <add>, %18, %cst_16 [0] : vector<8x256xf32> to vector<256xf32>
      %20 = vector.shape_cast %19 : vector<256xf32> to vector<1x256xf32>
      %c0_17 = arith.constant 0 : index
      %c0_18 = arith.constant 0 : index
      %21 = vector.load %arg6[%c0_17, %c0_18] : memref<8x256xf32, #tpu.memory_space<vmem>>, vector<8x256xf32>
      %cst_19 = arith.constant dense<0xFF800000> : vector<256xf32>
      %22 = vector.multi_reduction <maximumf>, %21, %cst_19 [0] : vector<8x256xf32> to vector<256xf32>
      %23 = vector.shape_cast %22 : vector<256xf32> to vector<1x256xf32>
      %cst_20 = arith.constant 0.000000e+00 : f32
      %24 = vector.broadcast %cst_20 : f32 to vector<27x147xf32>
      %c0_21 = arith.constant 0 : index
      %c0_22 = arith.constant 0 : index
      %25 = vector.load %arg7[%c0_21, %c0_22] : memref<27x147xf32, #tpu.memory_space<vmem>>, vector<27x147xf32>
      tpu.vector_store %arg7[%c0_21, %c0_22], %24 {strides = array<i32>} : memref<27x147xf32, #tpu.memory_space<vmem>>, vector<27x147xf32>,
      %cst_23 = arith.constant 0.000000e+00 : f32
      %26 = vector.broadcast %cst_23 : f32 to vector<27x147xf32>
      %c0_24 = arith.constant 0 : index
      %c0_25 = arith.constant 0 : index
      %27 = vector.load %arg8[%c0_24, %c0_25] : memref<27x147xf32, #tpu.memory_space<vmem>>, vector<27x147xf32>
      tpu.vector_store %arg8[%c0_24, %c0_25], %26 {strides = array<i32>} : memref<27x147xf32, #tpu.memory_space<vmem>>, vector<27x147xf32>,
      %28 = vector.extract_strided_slice %20 {offsets = [0, 0], sizes = [1, 16], strides = [1, 1]} : vector<1x256xf32> to vector<1x16xf32>
      %c8 = arith.constant 8 : index
      %c128 = arith.constant 128 : index
      %29 = vector.load %arg7[%c8, %c128] : memref<27x147xf32, #tpu.memory_space<vmem>>, vector<1x16xf32>
      tpu.vector_store %arg7[%c8, %c128], %28 {strides = array<i32>} : memref<27x147xf32, #tpu.memory_space<vmem>>, vector<1x16xf32>,
      %30 = vector.extract_strided_slice %23 {offsets = [0, 0], sizes = [1, 16], strides = [1, 1]} : vector<1x256xf32> to vector<1x16xf32>
      %c8_26 = arith.constant 8 : index
      %c128_27 = arith.constant 128 : index
      %31 = vector.load %arg8[%c8_26, %c128_27] : memref<27x147xf32, #tpu.memory_space<vmem>>, vector<1x16xf32>
      tpu.vector_store %arg8[%c8_26, %c128_27], %30 {strides = array<i32>} : memref<27x147xf32, #tpu.memory_space<vmem>>, vector<1x16xf32>,
      %32 = vector.extract_strided_slice %20 {offsets = [0, 16], sizes = [1, 16], strides = [1, 1]} : vector<1x256xf32> to vector<1x16xf32>
      %c9 = arith.constant 9 : index
      %c128_28 = arith.constant 128 : index
      %33 = vector.load %arg7[%c9, %c128_28] : memref<27x147xf32, #tpu.memory_space<vmem>>, vector<1x16xf32>
      tpu.vector_store %arg7[%c9, %c128_28], %32 {strides = array<i32>} : memref<27x147xf32, #tpu.memory_space<vmem>>, vector<1x16xf32>,
      %34 = vector.extract_strided_slice %23 {offsets = [0, 16], sizes = [1, 16], strides = [1, 1]} : vector<1x256xf32> to vector<1x16xf32>
      %c9_29 = arith.constant 9 : index
      %c128_30 = arith.constant 128 : index
      %35 = vector.load %arg8[%c9_29, %c128_30] : memref<27x147xf32, #tpu.memory_space<vmem>>, vector<1x16xf32>
      tpu.vector_store %arg8[%c9_29, %c128_30], %34 {strides = array<i32>} : memref<27x147xf32, #tpu.memory_space<vmem>>, vector<1x16xf32>,
      %36 = vector.extract_strided_slice %20 {offsets = [0, 32], sizes = [1, 16], strides = [1, 1]} : vector<1x256xf32> to vector<1x16xf32>
      %c10 = arith.constant 10 : index
      %c128_31 = arith.constant 128 : index
      %37 = vector.load %arg7[%c10, %c128_31] : memref<27x147xf32, #tpu.memory_space<vmem>>, vector<1x16xf32>
      tpu.vector_store %arg7[%c10, %c128_31], %36 {strides = array<i32>} : memref<27x147xf32, #tpu.memory_space<vmem>>, vector<1x16xf32>,
      %38 = vector.extract_strided_slice %23 {offsets = [0, 32], sizes = [1, 16], strides = [1, 1]} : vector<1x256xf32> to vector<1x16xf32>
      %c10_32 = arith.constant 10 : index
      %c128_33 = arith.constant 128 : index
      %39 = vector.load %arg8[%c10_32, %c128_33] : memref<27x147xf32, #tpu.memory_space<vmem>>, vector<1x16xf32>
      tpu.vector_store %arg8[%c10_32, %c128_33], %38 {strides = array<i32>} : memref<27x147xf32, #tpu.memory_space<vmem>>, vector<1x16xf32>,
      %40 = vector.extract_strided_slice %20 {offsets = [0, 48], sizes = [1, 16], strides = [1, 1]} : vector<1x256xf32> to vector<1x16xf32>
      %c11 = arith.constant 11 : index
      %c128_34 = arith.constant 128 : index
      %41 = vector.load %arg7[%c11, %c128_34] : memref<27x147xf32, #tpu.memory_space<vmem>>, vector<1x16xf32>
      tpu.vector_store %arg7[%c11, %c128_34], %40 {strides = array<i32>} : memref<27x147xf32, #tpu.memory_space<vmem>>, vector<1x16xf32>,
      %42 = vector.extract_strided_slice %23 {offsets = [0, 48], sizes = [1, 16], strides = [1, 1]} : vector<1x256xf32> to vector<1x16xf32>
      %c11_35 = arith.constant 11 : index
      %c128_36 = arith.constant 128 : index
      %43 = vector.load %arg8[%c11_35, %c128_36] : memref<27x147xf32, #tpu.memory_space<vmem>>, vector<1x16xf32>
      tpu.vector_store %arg8[%c11_35, %c128_36], %42 {strides = array<i32>} : memref<27x147xf32, #tpu.memory_space<vmem>>, vector<1x16xf32>,
      %44 = vector.extract_strided_slice %20 {offsets = [0, 64], sizes = [1, 16], strides = [1, 1]} : vector<1x256xf32> to vector<1x16xf32>
      %c12 = arith.constant 12 : index
      %c128_37 = arith.constant 128 : index
      %45 = vector.load %arg7[%c12, %c128_37] : memref<27x147xf32, #tpu.memory_space<vmem>>, vector<1x16xf32>
      tpu.vector_store %arg7[%c12, %c128_37], %44 {strides = array<i32>} : memref<27x147xf32, #tpu.memory_space<vmem>>, vector<1x16xf32>,
      %46 = vector.extract_strided_slice %23 {offsets = [0, 64], sizes = [1, 16], strides = [1, 1]} : vector<1x256xf32> to vector<1x16xf32>
      %c12_38 = arith.constant 12 : index
      %c128_39 = arith.constant 128 : index
      %47 = vector.load %arg8[%c12_38, %c128_39] : memref<27x147xf32, #tpu.memory_space<vmem>>, vector<1x16xf32>
      tpu.vector_store %arg8[%c12_38, %c128_39], %46 {strides = array<i32>} : memref<27x147xf32, #tpu.memory_space<vmem>>, vector<1x16xf32>,
      %48 = vector.extract_strided_slice %20 {offsets = [0, 80], sizes = [1, 16], strides = [1, 1]} : vector<1x256xf32> to vector<1x16xf32>
      %c13 = arith.constant 13 : index
      %c128_40 = arith.constant 128 : index
      %49 = vector.load %arg7[%c13, %c128_40] : memref<27x147xf32, #tpu.memory_space<vmem>>, vector<1x16xf32>
      tpu.vector_store %arg7[%c13, %c128_40], %48 {strides = array<i32>} : memref<27x147xf32, #tpu.memory_space<vmem>>, vector<1x16xf32>,
      %50 = vector.extract_strided_slice %23 {offsets = [0, 80], sizes = [1, 16], strides = [1, 1]} : vector<1x256xf32> to vector<1x16xf32>
      %c13_41 = arith.constant 13 : index
      %c128_42 = arith.constant 128 : index
      %51 = vector.load %arg8[%c13_41, %c128_42] : memref<27x147xf32, #tpu.memory_space<vmem>>, vector<1x16xf32>
      tpu.vector_store %arg8[%c13_41, %c128_42], %50 {strides = array<i32>} : memref<27x147xf32, #tpu.memory_space<vmem>>, vector<1x16xf32>,
      %52 = vector.extract_strided_slice %20 {offsets = [0, 96], sizes = [1, 16], strides = [1, 1]} : vector<1x256xf32> to vector<1x16xf32>
      %c14 = arith.constant 14 : index
      %c128_43 = arith.constant 128 : index
      %53 = vector.load %arg7[%c14, %c128_43] : memref<27x147xf32, #tpu.memory_space<vmem>>, vector<1x16xf32>
      tpu.vector_store %arg7[%c14, %c128_43], %52 {strides = array<i32>} : memref<27x147xf32, #tpu.memory_space<vmem>>, vector<1x16xf32>,
      %54 = vector.extract_strided_slice %23 {offsets = [0, 96], sizes = [1, 16], strides = [1, 1]} : vector<1x256xf32> to vector<1x16xf32>
      %c14_44 = arith.constant 14 : index
      %c128_45 = arith.constant 128 : index
      %55 = vector.load %arg8[%c14_44, %c128_45] : memref<27x147xf32, #tpu.memory_space<vmem>>, vector<1x16xf32>
      tpu.vector_store %arg8[%c14_44, %c128_45], %54 {strides = array<i32>} : memref<27x147xf32, #tpu.memory_space<vmem>>, vector<1x16xf32>,
      %56 = vector.extract_strided_slice %20 {offsets = [0, 112], sizes = [1, 16], strides = [1, 1]} : vector<1x256xf32> to vector<1x16xf32>
      %c15 = arith.constant 15 : index
      %c128_46 = arith.constant 128 : index
      %57 = vector.load %arg7[%c15, %c128_46] : memref<27x147xf32, #tpu.memory_space<vmem>>, vector<1x16xf32>
      tpu.vector_store %arg7[%c15, %c128_46], %56 {strides = array<i32>} : memref<27x147xf32, #tpu.memory_space<vmem>>, vector<1x16xf32>,
      %58 = vector.extract_strided_slice %23 {offsets = [0, 112], sizes = [1, 16], strides = [1, 1]} : vector<1x256xf32> to vector<1x16xf32>
      %c15_47 = arith.constant 15 : index
      %c128_48 = arith.constant 128 : index
      %59 = vector.load %arg8[%c15_47, %c128_48] : memref<27x147xf32, #tpu.memory_space<vmem>>, vector<1x16xf32>
      tpu.vector_store %arg8[%c15_47, %c128_48], %58 {strides = array<i32>} : memref<27x147xf32, #tpu.memory_space<vmem>>, vector<1x16xf32>,
      %60 = vector.extract_strided_slice %20 {offsets = [0, 128], sizes = [1, 16], strides = [1, 1]} : vector<1x256xf32> to vector<1x16xf32>
      %c16 = arith.constant 16 : index
      %c128_49 = arith.constant 128 : index
      %61 = vector.load %arg7[%c16, %c128_49] : memref<27x147xf32, #tpu.memory_space<vmem>>, vector<1x16xf32>
      tpu.vector_store %arg7[%c16, %c128_49], %60 {strides = array<i32>} : memref<27x147xf32, #tpu.memory_space<vmem>>, vector<1x16xf32>,
      %62 = vector.extract_strided_slice %23 {offsets = [0, 128], sizes = [1, 16], strides = [1, 1]} : vector<1x256xf32> to vector<1x16xf32>
      %c16_50 = arith.constant 16 : index
      %c128_51 = arith.constant 128 : index
      %63 = vector.load %arg8[%c16_50, %c128_51] : memref<27x147xf32, #tpu.memory_space<vmem>>, vector<1x16xf32>
      tpu.vector_store %arg8[%c16_50, %c128_51], %62 {strides = array<i32>} : memref<27x147xf32, #tpu.memory_space<vmem>>, vector<1x16xf32>,
      %64 = vector.extract_strided_slice %20 {offsets = [0, 144], sizes = [1, 16], strides = [1, 1]} : vector<1x256xf32> to vector<1x16xf32>
      %c17 = arith.constant 17 : index
      %c128_52 = arith.constant 128 : index
      %65 = vector.load %arg7[%c17, %c128_52] : memref<27x147xf32, #tpu.memory_space<vmem>>, vector<1x16xf32>
      tpu.vector_store %arg7[%c17, %c128_52], %64 {strides = array<i32>} : memref<27x147xf32, #tpu.memory_space<vmem>>, vector<1x16xf32>,
      %66 = vector.extract_strided_slice %23 {offsets = [0, 144], sizes = [1, 16], strides = [1, 1]} : vector<1x256xf32> to vector<1x16xf32>
      %c17_53 = arith.constant 17 : index
      %c128_54 = arith.constant 128 : index
      %67 = vector.load %arg8[%c17_53, %c128_54] : memref<27x147xf32, #tpu.memory_space<vmem>>, vector<1x16xf32>
      tpu.vector_store %arg8[%c17_53, %c128_54], %66 {strides = array<i32>} : memref<27x147xf32, #tpu.memory_space<vmem>>, vector<1x16xf32>,
      %68 = vector.extract_strided_slice %20 {offsets = [0, 160], sizes = [1, 16], strides = [1, 1]} : vector<1x256xf32> to vector<1x16xf32>
      %c18 = arith.constant 18 : index
      %c128_55 = arith.constant 128 : index
      %69 = vector.load %arg7[%c18, %c128_55] : memref<27x147xf32, #tpu.memory_space<vmem>>, vector<1x16xf32>
      tpu.vector_store %arg7[%c18, %c128_55], %68 {strides = array<i32>} : memref<27x147xf32, #tpu.memory_space<vmem>>, vector<1x16xf32>,
      %70 = vector.extract_strided_slice %23 {offsets = [0, 160], sizes = [1, 16], strides = [1, 1]} : vector<1x256xf32> to vector<1x16xf32>
      %c18_56 = arith.constant 18 : index
      %c128_57 = arith.constant 128 : index
      %71 = vector.load %arg8[%c18_56, %c128_57] : memref<27x147xf32, #tpu.memory_space<vmem>>, vector<1x16xf32>
      tpu.vector_store %arg8[%c18_56, %c128_57], %70 {strides = array<i32>} : memref<27x147xf32, #tpu.memory_space<vmem>>, vector<1x16xf32>,
      %72 = vector.extract_strided_slice %20 {offsets = [0, 176], sizes = [1, 16], strides = [1, 1]} : vector<1x256xf32> to vector<1x16xf32>
      %c19 = arith.constant 19 : index
      %c128_58 = arith.constant 128 : index
      %73 = vector.load %arg7[%c19, %c128_58] : memref<27x147xf32, #tpu.memory_space<vmem>>, vector<1x16xf32>
      tpu.vector_store %arg7[%c19, %c128_58], %72 {strides = array<i32>} : memref<27x147xf32, #tpu.memory_space<vmem>>, vector<1x16xf32>,
      %74 = vector.extract_strided_slice %23 {offsets = [0, 176], sizes = [1, 16], strides = [1, 1]} : vector<1x256xf32> to vector<1x16xf32>
      %c19_59 = arith.constant 19 : index
      %c128_60 = arith.constant 128 : index
      %75 = vector.load %arg8[%c19_59, %c128_60] : memref<27x147xf32, #tpu.memory_space<vmem>>, vector<1x16xf32>
      tpu.vector_store %arg8[%c19_59, %c128_60], %74 {strides = array<i32>} : memref<27x147xf32, #tpu.memory_space<vmem>>, vector<1x16xf32>,
      %76 = vector.extract_strided_slice %20 {offsets = [0, 192], sizes = [1, 16], strides = [1, 1]} : vector<1x256xf32> to vector<1x16xf32>
      %c20 = arith.constant 20 : index
      %c128_61 = arith.constant 128 : index
      %77 = vector.load %arg7[%c20, %c128_61] : memref<27x147xf32, #tpu.memory_space<vmem>>, vector<1x16xf32>
      tpu.vector_store %arg7[%c20, %c128_61], %76 {strides = array<i32>} : memref<27x147xf32, #tpu.memory_space<vmem>>, vector<1x16xf32>,
      %78 = vector.extract_strided_slice %23 {offsets = [0, 192], sizes = [1, 16], strides = [1, 1]} : vector<1x256xf32> to vector<1x16xf32>
      %c20_62 = arith.constant 20 : index
      %c128_63 = arith.constant 128 : index
      %79 = vector.load %arg8[%c20_62, %c128_63] : memref<27x147xf32, #tpu.memory_space<vmem>>, vector<1x16xf32>
      tpu.vector_store %arg8[%c20_62, %c128_63], %78 {strides = array<i32>} : memref<27x147xf32, #tpu.memory_space<vmem>>, vector<1x16xf32>,
      %80 = vector.extract_strided_slice %20 {offsets = [0, 208], sizes = [1, 16], strides = [1, 1]} : vector<1x256xf32> to vector<1x16xf32>
      %c21 = arith.constant 21 : index
      %c128_64 = arith.constant 128 : index
      %81 = vector.load %arg7[%c21, %c128_64] : memref<27x147xf32, #tpu.memory_space<vmem>>, vector<1x16xf32>
      tpu.vector_store %arg7[%c21, %c128_64], %80 {strides = array<i32>} : memref<27x147xf32, #tpu.memory_space<vmem>>, vector<1x16xf32>,
      %82 = vector.extract_strided_slice %23 {offsets = [0, 208], sizes = [1, 16], strides = [1, 1]} : vector<1x256xf32> to vector<1x16xf32>
      %c21_65 = arith.constant 21 : index
      %c128_66 = arith.constant 128 : index
      %83 = vector.load %arg8[%c21_65, %c128_66] : memref<27x147xf32, #tpu.memory_space<vmem>>, vector<1x16xf32>
      tpu.vector_store %arg8[%c21_65, %c128_66], %82 {strides = array<i32>} : memref<27x147xf32, #tpu.memory_space<vmem>>, vector<1x16xf32>,
      %84 = vector.extract_strided_slice %20 {offsets = [0, 224], sizes = [1, 16], strides = [1, 1]} : vector<1x256xf32> to vector<1x16xf32>
      %c22 = arith.constant 22 : index
      %c128_67 = arith.constant 128 : index
      %85 = vector.load %arg7[%c22, %c128_67] : memref<27x147xf32, #tpu.memory_space<vmem>>, vector<1x16xf32>
      tpu.vector_store %arg7[%c22, %c128_67], %84 {strides = array<i32>} : memref<27x147xf32, #tpu.memory_space<vmem>>, vector<1x16xf32>,
      %86 = vector.extract_strided_slice %23 {offsets = [0, 224], sizes = [1, 16], strides = [1, 1]} : vector<1x256xf32> to vector<1x16xf32>
      %c22_68 = arith.constant 22 : index
      %c128_69 = arith.constant 128 : index
      %87 = vector.load %arg8[%c22_68, %c128_69] : memref<27x147xf32, #tpu.memory_space<vmem>>, vector<1x16xf32>
      tpu.vector_store %arg8[%c22_68, %c128_69], %86 {strides = array<i32>} : memref<27x147xf32, #tpu.memory_space<vmem>>, vector<1x16xf32>,
      %88 = vector.extract_strided_slice %20 {offsets = [0, 240], sizes = [1, 16], strides = [1, 1]} : vector<1x256xf32> to vector<1x16xf32>
      %c23 = arith.constant 23 : index
      %c128_70 = arith.constant 128 : index
      %89 = vector.load %arg7[%c23, %c128_70] : memref<27x147xf32, #tpu.memory_space<vmem>>, vector<1x16xf32>
      tpu.vector_store %arg7[%c23, %c128_70], %88 {strides = array<i32>} : memref<27x147xf32, #tpu.memory_space<vmem>>, vector<1x16xf32>,
      %90 = vector.extract_strided_slice %23 {offsets = [0, 240], sizes = [1, 16], strides = [1, 1]} : vector<1x256xf32> to vector<1x16xf32>
      %c23_71 = arith.constant 23 : index
      %c128_72 = arith.constant 128 : index
      %91 = vector.load %arg8[%c23_71, %c128_72] : memref<27x147xf32, #tpu.memory_space<vmem>>, vector<1x16xf32>
      tpu.vector_store %arg8[%c23_71, %c128_72], %90 {strides = array<i32>} : memref<27x147xf32, #tpu.memory_space<vmem>>, vector<1x16xf32>,
      %c0_73 = arith.constant 0 : index
      %c0_74 = arith.constant 0 : index
      %92 = vector.load %arg7[%c0_73, %c0_74] : memref<27x147xf32, #tpu.memory_space<vmem>>, vector<27x147xf32>
      %c0_75 = arith.constant 0 : index
      %c0_76 = arith.constant 0 : index
      %93 = vector.load %arg8[%c0_75, %c0_76] : memref<27x147xf32, #tpu.memory_space<vmem>>, vector<27x147xf32>
      %94 = vector.extract_strided_slice %92 {offsets = [5, 125], sizes = [22, 16], strides = [1, 1]} : vector<27x147xf32> to vector<22x16xf32>
      %95 = vector.extract_strided_slice %92 {offsets = [5, 126], sizes = [22, 16], strides = [1, 1]} : vector<27x147xf32> to vector<22x16xf32>
      %96 = vector.extract_strided_slice %92 {offsets = [5, 127], sizes = [22, 16], strides = [1, 1]} : vector<27x147xf32> to vector<22x16xf32>
      %97 = vector.extract_strided_slice %92 {offsets = [5, 128], sizes = [22, 16], strides = [1, 1]} : vector<27x147xf32> to vector<22x16xf32>
      %98 = vector.extract_strided_slice %92 {offsets = [5, 129], sizes = [22, 16], strides = [1, 1]} : vector<27x147xf32> to vector<22x16xf32>
      %99 = vector.extract_strided_slice %92 {offsets = [5, 130], sizes = [22, 16], strides = [1, 1]} : vector<27x147xf32> to vector<22x16xf32>
      %100 = vector.extract_strided_slice %92 {offsets = [5, 131], sizes = [22, 16], strides = [1, 1]} : vector<27x147xf32> to vector<22x16xf32>
      %101 = vector.extract_strided_slice %93 {offsets = [5, 125], sizes = [22, 16], strides = [1, 1]} : vector<27x147xf32> to vector<22x16xf32>
      %102 = vector.extract_strided_slice %93 {offsets = [5, 126], sizes = [22, 16], strides = [1, 1]} : vector<27x147xf32> to vector<22x16xf32>
      %103 = vector.extract_strided_slice %93 {offsets = [5, 127], sizes = [22, 16], strides = [1, 1]} : vector<27x147xf32> to vector<22x16xf32>
      %104 = vector.extract_strided_slice %93 {offsets = [5, 128], sizes = [22, 16], strides = [1, 1]} : vector<27x147xf32> to vector<22x16xf32>
      %105 = vector.extract_strided_slice %93 {offsets = [5, 129], sizes = [22, 16], strides = [1, 1]} : vector<27x147xf32> to vector<22x16xf32>
      %106 = vector.extract_strided_slice %93 {offsets = [5, 130], sizes = [22, 16], strides = [1, 1]} : vector<27x147xf32> to vector<22x16xf32>
      %107 = vector.extract_strided_slice %93 {offsets = [5, 131], sizes = [22, 16], strides = [1, 1]} : vector<27x147xf32> to vector<22x16xf32>
      %c0_77 = arith.constant 0 : index
      %108 = memref.load %arg3[%c0_77] : memref<98xf32, #tpu.memory_space<smem>>
      %109 = vector.broadcast %108 : f32 to vector<22x16xf32>
      %110 = arith.mulf %109, %94 : vector<22x16xf32>
      %c49 = arith.constant 49 : index
      %111 = memref.load %arg3[%c49] : memref<98xf32, #tpu.memory_space<smem>>
      %112 = vector.broadcast %111 : f32 to vector<22x16xf32>
      %113 = arith.mulf %112, %101 : vector<22x16xf32>
      %c1 = arith.constant 1 : index
      %114 = memref.load %arg3[%c1] : memref<98xf32, #tpu.memory_space<smem>>
      %115 = vector.broadcast %114 : f32 to vector<22x16xf32>
      %116 = arith.mulf %115, %95 : vector<22x16xf32>
      %117 = arith.addf %110, %116 : vector<22x16xf32>
      %c50 = arith.constant 50 : index
      %118 = memref.load %arg3[%c50] : memref<98xf32, #tpu.memory_space<smem>>
      %119 = vector.broadcast %118 : f32 to vector<22x16xf32>
      %120 = arith.mulf %119, %102 : vector<22x16xf32>
      %121 = arith.addf %113, %120 : vector<22x16xf32>
      %c2 = arith.constant 2 : index
      %122 = memref.load %arg3[%c2] : memref<98xf32, #tpu.memory_space<smem>>
      %123 = vector.broadcast %122 : f32 to vector<22x16xf32>
      %124 = arith.mulf %123, %96 : vector<22x16xf32>
      %125 = arith.addf %117, %124 : vector<22x16xf32>
      %c51 = arith.constant 51 : index
      %126 = memref.load %arg3[%c51] : memref<98xf32, #tpu.memory_space<smem>>
      %127 = vector.broadcast %126 : f32 to vector<22x16xf32>
      %128 = arith.mulf %127, %103 : vector<22x16xf32>
      %129 = arith.addf %121, %128 : vector<22x16xf32>
      %c3 = arith.constant 3 : index
      %130 = memref.load %arg3[%c3] : memref<98xf32, #tpu.memory_space<smem>>
      %131 = vector.broadcast %130 : f32 to vector<22x16xf32>
      %132 = arith.mulf %131, %97 : vector<22x16xf32>
      %133 = arith.addf %125, %132 : vector<22x16xf32>
      %c52 = arith.constant 52 : index
      %134 = memref.load %arg3[%c52] : memref<98xf32, #tpu.memory_space<smem>>
      %135 = vector.broadcast %134 : f32 to vector<22x16xf32>
      %136 = arith.mulf %135, %104 : vector<22x16xf32>
      %137 = arith.addf %129, %136 : vector<22x16xf32>
      %c4 = arith.constant 4 : index
      %138 = memref.load %arg3[%c4] : memref<98xf32, #tpu.memory_space<smem>>
      %139 = vector.broadcast %138 : f32 to vector<22x16xf32>
      %140 = arith.mulf %139, %98 : vector<22x16xf32>
      %141 = arith.addf %133, %140 : vector<22x16xf32>
      %c53 = arith.constant 53 : index
      %142 = memref.load %arg3[%c53] : memref<98xf32, #tpu.memory_space<smem>>
      %143 = vector.broadcast %142 : f32 to vector<22x16xf32>
      %144 = arith.mulf %143, %105 : vector<22x16xf32>
      %145 = arith.addf %137, %144 : vector<22x16xf32>
      %c5 = arith.constant 5 : index
      %146 = memref.load %arg3[%c5] : memref<98xf32, #tpu.memory_space<smem>>
      %147 = vector.broadcast %146 : f32 to vector<22x16xf32>
      %148 = arith.mulf %147, %99 : vector<22x16xf32>
      %149 = arith.addf %141, %148 : vector<22x16xf32>
      %c54 = arith.constant 54 : index
      %150 = memref.load %arg3[%c54] : memref<98xf32, #tpu.memory_space<smem>>
      %151 = vector.broadcast %150 : f32 to vector<22x16xf32>
      %152 = arith.mulf %151, %106 : vector<22x16xf32>
      %153 = arith.addf %145, %152 : vector<22x16xf32>
      %c6 = arith.constant 6 : index
      %154 = memref.load %arg3[%c6] : memref<98xf32, #tpu.memory_space<smem>>
      %155 = vector.broadcast %154 : f32 to vector<22x16xf32>
      %156 = arith.mulf %155, %100 : vector<22x16xf32>
      %157 = arith.addf %149, %156 : vector<22x16xf32>
      %c55 = arith.constant 55 : index
      %158 = memref.load %arg3[%c55] : memref<98xf32, #tpu.memory_space<smem>>
      %159 = vector.broadcast %158 : f32 to vector<22x16xf32>
      %160 = arith.mulf %159, %107 : vector<22x16xf32>
      %161 = arith.addf %153, %160 : vector<22x16xf32>
      %162 = arith.addf %157, %161 : vector<22x16xf32>
      %163 = vector.extract_strided_slice %162 {offsets = [0, 0], sizes = [16, 16], strides = [1, 1]} : vector<22x16xf32> to vector<16x16xf32>
      %c7 = arith.constant 7 : index
      %164 = memref.load %arg3[%c7] : memref<98xf32, #tpu.memory_space<smem>>
      %165 = vector.broadcast %164 : f32 to vector<22x16xf32>
      %166 = arith.mulf %165, %94 : vector<22x16xf32>
      %c56 = arith.constant 56 : index
      %167 = memref.load %arg3[%c56] : memref<98xf32, #tpu.memory_space<smem>>
      %168 = vector.broadcast %167 : f32 to vector<22x16xf32>
      %169 = arith.mulf %168, %101 : vector<22x16xf32>
      %c8_78 = arith.constant 8 : index
      %170 = memref.load %arg3[%c8_78] : memref<98xf32, #tpu.memory_space<smem>>
      %171 = vector.broadcast %170 : f32 to vector<22x16xf32>
      %172 = arith.mulf %171, %95 : vector<22x16xf32>
      %173 = arith.addf %166, %172 : vector<22x16xf32>
      %c57 = arith.constant 57 : index
      %174 = memref.load %arg3[%c57] : memref<98xf32, #tpu.memory_space<smem>>
      %175 = vector.broadcast %174 : f32 to vector<22x16xf32>
      %176 = arith.mulf %175, %102 : vector<22x16xf32>
      %177 = arith.addf %169, %176 : vector<22x16xf32>
      %c9_79 = arith.constant 9 : index
      %178 = memref.load %arg3[%c9_79] : memref<98xf32, #tpu.memory_space<smem>>
      %179 = vector.broadcast %178 : f32 to vector<22x16xf32>
      %180 = arith.mulf %179, %96 : vector<22x16xf32>
      %181 = arith.addf %173, %180 : vector<22x16xf32>
      %c58 = arith.constant 58 : index
      %182 = memref.load %arg3[%c58] : memref<98xf32, #tpu.memory_space<smem>>
      %183 = vector.broadcast %182 : f32 to vector<22x16xf32>
      %184 = arith.mulf %183, %103 : vector<22x16xf32>
      %185 = arith.addf %177, %184 : vector<22x16xf32>
      %c10_80 = arith.constant 10 : index
      %186 = memref.load %arg3[%c10_80] : memref<98xf32, #tpu.memory_space<smem>>
      %187 = vector.broadcast %186 : f32 to vector<22x16xf32>
      %188 = arith.mulf %187, %97 : vector<22x16xf32>
      %189 = arith.addf %181, %188 : vector<22x16xf32>
      %c59 = arith.constant 59 : index
      %190 = memref.load %arg3[%c59] : memref<98xf32, #tpu.memory_space<smem>>
      %191 = vector.broadcast %190 : f32 to vector<22x16xf32>
      %192 = arith.mulf %191, %104 : vector<22x16xf32>
      %193 = arith.addf %185, %192 : vector<22x16xf32>
      %c11_81 = arith.constant 11 : index
      %194 = memref.load %arg3[%c11_81] : memref<98xf32, #tpu.memory_space<smem>>
      %195 = vector.broadcast %194 : f32 to vector<22x16xf32>
      %196 = arith.mulf %195, %98 : vector<22x16xf32>
      %197 = arith.addf %189, %196 : vector<22x16xf32>
      %c60 = arith.constant 60 : index
      %198 = memref.load %arg3[%c60] : memref<98xf32, #tpu.memory_space<smem>>
      %199 = vector.broadcast %198 : f32 to vector<22x16xf32>
      %200 = arith.mulf %199, %105 : vector<22x16xf32>
      %201 = arith.addf %193, %200 : vector<22x16xf32>
      %c12_82 = arith.constant 12 : index
      %202 = memref.load %arg3[%c12_82] : memref<98xf32, #tpu.memory_space<smem>>
      %203 = vector.broadcast %202 : f32 to vector<22x16xf32>
      %204 = arith.mulf %203, %99 : vector<22x16xf32>
      %205 = arith.addf %197, %204 : vector<22x16xf32>
      %c61 = arith.constant 61 : index
      %206 = memref.load %arg3[%c61] : memref<98xf32, #tpu.memory_space<smem>>
      %207 = vector.broadcast %206 : f32 to vector<22x16xf32>
      %208 = arith.mulf %207, %106 : vector<22x16xf32>
      %209 = arith.addf %201, %208 : vector<22x16xf32>
      %c13_83 = arith.constant 13 : index
      %210 = memref.load %arg3[%c13_83] : memref<98xf32, #tpu.memory_space<smem>>
      %211 = vector.broadcast %210 : f32 to vector<22x16xf32>
      %212 = arith.mulf %211, %100 : vector<22x16xf32>
      %213 = arith.addf %205, %212 : vector<22x16xf32>
      %c62 = arith.constant 62 : index
      %214 = memref.load %arg3[%c62] : memref<98xf32, #tpu.memory_space<smem>>
      %215 = vector.broadcast %214 : f32 to vector<22x16xf32>
      %216 = arith.mulf %215, %107 : vector<22x16xf32>
      %217 = arith.addf %209, %216 : vector<22x16xf32>
      %218 = arith.addf %213, %217 : vector<22x16xf32>
      %219 = vector.extract_strided_slice %218 {offsets = [1, 0], sizes = [16, 16], strides = [1, 1]} : vector<22x16xf32> to vector<16x16xf32>
      %c14_84 = arith.constant 14 : index
      %220 = memref.load %arg3[%c14_84] : memref<98xf32, #tpu.memory_space<smem>>
      %221 = vector.broadcast %220 : f32 to vector<22x16xf32>
      %222 = arith.mulf %221, %94 : vector<22x16xf32>
      %c63 = arith.constant 63 : index
      %223 = memref.load %arg3[%c63] : memref<98xf32, #tpu.memory_space<smem>>
      %224 = vector.broadcast %223 : f32 to vector<22x16xf32>
      %225 = arith.mulf %224, %101 : vector<22x16xf32>
      %c15_85 = arith.constant 15 : index
      %226 = memref.load %arg3[%c15_85] : memref<98xf32, #tpu.memory_space<smem>>
      %227 = vector.broadcast %226 : f32 to vector<22x16xf32>
      %228 = arith.mulf %227, %95 : vector<22x16xf32>
      %229 = arith.addf %222, %228 : vector<22x16xf32>
      %c64 = arith.constant 64 : index
      %230 = memref.load %arg3[%c64] : memref<98xf32, #tpu.memory_space<smem>>
      %231 = vector.broadcast %230 : f32 to vector<22x16xf32>
      %232 = arith.mulf %231, %102 : vector<22x16xf32>
      %233 = arith.addf %225, %232 : vector<22x16xf32>
      %c16_86 = arith.constant 16 : index
      %234 = memref.load %arg3[%c16_86] : memref<98xf32, #tpu.memory_space<smem>>
      %235 = vector.broadcast %234 : f32 to vector<22x16xf32>
      %236 = arith.mulf %235, %96 : vector<22x16xf32>
      %237 = arith.addf %229, %236 : vector<22x16xf32>
      %c65 = arith.constant 65 : index
      %238 = memref.load %arg3[%c65] : memref<98xf32, #tpu.memory_space<smem>>
      %239 = vector.broadcast %238 : f32 to vector<22x16xf32>
      %240 = arith.mulf %239, %103 : vector<22x16xf32>
      %241 = arith.addf %233, %240 : vector<22x16xf32>
      %c17_87 = arith.constant 17 : index
      %242 = memref.load %arg3[%c17_87] : memref<98xf32, #tpu.memory_space<smem>>
      %243 = vector.broadcast %242 : f32 to vector<22x16xf32>
      %244 = arith.mulf %243, %97 : vector<22x16xf32>
      %245 = arith.addf %237, %244 : vector<22x16xf32>
      %c66 = arith.constant 66 : index
      %246 = memref.load %arg3[%c66] : memref<98xf32, #tpu.memory_space<smem>>
      %247 = vector.broadcast %246 : f32 to vector<22x16xf32>
      %248 = arith.mulf %247, %104 : vector<22x16xf32>
      %249 = arith.addf %241, %248 : vector<22x16xf32>
      %c18_88 = arith.constant 18 : index
      %250 = memref.load %arg3[%c18_88] : memref<98xf32, #tpu.memory_space<smem>>
      %251 = vector.broadcast %250 : f32 to vector<22x16xf32>
      %252 = arith.mulf %251, %98 : vector<22x16xf32>
      %253 = arith.addf %245, %252 : vector<22x16xf32>
      %c67 = arith.constant 67 : index
      %254 = memref.load %arg3[%c67] : memref<98xf32, #tpu.memory_space<smem>>
      %255 = vector.broadcast %254 : f32 to vector<22x16xf32>
      %256 = arith.mulf %255, %105 : vector<22x16xf32>
      %257 = arith.addf %249, %256 : vector<22x16xf32>
      %c19_89 = arith.constant 19 : index
      %258 = memref.load %arg3[%c19_89] : memref<98xf32, #tpu.memory_space<smem>>
      %259 = vector.broadcast %258 : f32 to vector<22x16xf32>
      %260 = arith.mulf %259, %99 : vector<22x16xf32>
      %261 = arith.addf %253, %260 : vector<22x16xf32>
      %c68 = arith.constant 68 : index
      %262 = memref.load %arg3[%c68] : memref<98xf32, #tpu.memory_space<smem>>
      %263 = vector.broadcast %262 : f32 to vector<22x16xf32>
      %264 = arith.mulf %263, %106 : vector<22x16xf32>
      %265 = arith.addf %257, %264 : vector<22x16xf32>
      %c20_90 = arith.constant 20 : index
      %266 = memref.load %arg3[%c20_90] : memref<98xf32, #tpu.memory_space<smem>>
      %267 = vector.broadcast %266 : f32 to vector<22x16xf32>
      %268 = arith.mulf %267, %100 : vector<22x16xf32>
      %269 = arith.addf %261, %268 : vector<22x16xf32>
      %c69 = arith.constant 69 : index
      %270 = memref.load %arg3[%c69] : memref<98xf32, #tpu.memory_space<smem>>
      %271 = vector.broadcast %270 : f32 to vector<22x16xf32>
      %272 = arith.mulf %271, %107 : vector<22x16xf32>
      %273 = arith.addf %265, %272 : vector<22x16xf32>
      %274 = arith.addf %269, %273 : vector<22x16xf32>
      %275 = vector.extract_strided_slice %274 {offsets = [2, 0], sizes = [16, 16], strides = [1, 1]} : vector<22x16xf32> to vector<16x16xf32>
      %c21_91 = arith.constant 21 : index
      %276 = memref.load %arg3[%c21_91] : memref<98xf32, #tpu.memory_space<smem>>
      %277 = vector.broadcast %276 : f32 to vector<22x16xf32>
      %278 = arith.mulf %277, %94 : vector<22x16xf32>
      %c70 = arith.constant 70 : index
      %279 = memref.load %arg3[%c70] : memref<98xf32, #tpu.memory_space<smem>>
      %280 = vector.broadcast %279 : f32 to vector<22x16xf32>
      %281 = arith.mulf %280, %101 : vector<22x16xf32>
      %c22_92 = arith.constant 22 : index
      %282 = memref.load %arg3[%c22_92] : memref<98xf32, #tpu.memory_space<smem>>
      %283 = vector.broadcast %282 : f32 to vector<22x16xf32>
      %284 = arith.mulf %283, %95 : vector<22x16xf32>
      %285 = arith.addf %278, %284 : vector<22x16xf32>
      %c71 = arith.constant 71 : index
      %286 = memref.load %arg3[%c71] : memref<98xf32, #tpu.memory_space<smem>>
      %287 = vector.broadcast %286 : f32 to vector<22x16xf32>
      %288 = arith.mulf %287, %102 : vector<22x16xf32>
      %289 = arith.addf %281, %288 : vector<22x16xf32>
      %c23_93 = arith.constant 23 : index
      %290 = memref.load %arg3[%c23_93] : memref<98xf32, #tpu.memory_space<smem>>
      %291 = vector.broadcast %290 : f32 to vector<22x16xf32>
      %292 = arith.mulf %291, %96 : vector<22x16xf32>
      %293 = arith.addf %285, %292 : vector<22x16xf32>
      %c72 = arith.constant 72 : index
      %294 = memref.load %arg3[%c72] : memref<98xf32, #tpu.memory_space<smem>>
      %295 = vector.broadcast %294 : f32 to vector<22x16xf32>
      %296 = arith.mulf %295, %103 : vector<22x16xf32>
      %297 = arith.addf %289, %296 : vector<22x16xf32>
      %c24 = arith.constant 24 : index
      %298 = memref.load %arg3[%c24] : memref<98xf32, #tpu.memory_space<smem>>
      %299 = vector.broadcast %298 : f32 to vector<22x16xf32>
      %300 = arith.mulf %299, %97 : vector<22x16xf32>
      %301 = arith.addf %293, %300 : vector<22x16xf32>
      %c73 = arith.constant 73 : index
      %302 = memref.load %arg3[%c73] : memref<98xf32, #tpu.memory_space<smem>>
      %303 = vector.broadcast %302 : f32 to vector<22x16xf32>
      %304 = arith.mulf %303, %104 : vector<22x16xf32>
      %305 = arith.addf %297, %304 : vector<22x16xf32>
      %c25 = arith.constant 25 : index
      %306 = memref.load %arg3[%c25] : memref<98xf32, #tpu.memory_space<smem>>
      %307 = vector.broadcast %306 : f32 to vector<22x16xf32>
      %308 = arith.mulf %307, %98 : vector<22x16xf32>
      %309 = arith.addf %301, %308 : vector<22x16xf32>
      %c74 = arith.constant 74 : index
      %310 = memref.load %arg3[%c74] : memref<98xf32, #tpu.memory_space<smem>>
      %311 = vector.broadcast %310 : f32 to vector<22x16xf32>
      %312 = arith.mulf %311, %105 : vector<22x16xf32>
      %313 = arith.addf %305, %312 : vector<22x16xf32>
      %c26 = arith.constant 26 : index
      %314 = memref.load %arg3[%c26] : memref<98xf32, #tpu.memory_space<smem>>
      %315 = vector.broadcast %314 : f32 to vector<22x16xf32>
      %316 = arith.mulf %315, %99 : vector<22x16xf32>
      %317 = arith.addf %309, %316 : vector<22x16xf32>
      %c75 = arith.constant 75 : index
      %318 = memref.load %arg3[%c75] : memref<98xf32, #tpu.memory_space<smem>>
      %319 = vector.broadcast %318 : f32 to vector<22x16xf32>
      %320 = arith.mulf %319, %106 : vector<22x16xf32>
      %321 = arith.addf %313, %320 : vector<22x16xf32>
      %c27 = arith.constant 27 : index
      %322 = memref.load %arg3[%c27] : memref<98xf32, #tpu.memory_space<smem>>
      %323 = vector.broadcast %322 : f32 to vector<22x16xf32>
      %324 = arith.mulf %323, %100 : vector<22x16xf32>
      %325 = arith.addf %317, %324 : vector<22x16xf32>
      %c76 = arith.constant 76 : index
      %326 = memref.load %arg3[%c76] : memref<98xf32, #tpu.memory_space<smem>>
      %327 = vector.broadcast %326 : f32 to vector<22x16xf32>
      %328 = arith.mulf %327, %107 : vector<22x16xf32>
      %329 = arith.addf %321, %328 : vector<22x16xf32>
      %330 = arith.addf %325, %329 : vector<22x16xf32>
      %331 = vector.extract_strided_slice %330 {offsets = [3, 0], sizes = [16, 16], strides = [1, 1]} : vector<22x16xf32> to vector<16x16xf32>
      %c28 = arith.constant 28 : index
      %332 = memref.load %arg3[%c28] : memref<98xf32, #tpu.memory_space<smem>>
      %333 = vector.broadcast %332 : f32 to vector<22x16xf32>
      %334 = arith.mulf %333, %94 : vector<22x16xf32>
      %c77 = arith.constant 77 : index
      %335 = memref.load %arg3[%c77] : memref<98xf32, #tpu.memory_space<smem>>
      %336 = vector.broadcast %335 : f32 to vector<22x16xf32>
      %337 = arith.mulf %336, %101 : vector<22x16xf32>
      %c29 = arith.constant 29 : index
      %338 = memref.load %arg3[%c29] : memref<98xf32, #tpu.memory_space<smem>>
      %339 = vector.broadcast %338 : f32 to vector<22x16xf32>
      %340 = arith.mulf %339, %95 : vector<22x16xf32>
      %341 = arith.addf %334, %340 : vector<22x16xf32>
      %c78 = arith.constant 78 : index
      %342 = memref.load %arg3[%c78] : memref<98xf32, #tpu.memory_space<smem>>
      %343 = vector.broadcast %342 : f32 to vector<22x16xf32>
      %344 = arith.mulf %343, %102 : vector<22x16xf32>
      %345 = arith.addf %337, %344 : vector<22x16xf32>
      %c30 = arith.constant 30 : index
      %346 = memref.load %arg3[%c30] : memref<98xf32, #tpu.memory_space<smem>>
      %347 = vector.broadcast %346 : f32 to vector<22x16xf32>
      %348 = arith.mulf %347, %96 : vector<22x16xf32>
      %349 = arith.addf %341, %348 : vector<22x16xf32>
      %c79 = arith.constant 79 : index
      %350 = memref.load %arg3[%c79] : memref<98xf32, #tpu.memory_space<smem>>
      %351 = vector.broadcast %350 : f32 to vector<22x16xf32>
      %352 = arith.mulf %351, %103 : vector<22x16xf32>
      %353 = arith.addf %345, %352 : vector<22x16xf32>
      %c31 = arith.constant 31 : index
      %354 = memref.load %arg3[%c31] : memref<98xf32, #tpu.memory_space<smem>>
      %355 = vector.broadcast %354 : f32 to vector<22x16xf32>
      %356 = arith.mulf %355, %97 : vector<22x16xf32>
      %357 = arith.addf %349, %356 : vector<22x16xf32>
      %c80 = arith.constant 80 : index
      %358 = memref.load %arg3[%c80] : memref<98xf32, #tpu.memory_space<smem>>
      %359 = vector.broadcast %358 : f32 to vector<22x16xf32>
      %360 = arith.mulf %359, %104 : vector<22x16xf32>
      %361 = arith.addf %353, %360 : vector<22x16xf32>
      %c32 = arith.constant 32 : index
      %362 = memref.load %arg3[%c32] : memref<98xf32, #tpu.memory_space<smem>>
      %363 = vector.broadcast %362 : f32 to vector<22x16xf32>
      %364 = arith.mulf %363, %98 : vector<22x16xf32>
      %365 = arith.addf %357, %364 : vector<22x16xf32>
      %c81 = arith.constant 81 : index
      %366 = memref.load %arg3[%c81] : memref<98xf32, #tpu.memory_space<smem>>
      %367 = vector.broadcast %366 : f32 to vector<22x16xf32>
      %368 = arith.mulf %367, %105 : vector<22x16xf32>
      %369 = arith.addf %361, %368 : vector<22x16xf32>
      %c33 = arith.constant 33 : index
      %370 = memref.load %arg3[%c33] : memref<98xf32, #tpu.memory_space<smem>>
      %371 = vector.broadcast %370 : f32 to vector<22x16xf32>
      %372 = arith.mulf %371, %99 : vector<22x16xf32>
      %373 = arith.addf %365, %372 : vector<22x16xf32>
      %c82 = arith.constant 82 : index
      %374 = memref.load %arg3[%c82] : memref<98xf32, #tpu.memory_space<smem>>
      %375 = vector.broadcast %374 : f32 to vector<22x16xf32>
      %376 = arith.mulf %375, %106 : vector<22x16xf32>
      %377 = arith.addf %369, %376 : vector<22x16xf32>
      %c34 = arith.constant 34 : index
      %378 = memref.load %arg3[%c34] : memref<98xf32, #tpu.memory_space<smem>>
      %379 = vector.broadcast %378 : f32 to vector<22x16xf32>
      %380 = arith.mulf %379, %100 : vector<22x16xf32>
      %381 = arith.addf %373, %380 : vector<22x16xf32>
      %c83 = arith.constant 83 : index
      %382 = memref.load %arg3[%c83] : memref<98xf32, #tpu.memory_space<smem>>
      %383 = vector.broadcast %382 : f32 to vector<22x16xf32>
      %384 = arith.mulf %383, %107 : vector<22x16xf32>
      %385 = arith.addf %377, %384 : vector<22x16xf32>
      %386 = arith.addf %381, %385 : vector<22x16xf32>
      %387 = vector.extract_strided_slice %386 {offsets = [4, 0], sizes = [16, 16], strides = [1, 1]} : vector<22x16xf32> to vector<16x16xf32>
      %c35 = arith.constant 35 : index
      %388 = memref.load %arg3[%c35] : memref<98xf32, #tpu.memory_space<smem>>
      %389 = vector.broadcast %388 : f32 to vector<22x16xf32>
      %390 = arith.mulf %389, %94 : vector<22x16xf32>
      %c84 = arith.constant 84 : index
      %391 = memref.load %arg3[%c84] : memref<98xf32, #tpu.memory_space<smem>>
      %392 = vector.broadcast %391 : f32 to vector<22x16xf32>
      %393 = arith.mulf %392, %101 : vector<22x16xf32>
      %c36 = arith.constant 36 : index
      %394 = memref.load %arg3[%c36] : memref<98xf32, #tpu.memory_space<smem>>
      %395 = vector.broadcast %394 : f32 to vector<22x16xf32>
      %396 = arith.mulf %395, %95 : vector<22x16xf32>
      %397 = arith.addf %390, %396 : vector<22x16xf32>
      %c85 = arith.constant 85 : index
      %398 = memref.load %arg3[%c85] : memref<98xf32, #tpu.memory_space<smem>>
      %399 = vector.broadcast %398 : f32 to vector<22x16xf32>
      %400 = arith.mulf %399, %102 : vector<22x16xf32>
      %401 = arith.addf %393, %400 : vector<22x16xf32>
      %c37 = arith.constant 37 : index
      %402 = memref.load %arg3[%c37] : memref<98xf32, #tpu.memory_space<smem>>
      %403 = vector.broadcast %402 : f32 to vector<22x16xf32>
      %404 = arith.mulf %403, %96 : vector<22x16xf32>
      %405 = arith.addf %397, %404 : vector<22x16xf32>
      %c86 = arith.constant 86 : index
      %406 = memref.load %arg3[%c86] : memref<98xf32, #tpu.memory_space<smem>>
      %407 = vector.broadcast %406 : f32 to vector<22x16xf32>
      %408 = arith.mulf %407, %103 : vector<22x16xf32>
      %409 = arith.addf %401, %408 : vector<22x16xf32>
      %c38 = arith.constant 38 : index
      %410 = memref.load %arg3[%c38] : memref<98xf32, #tpu.memory_space<smem>>
      %411 = vector.broadcast %410 : f32 to vector<22x16xf32>
      %412 = arith.mulf %411, %97 : vector<22x16xf32>
      %413 = arith.addf %405, %412 : vector<22x16xf32>
      %c87 = arith.constant 87 : index
      %414 = memref.load %arg3[%c87] : memref<98xf32, #tpu.memory_space<smem>>
      %415 = vector.broadcast %414 : f32 to vector<22x16xf32>
      %416 = arith.mulf %415, %104 : vector<22x16xf32>
      %417 = arith.addf %409, %416 : vector<22x16xf32>
      %c39 = arith.constant 39 : index
      %418 = memref.load %arg3[%c39] : memref<98xf32, #tpu.memory_space<smem>>
      %419 = vector.broadcast %418 : f32 to vector<22x16xf32>
      %420 = arith.mulf %419, %98 : vector<22x16xf32>
      %421 = arith.addf %413, %420 : vector<22x16xf32>
      %c88 = arith.constant 88 : index
      %422 = memref.load %arg3[%c88] : memref<98xf32, #tpu.memory_space<smem>>
      %423 = vector.broadcast %422 : f32 to vector<22x16xf32>
      %424 = arith.mulf %423, %105 : vector<22x16xf32>
      %425 = arith.addf %417, %424 : vector<22x16xf32>
      %c40 = arith.constant 40 : index
      %426 = memref.load %arg3[%c40] : memref<98xf32, #tpu.memory_space<smem>>
      %427 = vector.broadcast %426 : f32 to vector<22x16xf32>
      %428 = arith.mulf %427, %99 : vector<22x16xf32>
      %429 = arith.addf %421, %428 : vector<22x16xf32>
      %c89 = arith.constant 89 : index
      %430 = memref.load %arg3[%c89] : memref<98xf32, #tpu.memory_space<smem>>
      %431 = vector.broadcast %430 : f32 to vector<22x16xf32>
      %432 = arith.mulf %431, %106 : vector<22x16xf32>
      %433 = arith.addf %425, %432 : vector<22x16xf32>
      %c41 = arith.constant 41 : index
      %434 = memref.load %arg3[%c41] : memref<98xf32, #tpu.memory_space<smem>>
      %435 = vector.broadcast %434 : f32 to vector<22x16xf32>
      %436 = arith.mulf %435, %100 : vector<22x16xf32>
      %437 = arith.addf %429, %436 : vector<22x16xf32>
      %c90 = arith.constant 90 : index
      %438 = memref.load %arg3[%c90] : memref<98xf32, #tpu.memory_space<smem>>
      %439 = vector.broadcast %438 : f32 to vector<22x16xf32>
      %440 = arith.mulf %439, %107 : vector<22x16xf32>
      %441 = arith.addf %433, %440 : vector<22x16xf32>
      %442 = arith.addf %437, %441 : vector<22x16xf32>
      %443 = vector.extract_strided_slice %442 {offsets = [5, 0], sizes = [16, 16], strides = [1, 1]} : vector<22x16xf32> to vector<16x16xf32>
      %c42 = arith.constant 42 : index
      %444 = memref.load %arg3[%c42] : memref<98xf32, #tpu.memory_space<smem>>
      %445 = vector.broadcast %444 : f32 to vector<22x16xf32>
      %446 = arith.mulf %445, %94 : vector<22x16xf32>
      %c91 = arith.constant 91 : index
      %447 = memref.load %arg3[%c91] : memref<98xf32, #tpu.memory_space<smem>>
      %448 = vector.broadcast %447 : f32 to vector<22x16xf32>
      %449 = arith.mulf %448, %101 : vector<22x16xf32>
      %c43 = arith.constant 43 : index
      %450 = memref.load %arg3[%c43] : memref<98xf32, #tpu.memory_space<smem>>
      %451 = vector.broadcast %450 : f32 to vector<22x16xf32>
      %452 = arith.mulf %451, %95 : vector<22x16xf32>
      %453 = arith.addf %446, %452 : vector<22x16xf32>
      %c92 = arith.constant 92 : index
      %454 = memref.load %arg3[%c92] : memref<98xf32, #tpu.memory_space<smem>>
      %455 = vector.broadcast %454 : f32 to vector<22x16xf32>
      %456 = arith.mulf %455, %102 : vector<22x16xf32>
      %457 = arith.addf %449, %456 : vector<22x16xf32>
      %c44 = arith.constant 44 : index
      %458 = memref.load %arg3[%c44] : memref<98xf32, #tpu.memory_space<smem>>
      %459 = vector.broadcast %458 : f32 to vector<22x16xf32>
      %460 = arith.mulf %459, %96 : vector<22x16xf32>
      %461 = arith.addf %453, %460 : vector<22x16xf32>
      %c93 = arith.constant 93 : index
      %462 = memref.load %arg3[%c93] : memref<98xf32, #tpu.memory_space<smem>>
      %463 = vector.broadcast %462 : f32 to vector<22x16xf32>
      %464 = arith.mulf %463, %103 : vector<22x16xf32>
      %465 = arith.addf %457, %464 : vector<22x16xf32>
      %c45 = arith.constant 45 : index
      %466 = memref.load %arg3[%c45] : memref<98xf32, #tpu.memory_space<smem>>
      %467 = vector.broadcast %466 : f32 to vector<22x16xf32>
      %468 = arith.mulf %467, %97 : vector<22x16xf32>
      %469 = arith.addf %461, %468 : vector<22x16xf32>
      %c94 = arith.constant 94 : index
      %470 = memref.load %arg3[%c94] : memref<98xf32, #tpu.memory_space<smem>>
      %471 = vector.broadcast %470 : f32 to vector<22x16xf32>
      %472 = arith.mulf %471, %104 : vector<22x16xf32>
      %473 = arith.addf %465, %472 : vector<22x16xf32>
      %c46 = arith.constant 46 : index
      %474 = memref.load %arg3[%c46] : memref<98xf32, #tpu.memory_space<smem>>
      %475 = vector.broadcast %474 : f32 to vector<22x16xf32>
      %476 = arith.mulf %475, %98 : vector<22x16xf32>
      %477 = arith.addf %469, %476 : vector<22x16xf32>
      %c95 = arith.constant 95 : index
      %478 = memref.load %arg3[%c95] : memref<98xf32, #tpu.memory_space<smem>>
      %479 = vector.broadcast %478 : f32 to vector<22x16xf32>
      %480 = arith.mulf %479, %105 : vector<22x16xf32>
      %481 = arith.addf %473, %480 : vector<22x16xf32>
      %c47 = arith.constant 47 : index
      %482 = memref.load %arg3[%c47] : memref<98xf32, #tpu.memory_space<smem>>
      %483 = vector.broadcast %482 : f32 to vector<22x16xf32>
      %484 = arith.mulf %483, %99 : vector<22x16xf32>
      %485 = arith.addf %477, %484 : vector<22x16xf32>
      %c96 = arith.constant 96 : index
      %486 = memref.load %arg3[%c96] : memref<98xf32, #tpu.memory_space<smem>>
      %487 = vector.broadcast %486 : f32 to vector<22x16xf32>
      %488 = arith.mulf %487, %106 : vector<22x16xf32>
      %489 = arith.addf %481, %488 : vector<22x16xf32>
      %c48 = arith.constant 48 : index
      %490 = memref.load %arg3[%c48] : memref<98xf32, #tpu.memory_space<smem>>
      %491 = vector.broadcast %490 : f32 to vector<22x16xf32>
      %492 = arith.mulf %491, %100 : vector<22x16xf32>
      %493 = arith.addf %485, %492 : vector<22x16xf32>
      %c97 = arith.constant 97 : index
      %494 = memref.load %arg3[%c97] : memref<98xf32, #tpu.memory_space<smem>>
      %495 = vector.broadcast %494 : f32 to vector<22x16xf32>
      %496 = arith.mulf %495, %107 : vector<22x16xf32>
      %497 = arith.addf %489, %496 : vector<22x16xf32>
      %498 = arith.addf %493, %497 : vector<22x16xf32>
      %499 = vector.extract_strided_slice %498 {offsets = [6, 0], sizes = [16, 16], strides = [1, 1]} : vector<22x16xf32> to vector<16x16xf32>
      %500 = arith.addf %163, %219 : vector<16x16xf32>
      %501 = arith.addf %275, %331 : vector<16x16xf32>
      %502 = arith.addf %387, %443 : vector<16x16xf32>
      %503 = arith.addf %500, %501 : vector<16x16xf32>
      %504 = arith.addf %502, %499 : vector<16x16xf32>
      %505 = arith.addf %503, %504 : vector<16x16xf32>
      %506 = arith.negf %505 : vector<16x16xf32>
      %507 = math.exp %506 : vector<16x16xf32>
      %cst_94 = arith.constant 1.000000e+00 : f32
      %508 = vector.broadcast %cst_94 : f32 to vector<16x16xf32>
      %509 = arith.addf %508, %507 : vector<16x16xf32>
      %510 = arith.divf %508, %509 : vector<16x16xf32>
      %c0_95 = arith.constant 0 : index
      %c0_96 = arith.constant 0 : index
      %c0_97 = arith.constant 0 : index
      %c0_98 = arith.constant 0 : index
      %511 = vector.load %arg4[%c0_95, %c0_96, %c0_97, %c0_98] : memref<1x1x16x16xf32, #tpu.memory_space<vmem>>, vector<1x1x16x16xf32>
      %512 = vector.shape_cast %511 : vector<1x1x16x16xf32> to vector<16x16xf32>
      %513 = vector.shape_cast %510 : vector<16x16xf32> to vector<1x1x16x16xf32>
      tpu.vector_store %arg4[%c0_95, %c0_96, %c0_97, %c0_98], %513 {strides = array<i32>} : memref<1x1x16x16xf32, #tpu.memory_space<vmem>>, vector<1x1x16x16xf32>,
    } else {
    }
    return
  }
  func.func @transform_0(%arg0: i32, %arg1: i32) -> (i32, i32, i32) {
    %c0_i32 = arith.constant 0 : i32
    %c0_i32_0 = arith.constant 0 : i32
    return %arg0, %arg1, %c0_i32 : i32, i32, i32
  }
  func.func @transform_1(%arg0: i32, %arg1: i32) -> i32 {
    %c0_i32 = arith.constant 0 : i32
    %c0_i32_0 = arith.constant 0 : i32
    return %c0_i32 : i32
  }
  func.func @transform_2(%arg0: i32, %arg1: i32) -> (i32, i32, i32, i32) {
    %c0_i32 = arith.constant 0 : i32
    %c0_i32_0 = arith.constant 0 : i32
    %c0_i32_1 = arith.constant 0 : i32
    %c0_i32_2 = arith.constant 0 : i32
    return %arg0, %c0_i32, %c0_i32_0, %c0_i32_1 : i32, i32, i32, i32
  }
}

</mosaic_0001>

<bundles_post_ra>
// kernel: tpu_custom_call.1
= control target key start
LH: loop header
LB: loop body
LE: loop exit
PB: predicated region body
PF: predicated region fallthrough
CT: control target
= control target key end

     0   :  { %7 = vsyncpa [#allocation7], 0  ;;  %s6660_s0 = inlined_call_operand.hbm [shape: f32[2,4,256], index: 0, kind: input, shape index: {}]   ;;  %s6661_s1 = inlined_call_operand.vmem [shape: f32[98], index: 1, kind: input, shape index: {}]   ;;  %s6662_s2 = inlined_call_operand.hbm [shape: f32[2,1,16,16], index: 2, kind: output, shape index: {}]  }
   0x1   :  { %9 = vsyncpa [#allocation7 + $0x1], 0 }
   0x2   :  { %10 = vsyncpa [#allocation9], 0 }
   0x3   :  { %11 = vsyncpa [#allocation8], 0 }
   0x4   :  { %13 = vsyncpa [#allocation8 + $0x1], 0  ;;  %s3710_s9 = smov 0   ;;  %s3712_s10 = smov 0  }
   0x5   :  { %s3714_s11 = smov 0   ;;  %s3716_s12 = smov 0  }
   0x6   :  { %s3718_s13 = smov 0   ;;  %s3720_s14 = smov 0  }
   0x7 LB: > { %s3284_s15 = sadd.s32 4294967295, %s3671_s14   ;;  %s3285_s16 = sadd.s32 4294967294, %s3671_s14   ;;  %s3671_s14 = sphi %s3720_s14, %s19_s14   ;;  %s3667_s13 = sphi %s3718_s13, %s7426_s13   ;;  %s3663_s12 = sphi %s3716_s12, %s7425_s12   ;;  %s3659_s11 = sphi %s3714_s11, %s7424_s11   ;;  %s3655_s10 = sphi %s3712_s10, %s7423_s10   ;;  %s3651_s9 = sphi %s3710_s9, %s7422_s9  }
   0x8   : > { %p53_p0 = scmp.ne.s32.totalorder %s3655_s10, %s3651_s9  ;;  %p3744_p1 = scmp.eq.s32.totalorder %s3284_s15, 0 }
   0x9   : > { %p3748_p2 = scmp.eq.s32.totalorder %s3284_s15, 1  ;;  %p104_p3 = scmp.eq.s32.totalorder %s3285_s16, 1 }
   0xa   : > { %s6860_s17 = scalar_select %p3744_p1, 1, 0 }
   0xb   : > { %p3754_p4 = por %p3744_p1, %p53_p0  ;;  %p3286_p5 = scmp.ge.s32.totalorder %s3671_s14, 1 }
   0xc   : > { %p3759_p6 = por %p104_p3, %p53_p0  ;;  %p111_p7 = scmp.lt.s32.totalorder %s3671_s14, 3 }
   0xd   : > { %s6862_s19 = scalar_select %p3754_p4, 1, 0 }
   0xe   : > { %s6863_s20 = scalar_select %p3759_p6, 1, 0 }
   0xf   : > { %s124_s23 = sshll.u32 %s6661_s1, 4  ;;  %p3767_p8 = pnand %p3286_p5, %p111_p7  ;;  %s125_s23 = int_to_ptr.vmem [resolvable:$true] %s124_s23 }
  0x10   : > { %s31_s26 = sadd.s32 1, %s3667_s13  ;;  %s40_s27 = sadd.s32 1, %s3659_s11 }
  0x11   : > { %p3414_p10 = pneg %p3767_p8  ;;  %p33_p12 = scmp.ge.s32.totalorder %s31_s26, 2 }
  0x12   : > { %s3540_s28 = scalar_lea.vmem %s125_s23, 16  ;;  %p3548_p7 = scmp.lt.s32.totalorder %s125_s23, %s125_s23 }
  0x13   : > { %p3776_p11 = pnand %p3414_p10, %p3744_p1  ;;  %p3541_p13 = scmp.ne.s32.totalorder %s125_s23, %s3540_s28 }
  0x14   : > { %p3549_p6 = scmp.lt.s32.totalorder %s3540_s28, %s3540_s28 }
  0x15   : > { %p3542_p0 = pneg %p3776_p11 }
  0x16   : > { %p3550_p9 = por %p3549_p6, %p3548_p7 }
  0x17   : > { %p3543_p3 = pnand %p3542_p0, %p3541_p13 }
  0x19   : > { %p3544_p5 = pneg %p3543_p3 }
  0x1b   : > { %p3551_p4 = pnand %p3550_p9, %p3544_p5 }
  0x1d   : > { %3554 = shalt.err (!%p3551_p4)
}
  0x1e   : > { %s3673_s29 = smov [#allocation10]   ;;  %s7428_s26 = smov (%p33_p12, %s31_s26), 0 }
  0x1f   : > { %3417 = dma.vmem_to_smem (!%p3776_p11), %s125_s23, 16, %s3673_s29, [#allocation9]  }
  0x20   : > { %p47_p10 = scmp.ne.s32.totalorder %s3659_s11, %s3655_s10  ;;  %p48_p6 = scmp.eq.s32.totalorder %s3671_s14, 0 }
  0x21   : > { %s35_s30 = ssub.s32 %s3667_s13, %s7428_s26  ;;  %p3427_p4 = scmp.lt.s32.totalorder %s3671_s14, 2 }
  0x22   : > { %p38_p9 = scmp.eq.s32.totalorder %s35_s30, 0  ;;  %p49_p13 = por %p48_p6, %p47_p10 }
  0x23   : > { %p3796_p0 = por %p3748_p2, %p47_p10  ;;  %s135_s4 = sand.u32 1, %s3659_s11  }
  0x24   : > { %s3802_s5 = scalar_select %p38_p9, %s3659_s11, %s40_s27  }
  0x25   : > { %s6866_s3 = scalar_select %p3796_p0, 1, 0 }
  0x26   : > { %s3289_s6 = sshll.u32 %s135_s4, 3  ;;  %s3404_s7 = sshll.u32 %s3667_s13, 7 }
  0x27   : > { %s3808_s16 = scalar_lea.hbm %s6660_s0, %s3404_s7  ;;  %s139_s21 = scalar_lea.vmem [#allocation6], %s3289_s6 }
  0x28   : > { %s149_s18 = sshll.u32 %s139_s21, 4  ;;  %p3812_p2 = pnand %p3427_p4, %p49_p13  ;;  %s3810_s18 = int_to_ptr.vmem [resolvable:$true] %s149_s18 }
  0x29   : > { %s136_s23 = scalar_lea.sflag [#allocation7], %s135_s4  ;;  %s3555_s25 = scalar_lea.hbm %s3808_s16, 128 }
  0x2a   : > { %p3556_p11 = scmp.ne.s32.totalorder %s3808_s16, %s3555_s25  ;;  %p3557_p12 = pneg %p3812_p2 }
  0x2b   : > { %s3560_s29 = scalar_lea.hbm %s6660_s0, 256  ;;  %p3561_p7 = scmp.lt.u32.totalorder %s3808_s16, %s6660_s0 }
  0x2c   : > { %p3558_p3 = pnand %p3557_p12, %p3556_p11  ;;  %p3562_p10 = scmp.lt.u32.totalorder %s3560_s29, %s3555_s25 }
  0x2d   : > { %p3564_p4 = scmp.lt.u32.totalorder %s3555_s25, %s3808_s16 }
  0x2e   : > { %p3559_p5 = pneg %p3558_p3  ;;  %p3563_p6 = por %p3562_p10, %p3561_p7 }
  0x30   : > { %p3565_p9 = por %p3564_p4, %p3563_p6 }
  0x32   : > { %p3566_p13 = pnand %p3565_p9, %p3559_p5 }
  0x34   : > { %3569 = shalt.err (!%p3566_p13)
}
  0x35   : > { %s3570_s4 = scalar_lea.vmem %s3810_s18, 128  ;;  %s3674_s7 = smov [#allocation6]  }
  0x36   : > { %p3571_p11 = scmp.ne.s32.totalorder %s3810_s18, %s3570_s4  ;;  %s3575_s8 = sshll.u32 %s3674_s7, 4  ;;  %s3576_s8 = int_to_ptr.vmem [resolvable:$false] %s3575_s8 }
  0x37   : > { %s3577_s15 = scalar_lea.vmem %s3576_s8, 256  ;;  %p3578_p1 = scmp.lt.s32.totalorder %s3810_s18, %s3576_s8 }
  0x38   : > { %p3573_p3 = pnand %p3571_p11, %p3557_p12  ;;  %p3579_p7 = scmp.lt.s32.totalorder %s3577_s15, %s3570_s4 }
  0x3a   : > { %p3574_p0 = pneg %p3573_p3  ;;  %p3580_p10 = por %p3579_p7, %p3578_p1 }
  0x3c   : > { %p3581_p6 = pnand %p3580_p10, %p3574_p0 }
  0x3e   : > { %3584 = shalt.err (!%p3581_p6)
}
  0x3f   : > { %3421 = dma.hbm_to_vmem [thread:$0]  (!%p3812_p2), %s3808_s16, 128, %s3810_s18, %s136_s23  }
  0x40   : > { %158 = sbr.rel (%p3767_p8) target bundleno = 1186 (0x4a2), region = 28 }
  0x47   : > { %s3844_s21 = sand.u32 1, %s3655_s10   ;;  %p6868_p1 = scmp.ne.s32.totalorder %s6862_s19, 0 }
  0x48   : > { %s3293_s25 = sshll.u32 %s3844_s21, 3  ;;  %s161_s27 = scalar_lea.sflag [#allocation7], %s3844_s21 }
  0x49   : > { %s164_s28 = scalar_lea.vmem [#allocation6], %s3293_s25 }
  0x4a   : > { %3638 = dma.done.wait (%p6868_p1), %s161_s27, 128  }
  0x4b   : > { %3640 = vsyncadd (%p6868_p1), %s161_s27, 4294967168  ;;  %p6869_p0 = scmp.ne.s32.totalorder %s6860_s17, 0 }
  0x4d   : > { %3642 = dma.done.wait (%p6869_p0), [#allocation9], 16  }
  0x4e   : > { %3644 = vsyncadd (%p6869_p0), [#allocation9], 4294967280 }
  0x4f   : > { %173 = sfence }
  0x50   : > { %v198_v0 = vld [vmem:[%s164_s28] sm:$0xff]  ;;  %vm203_vm0 = vcmask 1043456   ;;  %v3675_v1 = vmov 0.0   ;;  %v3676_v5 = vmov -inf   ;;  %vm311_vm1 = vcmask 154624   ;;  %s3678_s17 = smov 96  }
  0x51   : > { %194 = vst [vmem:[#allocation2] sm:$0xff] %v3675_v1  ;;  %195 = vst [vmem:[#allocation2 + $0x8] sm:$0xff] %v3675_v1  ;;  %v201_v2 = vcombine.high %v198_v0, %v198_v0  ;;  %v204_v3 = vsel %vm203_vm0, %v198_v0, 0.0  ;;  %v244_v6 = vsel %vm203_vm0, %v198_v0, -inf  ;;  %v224_v13 = vlaneseq  ;;  %s3679_s19 = smov 112   ;;  %s3680_s24 = smov 80  }
  0x52   : > { %310 = vst [vmem:[#allocation4] sm:$0xff] %v3675_v1  ;;  %317 = vst [vmem:[#allocation4 + $0x30] sm:$0x7] %v3675_v1  ;;  %v205_v4 = vrot.slane %v204_v3, 4  ;;  %v245_v8 = vrot.slane %v244_v6, 4  ;;  %vm328_vm3 = vcmask 122880  }
  0x53   : > { %326 = vst [vmem:[#allocation5 + $0x30] sm:$0x7] %v3675_v1  ;;  %196 = vst [vmem:[#allocation3] sm:$0xff] %v3676_v5  ;;  %v211_v7 = vsel %vm203_vm0, %v201_v2, 0.0  ;;  %v251_v9 = vsel %vm203_vm0, %v201_v2, -inf  ;;  %v225_v24 = vshrl.u32 %v224_v13, 7 }
  0x54   : > { %197 = vst [vmem:[#allocation3 + $0x8] sm:$0xff] %v3676_v5  ;;  %v206_v10 = vadd.f32 %v205_v4, %v204_v3  ;;  %v212_v11 = vrot.slane %v211_v7, 4  ;;  %v252_v12 = vrot.slane %v251_v9, 4  ;;  %v246_v14 = vmax.f32 %v244_v6, %v245_v8  ;;  %312 = vst.msk [vmem:[#allocation4 + $0x8] sm:$0xff] %vm311_vm1, %v3675_v1  ;;  %s3681_s16 = smov 64   ;;  %s3682_s18 = smov 48  }
  0x55   : > { %314 = vst.msk [vmem:[#allocation4 + $0x18] sm:$0xff] %vm311_vm1, %v3675_v1  ;;  %316 = vst.msk [vmem:[#allocation4 + $0x28] sm:$0xff] %vm311_vm1, %v3675_v1  ;;  %v3677_v17 = vmov 1966171168   ;;  %vm239_vm2 = vcmp.lt.s32.totalorder %v224_v13, 256  ;;  %s3683_s22 = smov 32  }
  0x56   : > { %321 = vst.msk [vmem:[#allocation5 + $0x8] sm:$0xff] %vm311_vm1, %v3675_v1  ;;  %323 = vst.msk [vmem:[#allocation5 + $0x18] sm:$0xff] %vm311_vm1, %v3675_v1  ;;  %v207_v15 = vrot.slane %v206_v10, 2  ;;  %v213_v16 = vadd.f32 %v212_v11, %v211_v7  ;;  %v222_v18 = vunpack.c.l.s4 %v3677_v17  ;;  %v253_v19 = vmax.f32 %v251_v9, %v252_v12  ;;  %s3684_s23 = smov 16   ;;  %s3297_s29 = sld [smem:[#allocation10 + $0x1]] }
  0x57   : > { %325 = vst.msk [vmem:[#allocation5 + $0x28] sm:$0xff] %vm311_vm1, %v3675_v1  ;;  %v247_v20 = vrot.slane %v246_v14, 2  ;;  %s3298_s30 = sld [smem:[#allocation10 + $0x32]]  ;;  %s3300_s4 = sld [smem:[#allocation10 + $0x33]]  ;;  %vm318_vm4 = vcmask 149504   ;;  %vm2949_vm5 = vcmask 1046528  }
  0x58   : > { %v208_v21 = vadd.f32 %v207_v15, %v206_v10  ;;  %v214_v22 = vrot.slane %v213_v16, 2  ;;  %v254_v23 = vrot.slane %v253_v19, 2  ;;  %v223_v28 = vunpack.c.0.s8 %v222_v18  ;;  %v199_v42 = vld [vmem:[#allocation2] ss:$8 sm:$0x3]  ;;  %s3299_s6 = sld [smem:[#allocation10 + $0x2]] }
  0x59   : > { %v248_v25 = vmax.f32 %v246_v14, %v247_v20  ;;  %s3685_s7 = smov 127   ;;  %s3302_s8 = sld [smem:[#allocation10 + $0x34]]  ;;  %vm3028_vm6 = vcmask 1045504   ;;  %vm507_vm7 = vcmask 1039360   ;;  %vm590_vm8 = vcmask 1031168  }
  0x5a   : > { %v209_v26 = vrot.slane %v208_v21, 1  ;;  %v215_v27 = vadd.f32 %v214_v22, %v213_v16  ;;  %v255_v29 = vmax.f32 %v253_v19, %v254_v23  ;;  %v226_v36 = vsub.s32 %v223_v28, %v225_v24  ;;  %s3304_s15 = sld [smem:[#allocation10 + $0x35]]  ;;  %s3686_s25 = smov 126  }
  0x5b   : > { %v249_v30 = vrot.slane %v248_v25, 1  ;;  %v243_v43 = vld [vmem:[#allocation3] ss:$8 sm:$0x3]  ;;  %v3866_v13 = vld [vmem:[#allocation4 + $0x8] sm:$0xff]  ;;  %s3306_s27 = sld [smem:[#allocation10 + $0x36]] }
  0x5c   : > { %v210_v31 = vadd.f32 %v209_v26, %v208_v21  ;;  %v216_v32 = vrot.slane %v215_v27, 1  ;;  %v256_v33 = vrot.slane %v255_v29, 1  ;;  %v3864_v12 = vstv %s3297_s29  ;;  %s3308_s28 = sld [smem:[#allocation10 + $0x37]]  ;;  %s3303_s29 = sld [smem:[#allocation10 + $0x4]] }
  0x5d   : > { %v250_v34 = vmax.f32 %v248_v25, %v249_v30  ;;  %v483_v14 = vmul.f32 0.0, %v3864_v12  ;;  %v484_v15 = vmul.f32 %v3864_v12, %v3866_v13  ;;  %v3871_v16 = vld [vmem:[#allocation5 + $0x8] sm:$0xff]  ;;  %v3873_v17 = vstv %s3298_s30  ;;  %s3305_s30 = sld [smem:[#allocation10 + $0x5]]  ;;  %p7419_p2 = scmp.ne.s32.totalorder %s6866_s3, 0 }
  0x5e   : > { %v217_v35 = vadd.f32 %v216_v32, %v215_v27  ;;  %v257_v37 = vmax.f32 %v255_v29, %v256_v33  ;;  %v526_v18 = vmul.f32 %v3873_v17, %v3871_v16  ;;  %v3879_v19 = vstv %s3299_s6  ;;  %s3307_s6 = sld [smem:[#allocation10 + $0x6]] }
  0x5f   : > { %v567_v20 = vmul.f32 %v3879_v19, %v3866_v13  ;;  %v3885_v21 = vstv %s3300_s4  ;;  %v525_v22 = vmul.f32 0.0, %v3873_v17  ;;  %v3892_v24 = vstv %s3302_s8  ;;  %s3313_s4 = sld [smem:[#allocation10 + $0x9]]  ;;  %s3314_s8 = sld [smem:[#allocation10 + $0x3a]] }
  0x60   : > { %v220_v38 = vcombine.low %v210_v31, %v217_v35  ;;  %v260_v39 = vcombine.low %v250_v34, %v257_v37  ;;  %v609_v23 = vmul.f32 %v3885_v21, %v3871_v16  ;;  %v672_v25 = vmul.f32 %v3892_v24, %v3871_v16 }
  0x61   : > { %v3898_v26 = vstv %s3304_s15  ;;  %v3904_v28 = vstv %s3306_s27  ;;  %v566_v29 = vmul.f32 0.0, %v3879_v19  ;;  %s3315_s15 = sld [smem:[#allocation10 + $0xa]]  ;;  %s3316_s27 = sld [smem:[#allocation10 + $0x3b]]  ;;  %vm3161_vm9 = vcmask 23552  }
  0x62   : > { %v227_v40 = vrot.slane %v220_v38, %v226_v36  ;;  %v267_v41 = vrot.slane %v260_v39, %v226_v36  ;;  %v718_v27 = vmul.f32 %v3898_v26, %v3871_v16  ;;  %v764_v30 = vmul.f32 %v3904_v28, %v3871_v16 }
  0x63   : > { %v3911_v31 = vstv %s3308_s28  ;;  %s3317_s28 = sld [smem:[#allocation10 + $0xb]]  ;;  %vm3168_vm10 = vcmask 130053   ;;  %vm3170_vm11 = vcmask 130048   ;;  %vm3172_vm12 = vcmask 126976  }
  0x64   : > { %v234_v44 = vrot.slane %v227_v40, %v226_v36  ;;  %v274_v45 = vrot.slane %v267_v41, %v226_v36  ;;  %v810_v32 = vmul.f32 %v3911_v31, %v3871_v16  ;;  %v608_v36 = vmul.f32 0.0, %v3885_v21 }
  0x65   : > { %v3938_v40 = vstv %s3303_s29  ;;  %s3321_s29 = sld [smem:[#allocation10 + $0xd]] }
  0x66   : > { %v236_v46 = vadd.f32 %v234_v44, %v199_v42  ;;  %v276_v47 = vmax.f32 %v243_v43, %v274_v45  ;;  %v695_v41 = vmul.f32 %v3938_v40, %v3866_v13  ;;  %v3943_v42 = vstv %s3305_s30  ;;  %s3322_s30 = sld [smem:[#allocation10 + $0x3e]] }
  0x67   : > { %v741_v43 = vmul.f32 %v3943_v42, %v3866_v13  ;;  %v3948_v44 = vstv %s3307_s6  ;;  %s3325_s6 = sld [smem:[#allocation10 + $0xf]] }
  0x68   : > { %241 = vst.msk [vmem:[#allocation2] ss:$8 sm:$0x3] %vm239_vm2, %v236_v46  ;;  %277 = vst.msk [vmem:[#allocation3] ss:$8 sm:$0x3] %vm239_vm2, %v276_v47  ;;  %v787_v45 = vmul.f32 %v3948_v44, %v3866_v13 }
  0x6f   : > { %v282_v48 = vld [vmem:[#allocation2] sm:$0xff]  ;;  %v296_v49 = vld [vmem:[#allocation3] sm:$0xff]  ;;  %v297_v50 = vld [vmem:[#allocation3 + $0x8] sm:$0xff] }
  0x70   : > { %v284_v51 = vrot.slane %v282_v48, 4  ;;  %v298_v52 = vrot.slane %v296_v49, 4  ;;  %v304_v53 = vrot.slane %v297_v50, 4  ;;  %v283_v54 = vld [vmem:[#allocation2 + $0x8] sm:$0xff] }
  0x71   : > { %v290_v55 = vrot.slane %v283_v54, 4 }
  0x72   : > { %v285_v56 = vadd.f32 %v284_v51, %v282_v48  ;;  %v299_v57 = vmax.f32 %v296_v49, %v298_v52  ;;  %v305_v58 = vmax.f32 %v297_v50, %v304_v53 }
  0x73   : > { %v291_v59 = vadd.f32 %v290_v55, %v283_v54 }
  0x74   : > { %v286_v60 = vrot.slane %v285_v56, 2  ;;  %v300_v61 = vrot.slane %v299_v57, 2  ;;  %v306_v62 = vrot.slane %v305_v58, 2 }
  0x75   : > { %v292_v63 = vrot.slane %v291_v59, 2 }
  0x76   : > { %v287_v0 = vadd.f32 %v286_v60, %v285_v56  ;;  %v301_v1 = vmax.f32 %v299_v57, %v300_v61  ;;  %v307_v2 = vmax.f32 %v305_v58, %v306_v62 }
  0x77   : > { %v293_v3 = vadd.f32 %v292_v63, %v291_v59 }
  0x78   : > { %v288_v4 = vrot.slane %v287_v0, 1  ;;  %v302_v5 = vrot.slane %v301_v1, 1  ;;  %v308_v6 = vrot.slane %v307_v2, 1 }
  0x79   : > { %v294_v7 = vrot.slane %v293_v3, 1 }
  0x7a   : > { %v289_v8 = vadd.f32 %v288_v4, %v287_v0  ;;  %v303_v9 = vmax.f32 %v301_v1, %v302_v5  ;;  %v309_v10 = vmax.f32 %v307_v2, %v308_v6 }
  0x7b   : > { %v295_v11 = vadd.f32 %v294_v7, %v293_v3 }
  0x7c   : > { %341 = vrot.lane.b32.xlu1 %v289_v8, %s3678_s17  ;;  %332 = vrot.lane.b32.xlu0 %v289_v8, %s3679_s19  ;;  %329 = vst.msk [vmem:[#allocation4 + $0x18] sm:$0x1] %vm328_vm3, %v289_v8  ;;  %330 = vst.msk [vmem:[#allocation5 + $0x18] sm:$0x1] %vm328_vm3, %v303_v9 }
  0x7d   : > { %390 = vst.msk [vmem:[#allocation5 + $0x28] sm:$0x1] %vm328_vm3, %v309_v10  ;;  %389 = vst.msk [vmem:[#allocation4 + $0x28] sm:$0x1] %vm328_vm3, %v295_v11 }
  0x80   : > { %345 = vrot.lane.b32.xlu1 %v303_v9, %s3678_s17  ;;  %337 = vrot.lane.b32.xlu0 %v303_v9, %s3679_s19 }
  0x84   : > { %353 = vrot.lane.b32.xlu1 %v303_v9, %s3680_s24  ;;  %349 = vrot.lane.b32.xlu0 %v289_v8, %s3680_s24 }
  0x88   : > { %361 = vrot.lane.b32.xlu1 %v303_v9, %s3681_s16  ;;  %357 = vrot.lane.b32.xlu0 %v289_v8, %s3681_s16 }
  0x8c   : > { %369 = vrot.lane.b32.xlu1 %v303_v9, %s3682_s18  ;;  %365 = vrot.lane.b32.xlu0 %v289_v8, %s3682_s18 }
  0x90   : > { %377 = vrot.lane.b32.xlu1 %v303_v9, %s3683_s22  ;;  %373 = vrot.lane.b32.xlu0 %v289_v8, %s3683_s22 }
  0x94   : > { %385 = vrot.lane.b32.xlu1 %v303_v9, %s3684_s23  ;;  %381 = vrot.lane.b32.xlu0 %v289_v8, %s3684_s23 }
  0x98   : > { %397 = vrot.lane.b32.xlu1 %v309_v10, %s3679_s19  ;;  %392 = vrot.lane.b32.xlu0 %v295_v11, %s3679_s19  ;;  %s3311_s19 = sld [smem:[#allocation10 + $0x8]] }
  0x9c   : > { %405 = vrot.lane.b32.xlu1 %v309_v10, %s3678_s17  ;;  %401 = vrot.lane.b32.xlu0 %v295_v11, %s3678_s17  ;;  %s3687_s17 = smov 125  }
  0x9e   : > { %v3917_v33 = vstv %s3311_s19  ;;  %s3318_s19 = sld [smem:[#allocation10 + $0x3c]] }
  0x9f   : > { %v856_v34 = vmul.f32 %v3917_v33, %v3866_v13  ;;  %v855_v48 = vmul.f32 0.0, %v3917_v33 }
  0xa0   : > { %413 = vrot.lane.b32.xlu1 %v309_v10, %s3680_s24  ;;  %409 = vrot.lane.b32.xlu0 %v295_v11, %s3680_s24  ;;  %s3688_s24 = smov 124  }
  0xa4   : > { %421 = vrot.lane.b32.xlu1 %v309_v10, %s3681_s16  ;;  %417 = vrot.lane.b32.xlu0 %v295_v11, %s3681_s16  ;;  %s3312_s16 = sld [smem:[#allocation10 + $0x39]] }
  0xa8   : > { %429 = vrot.lane.b32.xlu1 %v309_v10, %s3682_s18  ;;  %425 = vrot.lane.b32.xlu0 %v295_v11, %s3682_s18  ;;  %s3689_s18 = smov 123  }
  0xaa   : > { %v3923_v35 = vstv %s3312_s16  ;;  %s3319_s16 = sld [smem:[#allocation10 + $0xc]] }
  0xab   : > { %v897_v37 = vmul.f32 %v3923_v35, %v3871_v16  ;;  %v3967_v55 = vmul.f32 0.0, %v3923_v35 }
  0xac   : > { %437 = vrot.lane.b32.xlu1 %v309_v10, %s3683_s22  ;;  %433 = vrot.lane.b32.xlu0 %v295_v11, %s3683_s22  ;;  %s3690_s22 = smov 122  }
  0xb0   : > { %445 = vrot.lane.b32.xlu1 %v309_v10, %s3684_s23  ;;  %441 = vrot.lane.b32.xlu0 %v295_v11, %s3684_s23  ;;  %s3301_s23 = sld [smem:[#allocation10 + $0x3]] }
  0xb4   : > { %495 = vrot.lane.b32.xlu0 %v483_v14, %s3685_s7  ;;  %497 = vrot.lane.b32.xlu1 %v484_v15, %s3685_s7 }
  0xb6   : > { %v3933_v38 = vstv %s3301_s23  ;;  %s3320_s23 = sld [smem:[#allocation10 + $0x3d]] }
  0xb7   : > { %v649_v39 = vmul.f32 %v3933_v38, %v3866_v13 }
  0xb8   : > { %499 = vrot.lane.b32.xlu0 %v483_v14, %s3685_s7  ;;  %539 = vrot.lane.b32.xlu1 %v526_v18, %s3685_s7 }
  0xbc   : > { %503 = vrot.lane.b32.xlu0 %v483_v14, %s3685_s7  ;;  %580 = vrot.lane.b32.xlu1 %v567_v20, %s3686_s25 }
  0xc0   : > { %537 = vrot.lane.b32.xlu0 %v525_v22, %s3685_s7  ;;  %622 = vrot.lane.b32.xlu1 %v609_v23, %s3686_s25 }
  0xc4   : > { %541 = vrot.lane.b32.xlu0 %v525_v22, %s3685_s7  ;;  %678 = vrot.lane.b32.xlu1 %v672_v25, %s3687_s17 }
  0xc8   : > { %545 = vrot.lane.b32.xlu0 %v525_v22, %s3685_s7  ;;  %724 = vrot.lane.b32.xlu1 %v718_v27, %s3688_s24 }
  0xcc   : > { %578 = vrot.lane.b32.xlu0 %v566_v29, %s3686_s25  ;;  %770 = vrot.lane.b32.xlu1 %v764_v30, %s3689_s18 }
  0xd0   : > { %582 = vrot.lane.b32.xlu0 %v566_v29, %s3686_s25  ;;  %816 = vrot.lane.b32.xlu1 %v810_v32, %s3690_s22 }
  0xd4   : > { %586 = vrot.lane.b32.xlu0 %v566_v29, %s3686_s25  ;;  %869 = vrot.lane.b32.xlu1 %v856_v34, %s3685_s7 }
  0xd8   : > { %620 = vrot.lane.b32.xlu0 %v608_v36, %s3686_s25  ;;  %910 = vrot.lane.b32.xlu1 %v897_v37, %s3685_s7 }
  0xdc   : > { %624 = vrot.lane.b32.xlu0 %v608_v36, %s3686_s25 }
  0xe0   : > { %628 = vrot.lane.b32.xlu0 %v608_v36, %s3686_s25 }
  0xe4   : > { %655 = vrot.lane.b32.xlu0 %v649_v39, %s3687_s17 }
  0xe8   : > { %701 = vrot.lane.b32.xlu0 %v695_v41, %s3688_s24 }
  0xec   : > { %747 = vrot.lane.b32.xlu0 %v741_v43, %s3689_s18 }
  0xee   : > { %v342_v46 = vpop.permute.xlu1 %341  ;;  %v333_v47 = vpop.permute.xlu0 %332 }
  0xef   : > { %344 = vst.msk [vmem:[#allocation4 + $0x1a] sm:$0x1] %vm328_vm3, %v342_v46  ;;  %335 = vst.msk [vmem:[#allocation4 + $0x19] sm:$0x1] %vm328_vm3, %v333_v47 }
  0xf0   : > { %793 = vrot.lane.b32.xlu0 %v787_v45, %s3690_s22 }
  0xf2   : > { %v346_v49 = vpop.permute.xlu1 %345  ;;  %v338_v50 = vpop.permute.xlu0 %337 }
  0xf3   : > { %348 = vst.msk [vmem:[#allocation5 + $0x1a] sm:$0x1] %vm328_vm3, %v346_v49  ;;  %340 = vst.msk [vmem:[#allocation5 + $0x19] sm:$0x1] %vm328_vm3, %v338_v50 }
  0xf4   : > { %867 = vrot.lane.b32.xlu0 %v855_v48, %s3685_s7 }
  0xf6   : > { %v354_v51 = vpop.permute.xlu1 %353  ;;  %v350_v52 = vpop.permute.xlu0 %349 }
  0xf7   : > { %356 = vst.msk [vmem:[#allocation5 + $0x1b] sm:$0x1] %vm328_vm3, %v354_v51  ;;  %352 = vst.msk [vmem:[#allocation4 + $0x1b] sm:$0x1] %vm328_vm3, %v350_v52 }
  0xf8   : > { %871 = vrot.lane.b32.xlu0 %v855_v48, %s3685_s7 }
  0xfa   : > { %v362_v53 = vpop.permute.xlu1 %361  ;;  %v358_v54 = vpop.permute.xlu0 %357 }
  0xfb   : > { %364 = vst.msk [vmem:[#allocation5 + $0x1c] sm:$0x1] %vm328_vm3, %v362_v53  ;;  %360 = vst.msk [vmem:[#allocation4 + $0x1c] sm:$0x1] %vm328_vm3, %v358_v54  ;;  %v4068_v53 = vstv %s3313_s4  ;;  %s3326_s4 = sld [smem:[#allocation10 + $0x40]] }
  0xfc   : > { %875 = vrot.lane.b32.xlu0 %v855_v48, %s3685_s7  ;;  %v937_v54 = vmul.f32 0.0, %v4068_v53 }
  0xfe   : > { %v370_v56 = vpop.permute.xlu1 %369  ;;  %v366_v57 = vpop.permute.xlu0 %365 }
  0xff   : > { %372 = vst.msk [vmem:[#allocation5 + $0x1d] sm:$0x1] %vm328_vm3, %v370_v56  ;;  %368 = vst.msk [vmem:[#allocation4 + $0x1d] sm:$0x1] %vm328_vm3, %v366_v57 }
 0x100   : > { %908 = vrot.lane.b32.xlu0 %v3967_v55, %s3685_s7 }
 0x102   : > { %v378_v58 = vpop.permute.xlu1 %377  ;;  %v374_v59 = vpop.permute.xlu0 %373 }
 0x103   : > { %380 = vst.msk [vmem:[#allocation5 + $0x1e] sm:$0x1] %vm328_vm3, %v378_v58  ;;  %376 = vst.msk [vmem:[#allocation4 + $0x1e] sm:$0x1] %vm328_vm3, %v374_v59  ;;  %v4088_v58 = vstv %s3314_s8  ;;  %s3327_s8 = sld [smem:[#allocation10 + $0x10]] }
 0x104   : > { %912 = vrot.lane.b32.xlu0 %v3967_v55, %s3685_s7 }
 0x106   : > { %v386_v60 = vpop.permute.xlu1 %385  ;;  %v382_v61 = vpop.permute.xlu0 %381 }
 0x107   : > { %388 = vst.msk [vmem:[#allocation5 + $0x1f] sm:$0x1] %vm328_vm3, %v386_v60  ;;  %384 = vst.msk [vmem:[#allocation4 + $0x1f] sm:$0x1] %vm328_vm3, %v382_v61 }
 0x10a   : > { %v398_v62 = vpop.permute.xlu1 %397  ;;  %v393_v63 = vpop.permute.xlu0 %392 }
 0x10b   : > { %400 = vst.msk [vmem:[#allocation5 + $0x29] sm:$0x1] %vm328_vm3, %v398_v62  ;;  %395 = vst.msk [vmem:[#allocation4 + $0x29] sm:$0x1] %vm328_vm3, %v393_v63 }
 0x10e   : > { %v3981_v0 = vld [vmem:[#allocation4 + $0x18] sm:$0xff]  ;;  %v406_v1 = vpop.permute.xlu1 %405  ;;  %v402_v2 = vpop.permute.xlu0 %401 }
 0x10f   : > { %408 = vst.msk [vmem:[#allocation5 + $0x2a] sm:$0x1] %vm328_vm3, %v406_v1  ;;  %404 = vst.msk [vmem:[#allocation4 + $0x2a] sm:$0x1] %vm328_vm3, %v402_v2  ;;  %v486_v3 = vmul.f32 %v3864_v12, %v3981_v0  ;;  %v4008_v27 = vld [vmem:[#allocation5 + $0x18] sm:$0xff]  ;;  %v569_v41 = vmul.f32 %v3879_v19, %v3981_v0  ;;  %v650_v51 = vmul.f32 %v3933_v38, %v3981_v0 }
 0x110   : > { %v673_v29 = vmul.f32 %v3892_v24, %v4008_v27  ;;  %v528_v30 = vmul.f32 %v3873_v17, %v4008_v27  ;;  %v719_v39 = vmul.f32 %v3898_v26, %v4008_v27  ;;  %v765_v46 = vmul.f32 %v3904_v28, %v4008_v27 }
 0x111   : > { %501 = vrot.lane.b32.xlu1 %v486_v3, %s3685_s7  ;;  %v611_v47 = vmul.f32 %v3885_v21, %v4008_v27  ;;  %v811_v50 = vmul.f32 %v3911_v31, %v4008_v27  ;;  %v858_v2 = vmul.f32 %v3917_v33, %v3981_v0 }
 0x112   : > { %v414_v4 = vpop.permute.xlu1 %413  ;;  %v410_v5 = vpop.permute.xlu0 %409 }
 0x113   : > { %416 = vst.msk [vmem:[#allocation5 + $0x2b] sm:$0x1] %vm328_vm3, %v414_v4  ;;  %412 = vst.msk [vmem:[#allocation4 + $0x2b] sm:$0x1] %vm328_vm3, %v410_v5 }
 0x116   : > { %v422_v6 = vpop.permute.xlu1 %421  ;;  %v418_v7 = vpop.permute.xlu0 %417 }
 0x117   : > { %424 = vst.msk [vmem:[#allocation5 + $0x2c] sm:$0x1] %vm328_vm3, %v422_v6  ;;  %420 = vst.msk [vmem:[#allocation4 + $0x2c] sm:$0x1] %vm328_vm3, %v418_v7  ;;  %v4131_v6 = vstv %s3316_s27  ;;  %s3296_s27 = sld [smem:[#allocation10 + $0x31]] }
 0x118   : > { %v1043_v7 = vmul.f32 %v4131_v6, %v4008_v27 }
 0x11a   : > { %v430_v8 = vpop.permute.xlu1 %429  ;;  %v426_v9 = vpop.permute.xlu0 %425 }
 0x11b   : > { %432 = vst.msk [vmem:[#allocation5 + $0x2d] sm:$0x1] %vm328_vm3, %v430_v8  ;;  %428 = vst.msk [vmem:[#allocation4 + $0x2d] sm:$0x1] %vm328_vm3, %v426_v9  ;;  %v899_v8 = vmul.f32 %v3923_v35, %v4008_v27  ;;  %v4139_v9 = vstv %s3317_s28  ;;  %s465_s28 = sld [smem:[#allocation10]] }
 0x11e   : > { %v438_v10 = vpop.permute.xlu1 %437  ;;  %v434_v11 = vpop.permute.xlu0 %433 }
 0x11f   : > { %440 = vst.msk [vmem:[#allocation5 + $0x2e] sm:$0x1] %vm328_vm3, %v438_v10  ;;  %436 = vst.msk [vmem:[#allocation4 + $0x2e] sm:$0x1] %vm328_vm3, %v434_v11  ;;  %v1065_v11 = vmul.f32 %v4139_v9, %v3866_v13 }
 0x122   : > { %v446_v14 = vpop.permute.xlu1 %445  ;;  %v442_v15 = vpop.permute.xlu0 %441 }
 0x123   : > { %448 = vst.msk [vmem:[#allocation5 + $0x2f] sm:$0x1] %vm328_vm3, %v446_v14  ;;  %444 = vst.msk [vmem:[#allocation4 + $0x2f] sm:$0x1] %vm328_vm3, %v442_v15  ;;  %v938_v15 = vmul.f32 %v4068_v53, %v3866_v13 }
 0x126   : > { %v3998_v18 = vpop.permute.xlu0 %495  ;;  %v4099_v60 = vpop.permute.xlu1 %497 }
 0x127   : > { %6870 = vst [vmem:[#allocation15_spill] sm:$0xff] %v3998_v18 }
 0x12a   : > { %v4000_v20 = vld [vmem:[#allocation4 + $0x28] sm:$0xff]  ;;  %v4002_v22 = vpop.permute.xlu0 %499  ;;  %v4111_v63 = vpop.permute.xlu1 %539 }
 0x12b   : > { %6871 = vst [vmem:[#allocation16_spill] sm:$0xff] %v4002_v22  ;;  %v651_v23 = vmul.f32 %v3933_v38, %v4000_v20  ;;  %v488_v25 = vmul.f32 %v3864_v12, %v4000_v20  ;;  %v4018_v34 = vld [vmem:[#allocation5 + $0x28] sm:$0xff]  ;;  %v697_v12 = vmul.f32 %v3938_v40, %v4000_v20  ;;  %v743_v43 = vmul.f32 %v3943_v42, %v4000_v20 }
 0x12c   : > { %v530_v36 = vmul.f32 %v3873_v17, %v4018_v34  ;;  %v571_v17 = vmul.f32 %v3879_v19, %v4000_v20  ;;  %v789_v19 = vmul.f32 %v3948_v44, %v4000_v20  ;;  %v613_v49 = vmul.f32 %v3885_v21, %v4018_v34 }
 0x12d   : > { %659 = vrot.lane.b32.xlu0 %v651_v23, %s3687_s17  ;;  %505 = vrot.lane.b32.xlu1 %v488_v25, %s3685_s7  ;;  %v674_v21 = vmul.f32 %v3892_v24, %v4018_v34  ;;  %v696_v38 = vmul.f32 %v3938_v40, %v3981_v0  ;;  %v720_v24 = vmul.f32 %v3898_v26, %v4018_v34  ;;  %v978_v40 = vmul.f32 0.0, %v4088_v58 }
 0x12e   : > { %v4016_v32 = vpop.permute.xlu0 %503  ;;  %v766_v26 = vmul.f32 %v3904_v28, %v4018_v34  ;;  %v812_v62 = vmul.f32 %v3911_v31, %v4018_v34  ;;  %v4109_v28 = vstv %s3315_s15  ;;  %v4123_v31 = vpop.permute.xlu1 %580  ;;  %v860_v4 = vmul.f32 %v3917_v33, %v4000_v20  ;;  %s3328_s15 = sld [smem:[#allocation10 + $0x41]] }
 0x12f   : > { %6872 = vst [vmem:[#allocation17_spill] sm:$0xff] %v4016_v32  ;;  %v1021_v3 = vmul.f32 %v4109_v28, %v4000_v20  ;;  %v901_v14 = vmul.f32 %v3923_v35, %v4018_v34 }
 0x131   : > { %680 = vrot.lane.b32.xlu0 %v673_v29, %s3687_s17  ;;  %543 = vrot.lane.b32.xlu1 %v528_v30, %s3685_s7  ;;  %v1067_v29 = vmul.f32 %v4139_v9, %v4000_v20  ;;  %v4161_v30 = vstv %s3318_s19  ;;  %s3329_s19 = sld [smem:[#allocation10 + $0x11]] }
 0x132   : > { %v4028_v37 = vpop.permute.xlu0 %537  ;;  %v4141_v10 = vpop.permute.xlu1 %622  ;;  %v1089_v35 = vmul.f32 %v4161_v30, %v4008_v27 }
 0x133   : > { %6873 = vst [vmem:[#allocation18_spill] sm:$0xff] %v4028_v37 }
 0x135   : > { %705 = vrot.lane.b32.xlu0 %v697_v12, %s3688_s24  ;;  %547 = vrot.lane.b32.xlu1 %v530_v36, %s3685_s7  ;;  %v940_v12 = vmul.f32 %v4068_v53, %v3981_v0  ;;  %v4169_v36 = vstv %s3319_s16  ;;  %s3330_s16 = sld [smem:[#allocation10 + $0x42]] }
 0x136   : > { %v4040_v45 = vpop.permute.xlu0 %541  ;;  %v4155_v23 = vpop.permute.xlu1 %678 }
 0x137   : > { %6874 = vst [vmem:[#allocation19_spill] sm:$0xff] %v4040_v45  ;;  %6884 = vst [vmem:[#allocation29_spill] sm:$0xff] %v4155_v23 }
 0x139   : > { %726 = vrot.lane.b32.xlu0 %v719_v39, %s3688_s24  ;;  %584 = vrot.lane.b32.xlu1 %v569_v41, %s3686_s25 }
 0x13a   : > { %v4050_v48 = vpop.permute.xlu0 %545  ;;  %v4171_v39 = vpop.permute.xlu1 %724 }
 0x13b   : > { %6875 = vst [vmem:[#allocation20_spill] sm:$0xff] %v4050_v48  ;;  %6886 = vst [vmem:[#allocation31_spill] sm:$0xff] %v4171_v39  ;;  %v4347_v48 = vstv %s3329_s19  ;;  %s3342_s19 = sld [smem:[#allocation10 + $0x48]] }
 0x13d   : > { %751 = vrot.lane.b32.xlu0 %v743_v43, %s3689_s18  ;;  %588 = vrot.lane.b32.xlu1 %v571_v17, %s3686_s25  ;;  %v1111_v43 = vmul.f32 %v4169_v36, %v3866_v13  ;;  %v942_v17 = vmul.f32 %v4068_v53, %v4000_v20 }
 0x13e   : > { %v4062_v52 = vpop.permute.xlu0 %578 }
 0x13f   : > { %6876 = vst [vmem:[#allocation21_spill] sm:$0xff] %v4062_v52 }
 0x141   : > { %772 = vrot.lane.b32.xlu0 %v765_v46, %s3689_s18  ;;  %626 = vrot.lane.b32.xlu1 %v611_v47, %s3686_s25  ;;  %v979_v46 = vmul.f32 %v4088_v58, %v3871_v16  ;;  %v4579_v52 = vstv %s3342_s19  ;;  %s3353_s19 = sld [smem:[#allocation10 + $0x1d]] }
 0x142   : > { %v4074_v56 = vpop.permute.xlu0 %582 }
 0x143   : > { %6877 = vst [vmem:[#allocation22_spill] sm:$0xff] %v4074_v56 }
 0x145   : > { %797 = vrot.lane.b32.xlu0 %v789_v19, %s3690_s22  ;;  %630 = vrot.lane.b32.xlu1 %v613_v49, %s3686_s25  ;;  %v4187_v19 = vpop.permute.xlu1 %770  ;;  %v1113_v49 = vmul.f32 %v4169_v36, %v4000_v20 }
 0x146   : > { %v4082_v57 = vpop.permute.xlu0 %586  ;;  %6889 = vst [vmem:[#allocation34_spill] sm:$0xff] %v4187_v19 }
 0x147   : > { %6878 = vst [vmem:[#allocation23_spill] sm:$0xff] %v4082_v57  ;;  %v4375_v57 = vstv %s3330_s16  ;;  %s3310_s16 = sld [smem:[#allocation10 + $0x38]] }
 0x149   : > { %818 = vrot.lane.b32.xlu0 %v811_v50, %s3690_s22  ;;  %657 = vrot.lane.b32.xlu1 %v650_v51, %s3687_s17  ;;  %v4191_v50 = vstv %s3320_s23  ;;  %s3331_s23 = sld [smem:[#allocation10 + $0x12]] }
 0x14a   : > { %v4093_v59 = vpop.permute.xlu0 %620  ;;  %v1135_v51 = vmul.f32 %v4191_v50, %v4008_v27 }
 0x14b   : > { %6879 = vst [vmem:[#allocation24_spill] sm:$0xff] %v4093_v59 }
 0x14d   : > { %916 = vrot.lane.b32.xlu0 %v3967_v55, %s3685_s7  ;;  %682 = vrot.lane.b32.xlu1 %v674_v21, %s3687_s17  ;;  %v742_v55 = vmul.f32 %v3943_v42, %v3981_v0  ;;  %v788_v42 = vmul.f32 %v3948_v44, %v3981_v0  ;;  %v1019_v44 = vmul.f32 %v4109_v28, %v3866_v13 }
 0x14e   : > { %v4103_v61 = vpop.permute.xlu0 %624  ;;  %v981_v21 = vmul.f32 %v4088_v58, %v4008_v27 }
 0x14f   : > { %6880 = vst [vmem:[#allocation25_spill] sm:$0xff] %v4103_v61 }
 0x151   : > { %949 = vrot.lane.b32.xlu0 %v937_v54, %s3686_s25  ;;  %703 = vrot.lane.b32.xlu1 %v696_v38, %s3688_s24  ;;  %v4203_v38 = vpop.permute.xlu1 %816 }
 0x152   : > { %v4117_v1 = vpop.permute.xlu0 %628  ;;  %6891 = vst [vmem:[#allocation36_spill] sm:$0xff] %v4203_v38 }
 0x153   : > { %6881 = vst [vmem:[#allocation26_spill] sm:$0xff] %v4117_v1  ;;  %v4336_v1 = vstv %s465_s28  ;;  %s3341_s28 = sld [smem:[#allocation10 + $0x17]] }
 0x155   : > { %953 = vrot.lane.b32.xlu0 %v937_v54, %s3686_s25  ;;  %728 = vrot.lane.b32.xlu1 %v720_v24, %s3688_s24 }
 0x156   : > { %v4129_v5 = vpop.permute.xlu0 %655 }
 0x157   : > { %6882 = vst [vmem:[#allocation27_spill] sm:$0xff] %v4129_v5 }
 0x159   : > { %957 = vrot.lane.b32.xlu0 %v937_v54, %s3686_s25  ;;  %749 = vrot.lane.b32.xlu1 %v742_v55, %s3689_s18  ;;  %v4201_v54 = vstv %s3321_s29  ;;  %v983_v55 = vmul.f32 %v4088_v58, %v4018_v34  ;;  %v1042_v58 = vmul.f32 %v4131_v6, %v3871_v16  ;;  %s3332_s29 = sld [smem:[#allocation10 + $0x43]] }
 0x15a   : > { %v4145_v33 = vpop.permute.xlu0 %701  ;;  %v1157_v24 = vmul.f32 %v4201_v54, %v3866_v13 }
 0x15b   : > { %6883 = vst [vmem:[#allocation28_spill] sm:$0xff] %v4145_v33 }
 0x15d   : > { %990 = vrot.lane.b32.xlu0 %v978_v40, %s3686_s25  ;;  %774 = vrot.lane.b32.xlu1 %v766_v26, %s3689_s18  ;;  %v4215_v26 = vpop.permute.xlu1 %869 }
 0x15e   : > { %v4157_v25 = vpop.permute.xlu0 %747  ;;  %6893 = vst [vmem:[#allocation38_spill] sm:$0xff] %v4215_v26 }
 0x15f   : > { %6885 = vst [vmem:[#allocation30_spill] sm:$0xff] %v4157_v25 }
 0x161   : > { %994 = vrot.lane.b32.xlu0 %v978_v40, %s3686_s25  ;;  %795 = vrot.lane.b32.xlu1 %v788_v42, %s3690_s22  ;;  %v1159_v42 = vmul.f32 %v4201_v54, %v4000_v20 }
 0x162   : > { %v4173_v41 = vpop.permute.xlu0 %793 }
 0x163   : > { %6887 = vst [vmem:[#allocation32_spill] sm:$0xff] %v4173_v41 }
 0x165   : > { %998 = vrot.lane.b32.xlu0 %v978_v40, %s3686_s25  ;;  %820 = vrot.lane.b32.xlu1 %v812_v62, %s3690_s22  ;;  %v1020_v62 = vmul.f32 %v4109_v28, %v3981_v0 }
 0x166   : > { %v4185_v47 = vpop.permute.xlu0 %867 }
 0x167   : > { %6888 = vst [vmem:[#allocation33_spill] sm:$0xff] %v4185_v47 }
 0x169   : > { %1025 = vrot.lane.b32.xlu0 %v1019_v44, %s3687_s17  ;;  %873 = vrot.lane.b32.xlu1 %v858_v2, %s3685_s7  ;;  %v4221_v44 = vstv %s3322_s30  ;;  %s3333_s30 = sld [smem:[#allocation10 + $0x13]] }
 0x16a   : > { %v4199_v53 = vpop.permute.xlu0 %871  ;;  %v1181_v2 = vmul.f32 %v4221_v44, %v4008_v27 }
 0x16b   : > { %6890 = vst [vmem:[#allocation35_spill] sm:$0xff] %v4199_v53 }
 0x16d   : > { %1029 = vrot.lane.b32.xlu0 %v1021_v3, %s3687_s17  ;;  %877 = vrot.lane.b32.xlu1 %v860_v4, %s3685_s7  ;;  %v4231_v4 = vstv %s3325_s6  ;;  %s3334_s6 = sld [smem:[#allocation10 + $0x44]] }
 0x16e   : > { %v4213_v40 = vpop.permute.xlu0 %875  ;;  %v1225_v28 = vmul.f32 0.0, %v4231_v4  ;;  %v1230_v22 = vmul.f32 %v4231_v4, %v4000_v20 }
 0x16f   : > { %6892 = vst [vmem:[#allocation37_spill] sm:$0xff] %v4213_v40 }
 0x171   : > { %1050 = vrot.lane.b32.xlu0 %v1043_v7, %s3687_s17  ;;  %914 = vrot.lane.b32.xlu1 %v899_v8, %s3685_s7  ;;  %v4233_v7 = vpop.permute.xlu1 %910  ;;  %v1044_v8 = vmul.f32 %v4131_v6, %v4018_v34 }
 0x172   : > { %v4229_v3 = vpop.permute.xlu0 %908  ;;  %6895 = vst [vmem:[#allocation40_spill] sm:$0xff] %v4233_v7 }
 0x173   : > { %6894 = vst [vmem:[#allocation39_spill] sm:$0xff] %v4229_v3  ;;  %v472_v3 = vmul.f32 %v4336_v1, %v4000_v20 }
 0x175   : > { %1071 = vrot.lane.b32.xlu0 %v1065_v11, %s3688_s24  ;;  %918 = vrot.lane.b32.xlu1 %v901_v14, %s3685_s7 }
 0x176   : > { %v4242_v11 = vpop.permute.xlu0 %912 }
 0x177   : > { %6896 = vst [vmem:[#allocation41_spill] sm:$0xff] %v4242_v11 }
 0x179   : > { %1075 = vrot.lane.b32.xlu0 %v1067_v29, %s3688_s24  ;;  %951 = vrot.lane.b32.xlu1 %v938_v15, %s3686_s25  ;;  %v1066_v15 = vmul.f32 %v4139_v9, %v3981_v0  ;;  %v1088_v29 = vmul.f32 %v4161_v30, %v3871_v16 }
 0x17d   : > { %1096 = vrot.lane.b32.xlu0 %v1089_v35, %s3688_s24  ;;  %955 = vrot.lane.b32.xlu1 %v940_v12, %s3686_s25  ;;  %v4256_v12 = vstv %s3326_s4  ;;  %s3335_s4 = sld [smem:[#allocation10 + $0x14]] }
 0x181   : > { %1117 = vrot.lane.b32.xlu0 %v1111_v43, %s3689_s18  ;;  %959 = vrot.lane.b32.xlu1 %v942_v17, %s3686_s25  ;;  %v1266_v43 = vmul.f32 0.0, %v4256_v12 }
 0x183   : > { %v4244_v14 = vpop.permute.xlu1 %501 }
 0x184   : > { %6897 = vst [vmem:[#allocation42_spill] sm:$0xff] %v4244_v14 }
 0x185   : > { %1121 = vrot.lane.b32.xlu0 %v1113_v49, %s3689_s18  ;;  %992 = vrot.lane.b32.xlu1 %v979_v46, %s3686_s25  ;;  %v1090_v46 = vmul.f32 %v4161_v30, %v4018_v34 }
 0x189   : > { %1142 = vrot.lane.b32.xlu0 %v1135_v51, %s3689_s18  ;;  %996 = vrot.lane.b32.xlu1 %v981_v21, %s3686_s25  ;;  %v1112_v21 = vmul.f32 %v4169_v36, %v3981_v0 }
 0x18d   : > { %1163 = vrot.lane.b32.xlu0 %v1157_v24, %s3690_s22  ;;  %1000 = vrot.lane.b32.xlu1 %v983_v55, %s3686_s25  ;;  %v1134_v24 = vmul.f32 %v4191_v50, %v3871_v16 }
 0x191   : > { %1167 = vrot.lane.b32.xlu0 %v1159_v42, %s3690_s22  ;;  %1027 = vrot.lane.b32.xlu1 %v1020_v62, %s3687_s17  ;;  %v4283_v42 = vstv %s3327_s8  ;;  %s3336_s8 = sld [smem:[#allocation10 + $0x45]] }
 0x192   : > { %v1307_v62 = vmul.f32 0.0, %v4283_v42 }
 0x195   : > { %1188 = vrot.lane.b32.xlu0 %v1181_v2, %s3690_s22  ;;  %1048 = vrot.lane.b32.xlu1 %v1042_v58, %s3687_s17  ;;  %v1136_v2 = vmul.f32 %v4191_v50, %v4018_v34  ;;  %v1180_v50 = vmul.f32 %v4221_v44, %v3871_v16 }
 0x199   : > { %1237 = vrot.lane.b32.xlu0 %v1225_v28, %s3685_s7  ;;  %1052 = vrot.lane.b32.xlu1 %v1044_v8, %s3687_s17 }
 0x19d   : > { %1241 = vrot.lane.b32.xlu0 %v1225_v28, %s3685_s7  ;;  %1073 = vrot.lane.b32.xlu1 %v1066_v15, %s3688_s24  ;;  %v1158_v15 = vmul.f32 %v4201_v54, %v3981_v0 }
 0x19f   : > { %v4252_v6 = vpop.permute.xlu0 %659  ;;  %v4254_v35 = vpop.permute.xlu1 %505 }
 0x1a0   : > { %6898 = vst [vmem:[#allocation43_spill] sm:$0xff] %v4252_v6  ;;  %6899 = vst [vmem:[#allocation44_spill] sm:$0xff] %v4254_v35 }
 0x1a1   : > { %1245 = vrot.lane.b32.xlu0 %v1225_v28, %s3685_s7  ;;  %1094 = vrot.lane.b32.xlu1 %v1088_v29, %s3688_s24 }
 0x1a3   : > { %v4261_v9 = vpop.permute.xlu0 %680  ;;  %v4263_v17 = vpop.permute.xlu1 %543 }
 0x1a4   : > { %6900 = vst [vmem:[#allocation45_spill] sm:$0xff] %v4261_v9  ;;  %6901 = vst [vmem:[#allocation46_spill] sm:$0xff] %v4263_v17 }
 0x1a5   : > { %1278 = vrot.lane.b32.xlu0 %v1266_v43, %s3685_s7  ;;  %1098 = vrot.lane.b32.xlu1 %v1090_v46, %s3688_s24  ;;  %v4310_v46 = vstv %s3328_s15  ;;  %s3339_s15 = sld [smem:[#allocation10 + $0x16]] }
 0x1a6   : > { %v1348_v54 = vmul.f32 0.0, %v4310_v46 }
 0x1a7   : > { %v4269_v49 = vpop.permute.xlu0 %705  ;;  %v4271_v51 = vpop.permute.xlu1 %547 }
 0x1a8   : > { %6902 = vst [vmem:[#allocation47_spill] sm:$0xff] %v4269_v49  ;;  %6903 = vst [vmem:[#allocation48_spill] sm:$0xff] %v4271_v51 }
 0x1a9   : > { %1282 = vrot.lane.b32.xlu0 %v1266_v43, %s3685_s7  ;;  %1119 = vrot.lane.b32.xlu1 %v1112_v21, %s3689_s18 }
 0x1ab   : > { %v4279_v30 = vpop.permute.xlu0 %726  ;;  %v4281_v55 = vpop.permute.xlu1 %584 }
 0x1ac   : > { %6904 = vst [vmem:[#allocation49_spill] sm:$0xff] %v4279_v30  ;;  %6905 = vst [vmem:[#allocation50_spill] sm:$0xff] %v4281_v55 }
 0x1ad   : > { %1286 = vrot.lane.b32.xlu0 %v1266_v43, %s3685_s7  ;;  %1140 = vrot.lane.b32.xlu1 %v1134_v24, %s3689_s18 }
 0x1af   : > { %v4288_v36 = vpop.permute.xlu0 %751  ;;  %v4290_v58 = vpop.permute.xlu1 %588 }
 0x1b0   : > { %6906 = vst [vmem:[#allocation51_spill] sm:$0xff] %v4288_v36  ;;  %6907 = vst [vmem:[#allocation52_spill] sm:$0xff] %v4290_v58 }
 0x1b1   : > { %1319 = vrot.lane.b32.xlu0 %v1307_v62, %s3686_s25  ;;  %1144 = vrot.lane.b32.xlu1 %v1136_v2, %s3689_s18  ;;  %v1182_v2 = vmul.f32 %v4221_v44, %v4018_v34 }
 0x1b3   : > { %v4296_v28 = vpop.permute.xlu0 %772  ;;  %v4298_v8 = vpop.permute.xlu1 %626 }
 0x1b4   : > { %6908 = vst [vmem:[#allocation53_spill] sm:$0xff] %v4296_v28  ;;  %6909 = vst [vmem:[#allocation54_spill] sm:$0xff] %v4298_v8 }
 0x1b5   : > { %1323 = vrot.lane.b32.xlu0 %v1307_v62, %s3686_s25  ;;  %1165 = vrot.lane.b32.xlu1 %v1158_v15, %s3690_s22  ;;  %v4321_v15 = vstv %s3296_s27  ;;  %s3340_s27 = sld [smem:[#allocation10 + $0x47]] }
 0x1b6   : > { %v478_v11 = vmul.f32 %v4321_v15, %v4008_v27 }
 0x1b7   : > { %v4306_v29 = vpop.permute.xlu0 %797  ;;  %v4308_v43 = vpop.permute.xlu1 %630 }
 0x1b8   : > { %6910 = vst [vmem:[#allocation55_spill] sm:$0xff] %v4306_v29  ;;  %6911 = vst [vmem:[#allocation56_spill] sm:$0xff] %v4308_v43  ;;  %v561_v44 = vadd.f32 %v4263_v17, %v478_v11  ;;  %v1389_v11 = vmul.f32 %v4347_v48, %v3866_v13 }
 0x1b9   : > { %1327 = vrot.lane.b32.xlu0 %v1307_v62, %s3686_s25  ;;  %1186 = vrot.lane.b32.xlu1 %v1180_v50, %s3690_s22  ;;  %v1226_v62 = vmul.f32 %v4231_v4, %v3866_v13 }
 0x1ba   : > { %v644_v56 = vadd.f32 %v4298_v8, %v561_v44  ;;  %v470_v44 = vmul.f32 %v4336_v1, %v3981_v0  ;;  %v1391_v8 = vmul.f32 %v4347_v48, %v4000_v20 }
 0x1bb   : > { %v4315_v21 = vpop.permute.xlu0 %818  ;;  %v4317_v24 = vpop.permute.xlu1 %657 }
 0x1bc   : > { %6912 = vst [vmem:[#allocation57_spill] sm:$0xff] %v4315_v21  ;;  %6913 = vst [vmem:[#allocation58_spill] sm:$0xff] %v4317_v24 }
 0x1bd   : > { %1360 = vrot.lane.b32.xlu0 %v1348_v54, %s3686_s25  ;;  %1190 = vrot.lane.b32.xlu1 %v1182_v2, %s3690_s22 }
 0x1bf   : > { %v4327_v50 = vpop.permute.xlu0 %916  ;;  %v4329_v53 = vpop.permute.xlu1 %682 }
 0x1c0   : > { %6914 = vst [vmem:[#allocation59_spill] sm:$0xff] %v4327_v50  ;;  %6915 = vst [vmem:[#allocation60_spill] sm:$0xff] %v4329_v53  ;;  %v1228_v50 = vmul.f32 %v4231_v4, %v3981_v0 }
 0x1c1   : > { %1364 = vrot.lane.b32.xlu0 %v1348_v54, %s3686_s25  ;;  %1239 = vrot.lane.b32.xlu1 %v1226_v62, %s3685_s7  ;;  %v522_v62 = vadd.f32 %v4254_v35, %v472_v3  ;;  %v1267_v3 = vmul.f32 %v4256_v12, %v3871_v16 }
 0x1c3   : > { %v4338_v40 = vpop.permute.xlu0 %949  ;;  %v4340_v2 = vpop.permute.xlu1 %703 }
 0x1c4   : > { %6916 = vst [vmem:[#allocation61_spill] sm:$0xff] %v4338_v40  ;;  %6917 = vst [vmem:[#allocation62_spill] sm:$0xff] %v4340_v2 }
 0x1c5   : > { %1368 = vrot.lane.b32.xlu0 %v1348_v54, %s3686_s25  ;;  %1243 = vrot.lane.b32.xlu1 %v1228_v50, %s3685_s7  ;;  %v605_v54 = vadd.f32 %v4290_v58, %v522_v62  ;;  %v690_v50 = vadd.f32 %v4261_v9, %v644_v56  ;;  %v480_v56 = vmul.f32 %v4321_v15, %v4018_v34 }
 0x1c6   : > { %v1413_v58 = vmul.f32 %v4375_v57, %v4008_v27 }
 0x1c7   : > { %v4354_v40 = vpop.permute.xlu0 %953  ;;  %v4356_v47 = vpop.permute.xlu1 %728  ;;  %v736_v62 = vadd.f32 %v4279_v30, %v690_v50 }
 0x1c8   : > { %6918 = vst [vmem:[#allocation63_spill] sm:$0xff] %v4354_v40  ;;  %6919 = vst [vmem:[#allocation64_spill] sm:$0xff] %v4356_v47  ;;  %v520_v40 = vadd.f32 %v4244_v14, %v470_v44  ;;  %v563_v44 = vadd.f32 %v4271_v51, %v480_v56 }
 0x1c9   : > { %1395 = vrot.lane.b32.xlu0 %v1389_v11, %s3687_s17  ;;  %1247 = vrot.lane.b32.xlu1 %v1230_v22, %s3685_s7  ;;  %v669_v22 = vadd.f32 %v4252_v6, %v605_v54  ;;  %v4394_v54 = vstv %s3331_s23  ;;  %s4581_s23 = sld [smem:[#allocation10 + $0x18]] }
 0x1ca   : > { %v603_v11 = vadd.f32 %v4281_v55, %v520_v40  ;;  %v1269_v40 = vmul.f32 %v4256_v12, %v4008_v27  ;;  %v646_v50 = vadd.f32 %v4308_v43, %v563_v44  ;;  %v1414_v43 = vmul.f32 %v4375_v57, %v4018_v34 }
 0x1cb   : > { %v4369_v61 = vpop.permute.xlu0 %957  ;;  %v4371_v4 = vpop.permute.xlu1 %749 }
 0x1cc   : > { %6920 = vst [vmem:[#allocation65_spill] sm:$0xff] %v4369_v61  ;;  %6921 = vst [vmem:[#allocation66_spill] sm:$0xff] %v4371_v4  ;;  %v667_v61 = vadd.f32 %v4317_v24, %v603_v11  ;;  %v1435_v11 = vmul.f32 %v4394_v54, %v3866_v13 }
 0x1cd   : > { %1399 = vrot.lane.b32.xlu0 %v1391_v8, %s3687_s17  ;;  %1280 = vrot.lane.b32.xlu1 %v1267_v3, %s3685_s7  ;;  %v715_v8 = vadd.f32 %v4269_v49, %v669_v22  ;;  %v782_v3 = vadd.f32 %v4296_v28, %v736_v62  ;;  %v1271_v62 = vmul.f32 %v4256_v12, %v4018_v34  ;;  %v4505_v28 = vstv %s3336_s8  ;;  %s4642_s8 = sld [smem:[#allocation10 + $0x1a]] }
 0x1ce   : > { %v713_v56 = vadd.f32 %v4340_v2, %v667_v61  ;;  %v1353_v2 = vmul.f32 %v4310_v46, %v4018_v34 }
 0x1cf   : > { %v4386_v9 = vpop.permute.xlu0 %990  ;;  %v4388_v14 = vpop.permute.xlu1 %774  ;;  %v761_v61 = vadd.f32 %v4288_v36, %v715_v8  ;;  %v1551_v36 = vmul.f32 %v4505_v28, %v4008_v27  ;;  %v6695_v37 = vstv %s4581_s23 }
 0x1d0   : > { %6922 = vst [vmem:[#allocation67_spill] sm:$0xff] %v4386_v9  ;;  %6923 = vst [vmem:[#allocation68_spill] sm:$0xff] %v4388_v14  ;;  %v692_v9 = vadd.f32 %v4329_v53, %v646_v50  ;;  %v759_v24 = vadd.f32 %v4371_v4, %v713_v56  ;;  %v1308_v50 = vmul.f32 %v4283_v42, %v3866_v13 }
 0x1d1   : > { %1420 = vrot.lane.b32.xlu0 %v1413_v58, %s3687_s17  ;;  %1284 = vrot.lane.b32.xlu1 %v1269_v40, %s3685_s7  ;;  %v828_v58 = vadd.f32 %v4315_v21, %v782_v3  ;;  %v1390_v53 = vmul.f32 %v4347_v48, %v3981_v0 }
 0x1d2   : > { %v738_v44 = vadd.f32 %v4356_v47, %v692_v9  ;;  %v1437_v9 = vmul.f32 %v4394_v54, %v4000_v20 }
 0x1d3   : > { %v4406_v30 = vpop.permute.xlu0 %994  ;;  %v4408_v22 = vpop.permute.xlu1 %795 }
 0x1d4   : > { %6924 = vst [vmem:[#allocation69_spill] sm:$0xff] %v4406_v30  ;;  %6925 = vst [vmem:[#allocation70_spill] sm:$0xff] %v4408_v22  ;;  %v805_v40 = vadd.f32 %v4408_v22, %v759_v24  ;;  %v784_v56 = vadd.f32 %v4388_v14, %v738_v44  ;;  %v807_v24 = vadd.f32 %v4306_v29, %v761_v61  ;;  %v4445_v29 = vstv %s3333_s30  ;;  %s3309_s30 = sld [smem:[#allocation10 + $0x7]] }
 0x1d5   : > { %1441 = vrot.lane.b32.xlu0 %v1435_v11, %s3688_s24  ;;  %1288 = vrot.lane.b32.xlu1 %v1271_v62, %s3685_s7  ;;  %v4431_v11 = vstv %s3332_s29  ;;  %v1310_v61 = vmul.f32 %v4283_v42, %v3981_v0  ;;  %v1483_v21 = vmul.f32 %v4445_v29, %v4000_v20  ;;  %v4479_v22 = vstv %s3335_s4  ;;  %s4593_s29 = sld [smem:[#allocation10 + $0x49]]  ;;  %s4623_s4 = sld [smem:[#allocation10 + $0x4a]] }
 0x1d6   : > { %v4421_v4 = vadd.f32 %v828_v58, %v805_v40  ;;  %v1459_v40 = vmul.f32 %v4431_v11, %v4008_v27  ;;  %v4517_v30 = vstv %s3339_s15  ;;  %v1482_v32 = vmul.f32 %v4445_v29, %v3981_v0  ;;  %s4662_s15 = sld [smem:[#allocation10 + $0x4b]] }
 0x1d7   : > { %v4423_v12 = vpop.permute.xlu0 %998  ;;  %v4425_v8 = vpop.permute.xlu1 %820 }
 0x1d8   : > { %6926 = vst [vmem:[#allocation71_spill] sm:$0xff] %v4423_v12  ;;  %6927 = vst [vmem:[#allocation72_spill] sm:$0xff] %v4425_v8  ;;  %v830_v3 = vadd.f32 %v4425_v8, %v784_v56  ;;  %v4467_v8 = vstv %s3334_s6  ;;  %v1351_v12 = vmul.f32 %v4310_v46, %v4008_v27  ;;  %s4606_s6 = sld [smem:[#allocation10 + $0x19]] }
 0x1d9   : > { %1445 = vrot.lane.b32.xlu0 %v1437_v9, %s3688_s24  ;;  %1321 = vrot.lane.b32.xlu1 %v1308_v50, %s3686_s25  ;;  %v1481_v50 = vmul.f32 %v4445_v29, %v3866_v13 }
 0x1da   : > { %v4435_v62 = vadd.f32 %v830_v3, %v807_v24  ;;  %v1312_v24 = vmul.f32 %v4283_v42, %v4000_v20  ;;  %v1349_v3 = vmul.f32 %v4310_v46, %v3871_v16  ;;  %v1412_v46 = vmul.f32 %v4375_v57, %v3871_v16 }
 0x1db   : > { %v4437_v58 = vpop.permute.xlu0 %1025  ;;  %v4439_v44 = vpop.permute.xlu1 %873 }
 0x1dc   : > { %6928 = vst [vmem:[#allocation73_spill] sm:$0xff] %v4437_v58  ;;  %6929 = vst [vmem:[#allocation74_spill] sm:$0xff] %v4439_v44 }
 0x1dd   : > { %1466 = vrot.lane.b32.xlu0 %v1459_v40, %s3688_s24  ;;  %1325 = vrot.lane.b32.xlu1 %v1310_v61, %s3686_s25 }
 0x1df   : > { %v4451_v56 = vpop.permute.xlu0 %1029  ;;  %v4453_v9 = vpop.permute.xlu1 %877 }
 0x1e0   : > { %6930 = vst [vmem:[#allocation75_spill] sm:$0xff] %v4451_v56  ;;  %6931 = vst [vmem:[#allocation76_spill] sm:$0xff] %v4453_v9 }
 0x1e1   : > { %1487 = vrot.lane.b32.xlu0 %v1481_v50, %s3689_s18  ;;  %1329 = vrot.lane.b32.xlu1 %v1312_v24, %s3686_s25  ;;  %v1505_v24 = vmul.f32 %v4467_v8, %v4008_v27 }
 0x1e3   : > { %v4461_v40 = vpop.permute.xlu0 %1050  ;;  %v4463_v61 = vpop.permute.xlu1 %914 }
 0x1e4   : > { %6932 = vst [vmem:[#allocation77_spill] sm:$0xff] %v4461_v40  ;;  %6933 = vst [vmem:[#allocation78_spill] sm:$0xff] %v4463_v61 }
 0x1e5   : > { %1491 = vrot.lane.b32.xlu0 %v1483_v21, %s3689_s18  ;;  %1362 = vrot.lane.b32.xlu1 %v1349_v3, %s3686_s25  ;;  %v1527_v21 = vmul.f32 %v4479_v22, %v3866_v13  ;;  %v4485_v3 = vld [vmem:[#allocation4] sm:$0xff] }
 0x1e6   : > { %319 = vst.msk [vmem:[#allocation4 + $0x38] sm:$0x7] %vm318_vm4, %v4485_v3  ;;  %327 = vst.msk [vmem:[#allocation5 + $0x38] sm:$0x7] %vm318_vm4, %v4485_v3  ;;  %v1591_v48 = vmul.f32 %v4485_v3, %v4517_v30 }
 0x1e7   : > { %v4471_v42 = vpop.permute.xlu0 %1071  ;;  %v4473_v50 = vpop.permute.xlu1 %918 }
 0x1e8   : > { %6934 = vst [vmem:[#allocation79_spill] sm:$0xff] %v4471_v42  ;;  %6935 = vst [vmem:[#allocation80_spill] sm:$0xff] %v4473_v50 }
 0x1e9   : > { %1512 = vrot.lane.b32.xlu0 %v1505_v24, %s3689_s18  ;;  %1366 = vrot.lane.b32.xlu1 %v1351_v12, %s3686_s25  ;;  %v1529_v24 = vmul.f32 %v4479_v22, %v4000_v20 }
 0x1eb   : > { %v4489_v14 = vpop.permute.xlu0 %1075  ;;  %v4491_v47 = vpop.permute.xlu1 %951 }
 0x1ec   : > { %6936 = vst [vmem:[#allocation81_spill] sm:$0xff] %v4489_v14  ;;  %6937 = vst [vmem:[#allocation82_spill] sm:$0xff] %v4491_v47 }
 0x1ed   : > { %1533 = vrot.lane.b32.xlu0 %v1527_v21, %s3690_s22  ;;  %1370 = vrot.lane.b32.xlu1 %v1353_v2, %s3686_s25 }
 0x1ef   : > { %v4497_v13 = vpop.permute.xlu0 %1096  ;;  %v4499_v12 = vpop.permute.xlu1 %955 }
 0x1f0   : > { %6938 = vst [vmem:[#allocation83_spill] sm:$0xff] %v4497_v13  ;;  %6939 = vst [vmem:[#allocation84_spill] sm:$0xff] %v4499_v12 }
 0x1f1   : > { %1537 = vrot.lane.b32.xlu0 %v1529_v24, %s3690_s22  ;;  %1397 = vrot.lane.b32.xlu1 %v1390_v53, %s3687_s17 }
 0x1f3   : > { %v4511_v2 = vpop.permute.xlu0 %1117  ;;  %v4513_v21 = vpop.permute.xlu1 %959 }
 0x1f4   : > { %6940 = vst [vmem:[#allocation85_spill] sm:$0xff] %v4511_v2  ;;  %6941 = vst [vmem:[#allocation86_spill] sm:$0xff] %v4513_v21 }
 0x1f5   : > { %1558 = vrot.lane.b32.xlu0 %v1551_v36, %s3690_s22  ;;  %1418 = vrot.lane.b32.xlu1 %v1412_v46, %s3687_s17  ;;  %v1436_v36 = vmul.f32 %v4394_v54, %v3981_v0  ;;  %v4537_v46 = vstv %s3340_s27  ;;  %s4682_s27 = sld [smem:[#allocation10 + $0x1b]] }
 0x1f6   : > { %v1619_v57 = vmul.f32 %v4485_v3, %v4537_v46 }
 0x1f7   : > { %v4523_v53 = vpop.permute.xlu0 %1121  ;;  %v4525_v24 = vpop.permute.xlu1 %992 }
 0x1f8   : > { %6942 = vst [vmem:[#allocation87_spill] sm:$0xff] %v4523_v53  ;;  %6943 = vst [vmem:[#allocation88_spill] sm:$0xff] %v4525_v24 }
 0x1f9   : > { %1599 = vrot.lane.b32.xlu0 %v1591_v48, %s3685_s7  ;;  %1422 = vrot.lane.b32.xlu1 %v1414_v43, %s3687_s17  ;;  %v1458_v43 = vmul.f32 %v4431_v11, %v3871_v16 }
 0x1fb   : > { %v4531_v49 = vpop.permute.xlu0 %1142  ;;  %v4533_v55 = vpop.permute.xlu1 %996 }
 0x1fc   : > { %6944 = vst [vmem:[#allocation89_spill] sm:$0xff] %v4531_v49  ;;  %6945 = vst [vmem:[#allocation90_spill] sm:$0xff] %v4533_v55 }
 0x1fd   : > { %1603 = vrot.lane.b32.xlu0 %v1591_v48, %s3685_s7  ;;  %1443 = vrot.lane.b32.xlu1 %v1436_v36, %s3688_s24  ;;  %v1460_v48 = vmul.f32 %v4431_v11, %v4018_v34  ;;  %v4557_v36 = vstv %s3341_s28  ;;  %v4571_v11 = vld [vmem:[#allocation5 + $0x8] sm:$0xff]  ;;  %s4703_s28 = sld [smem:[#allocation10 + $0x4c]] }
 0x1fe   : > { %v1647_v16 = vmul.f32 %v4485_v3, %v4557_v36 }
 0x1ff   : > { %v4545_v51 = vpop.permute.xlu0 %1163  ;;  %v4547_v6 = vpop.permute.xlu1 %1000 }
 0x200   : > { %6946 = vst [vmem:[#allocation91_spill] sm:$0xff] %v4545_v51  ;;  %6947 = vst [vmem:[#allocation92_spill] sm:$0xff] %v4547_v6 }
 0x201   : > { %1627 = vrot.lane.b32.xlu0 %v1619_v57, %s3685_s7  ;;  %1464 = vrot.lane.b32.xlu1 %v1458_v43, %s3688_s24 }
 0x203   : > { %v4551_v54 = vpop.permute.xlu0 %1167  ;;  %v4553_v45 = vpop.permute.xlu1 %1027 }
 0x204   : > { %6948 = vst [vmem:[#allocation93_spill] sm:$0xff] %v4551_v54  ;;  %6949 = vst [vmem:[#allocation94_spill] sm:$0xff] %v4553_v45 }
 0x205   : > { %1631 = vrot.lane.b32.xlu0 %v1619_v57, %s3685_s7  ;;  %1468 = vrot.lane.b32.xlu1 %v1460_v48, %s3688_s24  ;;  %v1504_v57 = vmul.f32 %v4571_v11, %v4467_v8 }
 0x207   : > { %v4563_v17 = vpop.permute.xlu0 %1188  ;;  %v4565_v43 = vpop.permute.xlu1 %1048 }
 0x208   : > { %6950 = vst [vmem:[#allocation95_spill] sm:$0xff] %v4563_v17  ;;  %6951 = vst [vmem:[#allocation96_spill] sm:$0xff] %v4565_v43 }
 0x209   : > { %1655 = vrot.lane.b32.xlu0 %v1647_v16, %s3686_s25  ;;  %1489 = vrot.lane.b32.xlu1 %v1482_v32, %s3689_s18  ;;  %v1675_v32 = vmul.f32 %v4485_v3, %v4579_v52 }
 0x20b   : > { %v4575_v48 = vpop.permute.xlu0 %1237  ;;  %v4577_v35 = vpop.permute.xlu1 %1052 }
 0x20c   : > { %6952 = vst [vmem:[#allocation97_spill] sm:$0xff] %v4575_v48  ;;  %6953 = vst [vmem:[#allocation98_spill] sm:$0xff] %v4577_v35  ;;  %v1506_v48 = vmul.f32 %v4467_v8, %v4018_v34  ;;  %v1550_v8 = vmul.f32 %v4571_v11, %v4505_v28 }
 0x20d   : > { %1659 = vrot.lane.b32.xlu0 %v1647_v16, %s3686_s25  ;;  %1510 = vrot.lane.b32.xlu1 %v1504_v57, %s3689_s18  ;;  %v4597_v16 = vstv %s3310_s16  ;;  %s3354_s16 = sld [smem:[#allocation10 + $0x4e]] }
 0x20e   : > { %6956 = vst [vmem:[#allocation101_spill] sm:$0xff] %v4597_v16 }
 0x20f   : > { %v4587_v29 = vpop.permute.xlu0 %1241  ;;  %v4589_v18 = vpop.permute.xlu1 %1073 }
 0x210   : > { %6954 = vst [vmem:[#allocation99_spill] sm:$0xff] %v4587_v29  ;;  %6955 = vst [vmem:[#allocation100_spill] sm:$0xff] %v4589_v18  ;;  %v1528_v29 = vmul.f32 %v4479_v22, %v3981_v0  ;;  %v1703_v22 = vmul.f32 %v6695_v37, %v3981_v0 }
 0x211   : > { %1683 = vrot.lane.b32.xlu0 %v1675_v32, %s3686_s25  ;;  %1514 = vrot.lane.b32.xlu1 %v1506_v48, %s3689_s18  ;;  %v850_v48 = vmul.f32 %v4597_v16, %v4008_v27 }
 0x213   : > { %v4599_v57 = vpop.permute.xlu0 %1245  ;;  %v4601_v59 = vpop.permute.xlu1 %1094  ;;  %v932_v38 = vadd.f32 %v4463_v61, %v850_v48  ;;  %v1552_v48 = vmul.f32 %v4505_v28, %v4018_v34 }
 0x214   : > { %6957 = vst [vmem:[#allocation102_spill] sm:$0xff] %v4599_v57  ;;  %6958 = vst [vmem:[#allocation103_spill] sm:$0xff] %v4601_v59 }
 0x215   : > { %1687 = vrot.lane.b32.xlu0 %v1675_v32, %s3686_s25  ;;  %1535 = vrot.lane.b32.xlu1 %v1528_v29, %s3690_s22  ;;  %v6697_v32 = vstv %s4593_s29  ;;  %v4625_v29 = vstv %s3309_s30  ;;  %v1014_v25 = vadd.f32 %v4533_v55, %v932_v38  ;;  %s3357_s30 = sld [smem:[#allocation10 + $0x1f]] }
 0x216   : > { %6961 = vst [vmem:[#allocation106_spill] sm:$0xff] %v4625_v29  ;;  %v1719_v37 = vmul.f32 %v6697_v32, %v4008_v27  ;;  %v842_v61 = vmul.f32 %v4625_v29, %v3981_v0 }
 0x217   : > { %v4614_v57 = vpop.permute.xlu0 %1278  ;;  %v4616_v41 = vpop.permute.xlu1 %1098  ;;  %v1060_v32 = vadd.f32 %v4461_v40, %v1014_v25 }
 0x218   : > { %6959 = vst [vmem:[#allocation104_spill] sm:$0xff] %v4614_v57  ;;  %6960 = vst [vmem:[#allocation105_spill] sm:$0xff] %v4616_v41  ;;  %v891_v38 = vadd.f32 %v4439_v44, %v842_v61  ;;  %v6703_v44 = vstv %s4623_s4 }
 0x219   : > { %1707 = vrot.lane.b32.xlu0 %v1703_v22, %s3687_s17  ;;  %1556 = vrot.lane.b32.xlu1 %v1550_v8, %s3690_s22  ;;  %v6700_v22 = vstv %s4606_s6  ;;  %v844_v8 = vmul.f32 %v4625_v29, %v4000_v20 }
 0x21a   : > { %v1735_v55 = vmul.f32 %v6700_v22, %v3981_v0  ;;  %v973_v61 = vadd.f32 %v4499_v12, %v891_v38  ;;  %v1106_v22 = vadd.f32 %v4497_v13, %v1060_v32  ;;  %v1751_v38 = vmul.f32 %v6703_v44, %v4008_v27 }
 0x21b   : > { %v4630_v57 = vpop.permute.xlu0 %1282  ;;  %v4632_v19 = vpop.permute.xlu1 %1119 }
 0x21c   : > { %6962 = vst [vmem:[#allocation107_spill] sm:$0xff] %v4630_v57  ;;  %6963 = vst [vmem:[#allocation108_spill] sm:$0xff] %v4632_v19  ;;  %v1152_v44 = vadd.f32 %v4531_v49, %v1106_v22  ;;  %v6997_v49 = vstv %s4642_s8 }
 0x21d   : > { %1723 = vrot.lane.b32.xlu0 %v1719_v37, %s3687_s17  ;;  %1560 = vrot.lane.b32.xlu1 %v1552_v48, %s3690_s22  ;;  %v1592_v37 = vmul.f32 %v4517_v30, %v3981_v0  ;;  %v893_v48 = vadd.f32 %v4453_v9, %v844_v8  ;;  %v1594_v8 = vmul.f32 %v4517_v30, %v4000_v20 }
 0x21f   : > { %v4650_v57 = vpop.permute.xlu0 %1286  ;;  %v4652_v28 = vpop.permute.xlu1 %1140  ;;  %v975_v25 = vadd.f32 %v4513_v21, %v893_v48  ;;  %v6705_v48 = vstv %s4642_s8  ;;  %s3324_s8 = sld [smem:[#allocation10 + $0x3f]] }
 0x220   : > { %6964 = vst [vmem:[#allocation109_spill] sm:$0xff] %v4650_v57  ;;  %6965 = vst [vmem:[#allocation110_spill] sm:$0xff] %v4652_v28  ;;  %v1037_v57 = vadd.f32 %v4553_v45, %v973_v61 }
 0x221   : > { %1739 = vrot.lane.b32.xlu0 %v1735_v55, %s3688_s24  ;;  %1601 = vrot.lane.b32.xlu1 %v1592_v37, %s3685_s7  ;;  %v852_v55 = vmul.f32 %v4597_v16, %v4018_v34  ;;  %v1039_v61 = vadd.f32 %v4451_v56, %v975_v25  ;;  %v1198_v25 = vadd.f32 %v4563_v17, %v1152_v44  ;;  %v6714_v17 = vstv %s4703_s28 }
 0x222   : > { %v1083_v37 = vadd.f32 %v4589_v18, %v1037_v57  ;;  %v1767_v18 = vmul.f32 %v6705_v48, %v3981_v0  ;;  %v7006_v56 = vstv %s4703_s28  ;;  %s3361_s28 = sld [smem:[#allocation10 + $0x21]] }
 0x223   : > { %v4669_v40 = vpop.permute.xlu0 %1319  ;;  %v4671_v51 = vpop.permute.xlu1 %1144  ;;  %v934_v32 = vadd.f32 %v4473_v50, %v852_v55  ;;  %v6707_v55 = vstv %s4662_s15 }
 0x224   : > { %6966 = vst [vmem:[#allocation111_spill] sm:$0xff] %v4669_v40  ;;  %6967 = vst [vmem:[#allocation112_spill] sm:$0xff] %v4671_v51  ;;  %v1129_v30 = vadd.f32 %v4632_v19, %v1083_v37  ;;  %v1085_v37 = vadd.f32 %v4489_v14, %v1039_v61  ;;  %v1783_v44 = vmul.f32 %v6707_v55, %v4008_v27  ;;  %v4730_v55 = vld [vmem:[#allocation4 + $0x18] sm:$0xff] }
 0x225   : > { %1755 = vrot.lane.b32.xlu0 %v1751_v38, %s3688_s24  ;;  %1605 = vrot.lane.b32.xlu1 %v1594_v8, %s3685_s7  ;;  %v1620_v38 = vmul.f32 %v4537_v46, %v4008_v27  ;;  %v1016_v8 = vadd.f32 %v4547_v6, %v934_v32 }
 0x226   : > { %v1131_v61 = vadd.f32 %v4523_v53, %v1085_v37 }
 0x227   : > { %v4690_v40 = vpop.permute.xlu0 %1323  ;;  %v4692_v57 = vpop.permute.xlu1 %1165  ;;  %v1062_v0 = vadd.f32 %v4577_v35, %v1016_v8  ;;  %v6994_v35 = vstv %s4623_s4  ;;  %s3359_s4 = sld [smem:[#allocation10 + $0x20]] }
 0x228   : > { %6968 = vst [vmem:[#allocation113_spill] sm:$0xff] %v4690_v40  ;;  %6969 = vst [vmem:[#allocation114_spill] sm:$0xff] %v4692_v57  ;;  %v1175_v22 = vadd.f32 %v4692_v57, %v1129_v30 }
 0x229   : > { %1771 = vrot.lane.b32.xlu0 %v1767_v18, %s3689_s18  ;;  %1629 = vrot.lane.b32.xlu1 %v1620_v38, %s3685_s7  ;;  %v1622_v18 = vmul.f32 %v4537_v46, %v4018_v34  ;;  %v1108_v30 = vadd.f32 %v4616_v41, %v1062_v0  ;;  %v6710_v38 = vstv %s4682_s27  ;;  %v1648_v0 = vmul.f32 %v4730_v55, %v4557_v36 }
 0x22a   : > { %v4709_v48 = vadd.f32 %v1198_v25, %v1175_v22  ;;  %v1799_v46 = vmul.f32 %v4730_v55, %v6710_v38  ;;  %v1815_v38 = vmul.f32 %v6714_v17, %v4008_v27  ;;  %v6988_v41 = vstv %s4593_s29  ;;  %s3356_s29 = sld [smem:[#allocation10 + $0x4f]] }
 0x22b   : > { %v4711_v19 = vpop.permute.xlu0 %1327  ;;  %v4713_v32 = vpop.permute.xlu1 %1186  ;;  %v1154_v8 = vadd.f32 %v4671_v51, %v1108_v30  ;;  %v1650_v51 = vmul.f32 %v4557_v36, %v4000_v20 }
 0x22c   : > { %6970 = vst [vmem:[#allocation115_spill] sm:$0xff] %v4709_v48  ;;  %6971 = vst [vmem:[#allocation116_spill] sm:$0xff] %v4711_v19 }
 0x22d   : > { %6972 = vst [vmem:[#allocation117_spill] sm:$0xff] %v4713_v32  ;;  %1787 = vrot.lane.b32.xlu0 %v1783_v44, %s3689_s18  ;;  %1633 = vrot.lane.b32.xlu1 %v1622_v18, %s3685_s7  ;;  %v1177_v44 = vadd.f32 %v4551_v54, %v1131_v61  ;;  %v6713_v61 = vrot.slane %v4709_v48, 1  ;;  %v4899_v48 = vstv %s3357_s30  ;;  %v4937_v28 = vstv %s3359_s4  ;;  %s3337_s30 = sld [smem:[#allocation10 + $0x15]]  ;;  %s3338_s4 = sld [smem:[#allocation10 + $0x46]] }
 0x22f   : > { %v4726_v25 = vpop.permute.xlu0 %1360  ;;  %v4728_v22 = vpop.permute.xlu1 %1190 }
 0x230   : > { %6973 = vst [vmem:[#allocation118_spill] sm:$0xff] %v4726_v25  ;;  %6974 = vst [vmem:[#allocation119_spill] sm:$0xff] %v4728_v22  ;;  %v1200_v18 = vadd.f32 %v4728_v22, %v1154_v8  ;;  %v4752_v8 = vstv %s3353_s19  ;;  %v4796_v22 = vstv %s3354_s16  ;;  %v6991_v25 = vstv %s4606_s6  ;;  %s3358_s6 = sld [smem:[#allocation10 + $0x50]]  ;;  %s3362_s19 = sld [smem:[#allocation10 + $0x52]] }
 0x231   : > { %1803 = vrot.lane.b32.xlu0 %v1799_v46, %s3690_s22  ;;  %1657 = vrot.lane.b32.xlu1 %v1648_v0, %s3686_s25  ;;  %v1851_v46 = vmul.f32 %v4485_v3, %v4752_v8  ;;  %v4866_v50 = vstv %s3356_s29  ;;  %s3363_s16 = sld [smem:[#allocation10 + $0x22]]  ;;  %s3367_s29 = sld [smem:[#allocation10 + $0x24]] }
 0x232   : > { %v1206_v37 = vadd.f32 %v1200_v18, %v1177_v44 }
 0x233   : > { %v4742_v30 = vpop.permute.xlu0 %1364  ;;  %v4744_v57 = vpop.permute.xlu1 %1239 }
 0x234   : > { %6975 = vst [vmem:[#allocation120_spill] sm:$0xff] %v4742_v30  ;;  %6976 = vst [vmem:[#allocation121_spill] sm:$0xff] %v4744_v57  ;;  %v2958_v54 = vrot.slane %v1206_v37, 1 }
 0x235   : > { %1819 = vrot.lane.b32.xlu0 %v1815_v38, %s3690_s22  ;;  %1661 = vrot.lane.b32.xlu1 %v1650_v51, %s3686_s25  ;;  %v1676_v51 = vmul.f32 %v4579_v52, %v4008_v27  ;;  %v4775_v38 = vld [vmem:[#allocation4 + $0x30] sm:$0x7] }
 0x236   : > { %v2959_v0 = vsel %vm2949_vm5, %v6713_v61, %v2958_v54  ;;  %v4762_v44 = vadd.f32 %v2958_v54, %v4435_v62  ;;  %v1855_v27 = vmul.f32 %v4752_v8, %v4775_v38  ;;  %v6985_v61 = vstv %s4581_s23  ;;  %s3355_s23 = sld [smem:[#allocation10 + $0x1e]] }
 0x237   : > { %v4765_v20 = vadd.f32 %v2959_v0, %v4421_v4  ;;  %v4767_v36 = vpop.permute.xlu0 %1368  ;;  %v4769_v18 = vpop.permute.xlu1 %1243  ;;  %v1678_v4 = vmul.f32 %v4579_v52, %v4018_v34  ;;  %v1892_v34 = vmul.f32 %v4485_v3, %v4796_v22 }
 0x238   : > { %6977 = vst [vmem:[#allocation122_spill] sm:$0xff] %v4762_v44  ;;  %6979 = vst [vmem:[#allocation124_spill] sm:$0xff] %v4767_v36 }
 0x239   : > { %6978 = vst [vmem:[#allocation123_spill] sm:$0xff] %v4765_v20  ;;  %6980 = vst [vmem:[#allocation125_spill] sm:$0xff] %v4769_v18  ;;  %1863 = vrot.lane.b32.xlu0 %v1851_v46, %s3685_s7  ;;  %1685 = vrot.lane.b32.xlu1 %v1676_v51, %s3686_s25  ;;  %v4791_v51 = vld [vmem:[#allocation4 + $0x28] sm:$0xff] }
 0x23a   : > { %v1704_v17 = vmul.f32 %v4791_v51, %v6985_v61  ;;  %v4813_v61 = vld [vmem:[#allocation5 + $0x30] sm:$0x7]  ;;  %v1736_v40 = vmul.f32 %v4791_v51, %v6991_v25  ;;  %v1768_v53 = vmul.f32 %v4791_v51, %v6997_v49 }
 0x23b   : > { %v4777_v62 = vpop.permute.xlu0 %1395  ;;  %v4779_v54 = vpop.permute.xlu1 %1247  ;;  %v1978_v9 = vmul.f32 %v4866_v50, %v4813_v61 }
 0x23c   : > { %6981 = vst [vmem:[#allocation126_spill] sm:$0xff] %v4777_v62  ;;  %6982 = vst [vmem:[#allocation127_spill] sm:$0xff] %v4779_v54  ;;  %v4833_v45 = vstv %s3355_s23  ;;  %s3364_s23 = sld [smem:[#allocation10 + $0x53]] }
 0x23d   : > { %1867 = vrot.lane.b32.xlu0 %v1851_v46, %s3685_s7  ;;  %1689 = vrot.lane.b32.xlu1 %v1678_v4, %s3686_s25  ;;  %v4806_v4 = vld [vmem:[#allocation5 + $0x28] sm:$0xff]  ;;  %v1937_v49 = vmul.f32 %v4833_v45, %v4775_v38 }
 0x23e   : > { %v1720_v36 = vmul.f32 %v4806_v4, %v6988_v41  ;;  %v1896_v41 = vmul.f32 %v4796_v22, %v4813_v61  ;;  %v1752_v30 = vmul.f32 %v4806_v4, %v6994_v35  ;;  %v1816_v21 = vmul.f32 %v4806_v4, %v7006_v56  ;;  %v4891_v56 = vld [vmem:[#allocation4 + $0x38] sm:$0x7] }
 0x23f   : > { %v4787_v37 = vpop.permute.xlu0 %1399  ;;  %v4789_v0 = vpop.permute.xlu1 %1280  ;;  %v1895_v39 = vmul.f32 %v4806_v4, %v4796_v22 }
 0x240   : > { %6983 = vst [vmem:[#allocation128_spill] sm:$0xff] %v4787_v37  ;;  %6984 = vst [vmem:[#allocation129_spill] sm:$0xff] %v4789_v0 }
 0x241   : > { %1871 = vrot.lane.b32.xlu0 %v1855_v27, %s3685_s7  ;;  %1709 = vrot.lane.b32.xlu1 %v1704_v17, %s3687_s17 }
 0x243   : > { %v4802_v52 = vpop.permute.xlu0 %1420  ;;  %v4804_v46 = vpop.permute.xlu1 %1284 }
 0x244   : > { %6986 = vst [vmem:[#allocation130_spill] sm:$0xff] %v4802_v52  ;;  %6987 = vst [vmem:[#allocation131_spill] sm:$0xff] %v4804_v46 }
 0x245   : > { %1904 = vrot.lane.b32.xlu0 %v1892_v34, %s3685_s7  ;;  %1725 = vrot.lane.b32.xlu1 %v1720_v36, %s3687_s17 }
 0x247   : > { %v4815_v17 = vpop.permute.xlu0 %1441  ;;  %v4817_v27 = vpop.permute.xlu1 %1288 }
 0x248   : > { %6989 = vst [vmem:[#allocation132_spill] sm:$0xff] %v4815_v17  ;;  %6990 = vst [vmem:[#allocation133_spill] sm:$0xff] %v4817_v27  ;;  %v4919_v17 = vld [vmem:[#allocation5 + $0x18] sm:$0xff] }
 0x249   : > { %1908 = vrot.lane.b32.xlu0 %v1892_v34, %s3685_s7  ;;  %1741 = vrot.lane.b32.xlu1 %v1736_v40, %s3688_s24  ;;  %v1933_v40 = vmul.f32 %v4485_v3, %v4833_v45  ;;  %v1893_v32 = vmul.f32 %v4919_v17, %v4796_v22 }
 0x24b   : > { %v4826_v19 = vpop.permute.xlu0 %1445  ;;  %v4828_v36 = vpop.permute.xlu1 %1321 }
 0x24c   : > { %6992 = vst [vmem:[#allocation134_spill] sm:$0xff] %v4826_v19  ;;  %6993 = vst [vmem:[#allocation135_spill] sm:$0xff] %v4828_v36 }
 0x24d   : > { %1912 = vrot.lane.b32.xlu0 %v1896_v41, %s3685_s7  ;;  %1757 = vrot.lane.b32.xlu1 %v1752_v30, %s3688_s24  ;;  %v7000_v41 = vstv %s4662_s15  ;;  %s3323_s15 = sld [smem:[#allocation10 + $0xe]] }
 0x24e   : > { %v1784_v6 = vmul.f32 %v4806_v4, %v7000_v41 }
 0x24f   : > { %v4839_v25 = vpop.permute.xlu0 %1466  ;;  %v4841_v34 = vpop.permute.xlu1 %1325 }
 0x250   : > { %6995 = vst [vmem:[#allocation136_spill] sm:$0xff] %v4839_v25  ;;  %6996 = vst [vmem:[#allocation137_spill] sm:$0xff] %v4841_v34 }
 0x251   : > { %1945 = vrot.lane.b32.xlu0 %v1933_v40, %s3686_s25  ;;  %1773 = vrot.lane.b32.xlu1 %v1768_v53, %s3689_s18  ;;  %v7003_v53 = vstv %s4682_s27  ;;  %s3360_s27 = sld [smem:[#allocation10 + $0x51]] }
 0x252   : > { %v1800_v12 = vmul.f32 %v4791_v51, %v7003_v53 }
 0x253   : > { %v4848_v35 = vpop.permute.xlu0 %1487  ;;  %v4850_v30 = vpop.permute.xlu1 %1329  ;;  %v4964_v59 = vstv %s3323_s15  ;;  %s3370_s15 = sld [smem:[#allocation10 + $0x56]] }
 0x254   : > { %6998 = vst [vmem:[#allocation138_spill] sm:$0xff] %v4848_v35  ;;  %6999 = vst [vmem:[#allocation139_spill] sm:$0xff] %v4850_v30  ;;  %v2015_v35 = vmul.f32 %v4730_v55, %v4899_v48 }
 0x255   : > { %1949 = vrot.lane.b32.xlu0 %v1933_v40, %s3686_s25  ;;  %1789 = vrot.lane.b32.xlu1 %v1784_v6, %s3689_s18  ;;  %v1974_v40 = vmul.f32 %v4485_v3, %v4866_v50  ;;  %7022 = vst [vmem:[#allocation159_spill] sm:$0xff] %v4964_v59 }
 0x257   : > { %v4859_v13 = vpop.permute.xlu0 %1491  ;;  %v4861_v14 = vpop.permute.xlu1 %1362 }
 0x258   : > { %7001 = vst [vmem:[#allocation140_spill] sm:$0xff] %v4859_v13  ;;  %7002 = vst [vmem:[#allocation141_spill] sm:$0xff] %v4861_v14 }
 0x259   : > { %1953 = vrot.lane.b32.xlu0 %v1937_v49, %s3686_s25  ;;  %1805 = vrot.lane.b32.xlu1 %v1800_v12, %s3690_s22  ;;  %v1852_v12 = vmul.f32 %v4730_v55, %v4752_v8 }
 0x25b   : > { %v4872_v6 = vpop.permute.xlu0 %1512  ;;  %v4874_v41 = vpop.permute.xlu1 %1366 }
 0x25c   : > { %7004 = vst [vmem:[#allocation142_spill] sm:$0xff] %v4872_v6  ;;  %7005 = vst [vmem:[#allocation143_spill] sm:$0xff] %v4874_v41 }
 0x25d   : > { %1986 = vrot.lane.b32.xlu0 %v1974_v40, %s3686_s25  ;;  %1821 = vrot.lane.b32.xlu1 %v1816_v21, %s3690_s22  ;;  %v1854_v21 = vmul.f32 %v4791_v51, %v4752_v8 }
 0x25f   : > { %v4881_v53 = vpop.permute.xlu0 %1533  ;;  %v4883_v49 = vpop.permute.xlu1 %1370 }
 0x260   : > { %7007 = vst [vmem:[#allocation144_spill] sm:$0xff] %v4881_v53  ;;  %7008 = vst [vmem:[#allocation145_spill] sm:$0xff] %v4883_v49 }
 0x261   : > { %1990 = vrot.lane.b32.xlu0 %v1974_v40, %s3686_s25  ;;  %1865 = vrot.lane.b32.xlu1 %v1852_v12, %s3685_s7  ;;  %v1856_v40 = vmul.f32 %v4752_v8, %v4891_v56 }
 0x263   : > { %v4893_v20 = vpop.permute.xlu0 %1537  ;;  %v4895_v44 = vpop.permute.xlu1 %1397 }
 0x264   : > { %7009 = vst [vmem:[#allocation146_spill] sm:$0xff] %v4893_v20  ;;  %7010 = vst [vmem:[#allocation147_spill] sm:$0xff] %v4895_v44 }
 0x265   : > { %1994 = vrot.lane.b32.xlu0 %v1978_v9, %s3686_s25  ;;  %1869 = vrot.lane.b32.xlu1 %v1854_v21, %s3685_s7  ;;  %v2017_v9 = vmul.f32 %v4899_v48, %v4891_v56 }
 0x267   : > { %v4905_v12 = vpop.permute.xlu0 %1558  ;;  %v4907_v53 = vpop.permute.xlu1 %1418 }
 0x268   : > { %7011 = vst [vmem:[#allocation148_spill] sm:$0xff] %v4905_v12  ;;  %7012 = vst [vmem:[#allocation149_spill] sm:$0xff] %v4907_v53  ;;  %v2061_v53 = vmul.f32 %v4730_v55, %v4937_v28 }
 0x269   : > { %2021 = vrot.lane.b32.xlu0 %v2015_v35, %s3687_s17  ;;  %1873 = vrot.lane.b32.xlu1 %v1856_v40, %s3685_s7  ;;  %v4925_v35 = vstv %s3358_s6  ;;  %v4927_v40 = vld [vmem:[#allocation5 + $0x38] sm:$0x7]  ;;  %s3368_s6 = sld [smem:[#allocation10 + $0x55]] }
 0x26b   : > { %v4915_v21 = vpop.permute.xlu0 %1599  ;;  %v4917_v8 = vpop.permute.xlu1 %1422 }
 0x26c   : > { %7013 = vst [vmem:[#allocation150_spill] sm:$0xff] %v4915_v21  ;;  %7014 = vst [vmem:[#allocation151_spill] sm:$0xff] %v4917_v8  ;;  %v2039_v21 = vmul.f32 %v4806_v4, %v4925_v35 }
 0x26d   : > { %2025 = vrot.lane.b32.xlu0 %v2017_v9, %s3687_s17  ;;  %1906 = vrot.lane.b32.xlu1 %v1893_v32, %s3685_s7  ;;  %v1897_v32 = vmul.f32 %v4796_v22, %v4927_v40  ;;  %v4943_v9 = vstv %s3324_s8  ;;  %s3369_s8 = sld [smem:[#allocation10 + $0x25]] }
 0x26e   : > { %7017 = vst [vmem:[#allocation154_spill] sm:$0xff] %v4943_v9  ;;  %v1220_v22 = vmul.f32 %v4919_v17, %v4943_v9 }
 0x26f   : > { %v4929_v2 = vpop.permute.xlu0 %1603  ;;  %v4931_v33 = vpop.permute.xlu1 %1443 }
 0x270   : > { %7015 = vst [vmem:[#allocation152_spill] sm:$0xff] %v4929_v2  ;;  %7016 = vst [vmem:[#allocation153_spill] sm:$0xff] %v4931_v33 }
 0x271   : > { %2046 = vrot.lane.b32.xlu0 %v2039_v21, %s3687_s17  ;;  %1910 = vrot.lane.b32.xlu1 %v1895_v39, %s3685_s7  ;;  %v2063_v39 = vmul.f32 %v4937_v28, %v4891_v56 }
 0x273   : > { %v4945_v2 = vpop.permute.xlu0 %1627  ;;  %v4947_v42 = vpop.permute.xlu1 %1464 }
 0x274   : > { %7018 = vst [vmem:[#allocation155_spill] sm:$0xff] %v4945_v2  ;;  %7019 = vst [vmem:[#allocation156_spill] sm:$0xff] %v4947_v42  ;;  %v1934_v2 = vmul.f32 %v4730_v55, %v4833_v45  ;;  %v1302_v42 = vadd.f32 %v4804_v46, %v1220_v22  ;;  %v1936_v22 = vmul.f32 %v4791_v51, %v4833_v45 }
 0x275   : > { %2067 = vrot.lane.b32.xlu0 %v2061_v53, %s3688_s24  ;;  %1914 = vrot.lane.b32.xlu1 %v1897_v32, %s3685_s7  ;;  %v4969_v32 = vstv %s3360_s27  ;;  %v1212_v46 = vmul.f32 %v4730_v55, %v4964_v59  ;;  %s3381_s27 = sld [smem:[#allocation10 + $0x2b]] }
 0x276   : > { %v1384_v53 = vadd.f32 %v4874_v41, %v1302_v42  ;;  %v2085_v5 = vmul.f32 %v4806_v4, %v4969_v32  ;;  %v1938_v42 = vmul.f32 %v4833_v45, %v4891_v56  ;;  %v1214_v41 = vmul.f32 %v4791_v51, %v4964_v59 }
 0x277   : > { %v4957_v21 = vpop.permute.xlu0 %1631  ;;  %v4959_v62 = vpop.permute.xlu1 %1468 }
 0x278   : > { %7020 = vst [vmem:[#allocation157_spill] sm:$0xff] %v4957_v21  ;;  %7021 = vst [vmem:[#allocation158_spill] sm:$0xff] %v4959_v62 }
 0x279   : > { %2071 = vrot.lane.b32.xlu0 %v2063_v39, %s3688_s24  ;;  %1947 = vrot.lane.b32.xlu1 %v1934_v2, %s3686_s25  ;;  %v4981_v39 = vstv %s3361_s28  ;;  %v1261_v2 = vadd.f32 %v4769_v18, %v1212_v46  ;;  %s5257_s28 = sld [smem:[#allocation10 + $0x5c]] }
 0x27a   : > { %v2109_v45 = vmul.f32 %v4981_v39, %v4891_v56 }
 0x27b   : > { %v4971_v14 = vpop.permute.xlu0 %1655  ;;  %v4973_v21 = vpop.permute.xlu1 %1489  ;;  %v1343_v58 = vadd.f32 %v4841_v34, %v1261_v2  ;;  %v1222_v2 = vmul.f32 %v4806_v4, %v4943_v9 }
 0x27c   : > { %7023 = vst [vmem:[#allocation160_spill] sm:$0xff] %v4971_v14  ;;  %7024 = vst [vmem:[#allocation161_spill] sm:$0xff] %v4973_v21  ;;  %v1430_v14 = vadd.f32 %v4802_v52, %v1384_v53 }
 0x27d   : > { %2092 = vrot.lane.b32.xlu0 %v2085_v5, %s3688_s24  ;;  %1951 = vrot.lane.b32.xlu1 %v1936_v22, %s3686_s25  ;;  %v2107_v5 = vmul.f32 %v4730_v55, %v4981_v39  ;;  %v1263_v22 = vadd.f32 %v4779_v54, %v1214_v41  ;;  %v1407_v53 = vadd.f32 %v4895_v44, %v1343_v58 }
 0x27e   : > { %v1476_v52 = vadd.f32 %v4839_v25, %v1430_v14  ;;  %v1975_v41 = vmul.f32 %v4919_v17, %v4866_v50  ;;  %v1304_v14 = vadd.f32 %v4817_v27, %v1222_v2 }
 0x27f   : > { %v4991_v23 = vpop.permute.xlu0 %1659  ;;  %v4993_v43 = vpop.permute.xlu1 %1510  ;;  %v1345_v46 = vadd.f32 %v4850_v30, %v1263_v22 }
 0x280   : > { %7025 = vst [vmem:[#allocation162_spill] sm:$0xff] %v4991_v23  ;;  %7026 = vst [vmem:[#allocation163_spill] sm:$0xff] %v4993_v43  ;;  %v1522_v22 = vadd.f32 %v4872_v6, %v1476_v52  ;;  %v1979_v52 = vmul.f32 %v4866_v50, %v4927_v40 }
 0x281   : > { %2113 = vrot.lane.b32.xlu0 %v2107_v5, %s3689_s18  ;;  %1955 = vrot.lane.b32.xlu1 %v1938_v42, %s3686_s25  ;;  %v1453_v42 = vadd.f32 %v4931_v33, %v1407_v53  ;;  %v5017_v5 = vstv %s3362_s19  ;;  %v1409_v58 = vadd.f32 %v4787_v37, %v1345_v46  ;;  %v5034_v33 = vstv %s3363_s16  ;;  %s3383_s19 = sld [smem:[#allocation10 + $0x2c]]  ;;  %s3384_s16 = sld [smem:[#allocation10 + $0x5d]] }
 0x282   : > { %v2131_v53 = vmul.f32 %v4806_v4, %v5017_v5  ;;  %v1568_v2 = vadd.f32 %v4905_v12, %v1522_v22  ;;  %v2084_v12 = vmul.f32 %v4919_v17, %v4969_v32 }
 0x283   : > { %v5006_v18 = vpop.permute.xlu0 %1683  ;;  %v5008_v23 = vpop.permute.xlu1 %1514  ;;  %v1499_v25 = vadd.f32 %v4973_v21, %v1453_v42  ;;  %v1455_v42 = vadd.f32 %v4826_v19, %v1409_v58 }
 0x284   : > { %7027 = vst [vmem:[#allocation164_spill] sm:$0xff] %v5006_v18  ;;  %7028 = vst [vmem:[#allocation165_spill] sm:$0xff] %v5008_v23 }
 0x285   : > { %2117 = vrot.lane.b32.xlu0 %v2109_v45, %s3689_s18  ;;  %1988 = vrot.lane.b32.xlu1 %v1975_v41, %s3686_s25  ;;  %v1977_v45 = vmul.f32 %v4806_v4, %v4866_v50  ;;  %v1386_v41 = vadd.f32 %v4883_v49, %v1304_v14  ;;  %v2155_v50 = vmul.f32 %v5034_v33, %v4891_v56  ;;  %v5127_v49 = vstv %s3338_s4  ;;  %s3385_s4 = sld [smem:[#allocation10 + $0x2d]] }
 0x286   : > { %v1501_v58 = vadd.f32 %v4859_v13, %v1455_v42  ;;  %v5069_v42 = vstv %s3364_s23  ;;  %7046 = vst [vmem:[#allocation183_spill] sm:$0xff] %v5127_v49  ;;  %s3371_s23 = sld [smem:[#allocation10 + $0x26]] }
 0x287   : > { %v5023_v44 = vpop.permute.xlu0 %1687  ;;  %v5025_v34 = vpop.permute.xlu1 %1535  ;;  %v1432_v6 = vadd.f32 %v4917_v8, %v1386_v41 }
 0x288   : > { %7029 = vst [vmem:[#allocation166_spill] sm:$0xff] %v5023_v44  ;;  %7030 = vst [vmem:[#allocation167_spill] sm:$0xff] %v5025_v34  ;;  %v1545_v46 = vadd.f32 %v5025_v34, %v1499_v25  ;;  %v2153_v25 = vmul.f32 %v4730_v55, %v5034_v33  ;;  %v5113_v34 = vstv %s3368_s6  ;;  %s3374_s6 = sld [smem:[#allocation10 + $0x58]] }
 0x289   : > { %2138 = vrot.lane.b32.xlu0 %v2131_v53, %s3689_s18  ;;  %1992 = vrot.lane.b32.xlu1 %v1977_v45, %s3686_s25  ;;  %v1478_v53 = vadd.f32 %v4959_v62, %v1432_v6  ;;  %v1547_v6 = vadd.f32 %v4893_v20, %v1501_v58  ;;  %v5079_v58 = vstv %s3367_s29  ;;  %v5099_v20 = vstv %s3337_s30  ;;  %s3372_s29 = sld [smem:[#allocation10 + $0x57]] }
 0x28a   : > { %v5042_v21 = vadd.f32 %v1568_v2, %v1545_v46  ;;  %v2016_v46 = vmul.f32 %v4791_v51, %v4899_v48  ;;  %v2038_v48 = vmul.f32 %v4919_v17, %v4925_v35  ;;  %7041 = vst [vmem:[#allocation178_spill] sm:$0xff] %v5099_v20  ;;  %s3373_s30 = sld [smem:[#allocation10 + $0x27]] }
 0x28b   : > { %v5044_v14 = vpop.permute.xlu0 %1707  ;;  %v5046_v22 = vpop.permute.xlu1 %1556  ;;  %v1524_v45 = vadd.f32 %v5008_v23, %v1478_v53  ;;  %v2177_v23 = vmul.f32 %v4806_v4, %v5069_v42 }
 0x28c   : > { %7031 = vst [vmem:[#allocation168_spill] sm:$0xff] %v5044_v14  ;;  %7032 = vst [vmem:[#allocation169_spill] sm:$0xff] %v5046_v22 }
 0x28d   : > { %2159 = vrot.lane.b32.xlu0 %v2153_v25, %s3690_s22  ;;  %1996 = vrot.lane.b32.xlu1 %v1979_v52, %s3686_s25 }
 0x28f   : > { %v5057_v41 = vpop.permute.xlu0 %1723  ;;  %v5059_v2 = vpop.permute.xlu1 %1560 }
 0x290   : > { %7033 = vst [vmem:[#allocation170_spill] sm:$0xff] %v5057_v41  ;;  %7034 = vst [vmem:[#allocation171_spill] sm:$0xff] %v5059_v2  ;;  %v1570_v25 = vadd.f32 %v5059_v2, %v1524_v45  ;;  %v2040_v45 = vmul.f32 %v4925_v35, %v4927_v40  ;;  %v2225_v35 = vmul.f32 %v5079_v58, %v4775_v38 }
 0x291   : > { %2163 = vrot.lane.b32.xlu0 %v2155_v50, %s3690_s22  ;;  %2023 = vrot.lane.b32.xlu1 %v2016_v46, %s3687_s17  ;;  %v2221_v50 = vmul.f32 %v4485_v3, %v5079_v58 }
 0x292   : > { %v5067_v52 = vadd.f32 %v1570_v25, %v1547_v6 }
 0x293   : > { %v5071_v53 = vpop.permute.xlu0 %1739  ;;  %v5073_v13 = vpop.permute.xlu1 %1601 }
 0x294   : > { %7035 = vst [vmem:[#allocation172_spill] sm:$0xff] %v5071_v53  ;;  %7036 = vst [vmem:[#allocation173_spill] sm:$0xff] %v5073_v13 }
 0x295   : > { %2184 = vrot.lane.b32.xlu0 %v2177_v23, %s3690_s22  ;;  %2044 = vrot.lane.b32.xlu1 %v2038_v48, %s3687_s17  ;;  %v2062_v48 = vmul.f32 %v4791_v51, %v4937_v28  ;;  %v1580_v28 = vmul.f32 %v4730_v55, %v5099_v20 }
 0x297   : > { %v5087_v46 = vpop.permute.xlu0 %1755  ;;  %v5089_v6 = vpop.permute.xlu1 %1605  ;;  %v1614_v62 = vadd.f32 %v5073_v13, %v1580_v28  ;;  %v1586_v28 = vmul.f32 %v4919_v17, %v5127_v49 }
 0x298   : > { %7037 = vst [vmem:[#allocation174_spill] sm:$0xff] %v5087_v46  ;;  %7038 = vst [vmem:[#allocation175_spill] sm:$0xff] %v5089_v6 }
 0x299   : > { %2233 = vrot.lane.b32.xlu0 %v2221_v50, %s3685_s7  ;;  %2048 = vrot.lane.b32.xlu1 %v2040_v45, %s3687_s17 }
 0x29b   : > { %v5093_v25 = vpop.permute.xlu0 %1771  ;;  %v5095_v23 = vpop.permute.xlu1 %1629 }
 0x29c   : > { %7039 = vst [vmem:[#allocation176_spill] sm:$0xff] %v5093_v25  ;;  %7040 = vst [vmem:[#allocation177_spill] sm:$0xff] %v5095_v23 }
 0x29d   : > { %2237 = vrot.lane.b32.xlu0 %v2221_v50, %s3685_s7  ;;  %2069 = vrot.lane.b32.xlu1 %v2062_v48, %s3688_s24  ;;  %v2262_v50 = vmul.f32 %v4485_v3, %v5113_v34  ;;  %v2086_v48 = vmul.f32 %v4969_v32, %v4927_v40  ;;  %v2108_v32 = vmul.f32 %v4791_v51, %v4981_v39 }
 0x29e   : > { %v2130_v39 = vmul.f32 %v4919_v17, %v5017_v5 }
 0x29f   : > { %v5105_v2 = vpop.permute.xlu0 %1787  ;;  %v5107_v45 = vpop.permute.xlu1 %1633 }
 0x2a0   : > { %7042 = vst [vmem:[#allocation179_spill] sm:$0xff] %v5105_v2  ;;  %7043 = vst [vmem:[#allocation180_spill] sm:$0xff] %v5107_v45 }
 0x2a1   : > { %2241 = vrot.lane.b32.xlu0 %v2225_v35, %s3685_s7  ;;  %2090 = vrot.lane.b32.xlu1 %v2084_v12, %s3688_s24 }
 0x2a3   : > { %v5122_v19 = vpop.permute.xlu0 %1803  ;;  %v5124_v8 = vpop.permute.xlu1 %1657 }
 0x2a4   : > { %7044 = vst [vmem:[#allocation181_spill] sm:$0xff] %v5122_v19  ;;  %7045 = vst [vmem:[#allocation182_spill] sm:$0xff] %v5124_v8  ;;  %v1670_v37 = vadd.f32 %v5124_v8, %v1614_v62  ;;  %v2266_v62 = vmul.f32 %v5113_v34, %v4813_v61 }
 0x2a5   : > { %2274 = vrot.lane.b32.xlu0 %v2262_v50, %s3685_s7  ;;  %2094 = vrot.lane.b32.xlu1 %v2086_v48, %s3688_s24  ;;  %v1642_v48 = vadd.f32 %v5095_v23, %v1586_v28 }
 0x2a6   : > { %v1714_v27 = vadd.f32 %v5044_v14, %v1670_v37  ;;  %v5153_v14 = vstv %s3369_s8  ;;  %s3386_s8 = sld [smem:[#allocation10 + $0x5e]] }
 0x2a7   : > { %v5131_v12 = vpop.permute.xlu0 %1819  ;;  %v5133_v35 = vpop.permute.xlu1 %1661 }
 0x2a8   : > { %7047 = vst [vmem:[#allocation184_spill] sm:$0xff] %v5131_v12  ;;  %7048 = vst [vmem:[#allocation185_spill] sm:$0xff] %v5133_v35  ;;  %v1746_v44 = vadd.f32 %v5071_v53, %v1714_v27  ;;  %v2222_v53 = vmul.f32 %v4730_v55, %v5079_v58 }
 0x2a9   : > { %2278 = vrot.lane.b32.xlu0 %v2262_v50, %s3685_s7  ;;  %2115 = vrot.lane.b32.xlu1 %v2108_v32, %s3689_s18  ;;  %v2303_v50 = vmul.f32 %v4485_v3, %v5153_v14  ;;  %v2132_v32 = vmul.f32 %v5017_v5, %v4927_v40 }
 0x2aa   : > { %v1778_v27 = vadd.f32 %v5093_v25, %v1746_v44  ;;  %v5191_v25 = vstv %s3370_s15  ;;  %s3375_s15 = sld [smem:[#allocation10 + $0x28]] }
 0x2ab   : > { %v5145_v30 = vpop.permute.xlu0 %1863  ;;  %v5147_v54 = vpop.permute.xlu1 %1685 }
 0x2ac   : > { %7049 = vst [vmem:[#allocation186_spill] sm:$0xff] %v5145_v30  ;;  %7050 = vst [vmem:[#allocation187_spill] sm:$0xff] %v5147_v54  ;;  %v1698_v37 = vadd.f32 %v5147_v54, %v1642_v48 }
 0x2ad   : > { %2282 = vrot.lane.b32.xlu0 %v2266_v62, %s3685_s7  ;;  %2136 = vrot.lane.b32.xlu1 %v2130_v39, %s3689_s18 }
 0x2ae   : > { %v1730_v28 = vadd.f32 %v5057_v41, %v1698_v37  ;;  %v2154_v37 = vmul.f32 %v4791_v51, %v5034_v33  ;;  %v2176_v33 = vmul.f32 %v4919_v17, %v5069_v42 }
 0x2af   : > { %v5162_v30 = vpop.permute.xlu0 %1867  ;;  %v5164_v8 = vpop.permute.xlu1 %1689 }
 0x2b0   : > { %7051 = vst [vmem:[#allocation188_spill] sm:$0xff] %v5162_v30  ;;  %7052 = vst [vmem:[#allocation189_spill] sm:$0xff] %v5164_v8  ;;  %v1762_v48 = vadd.f32 %v5087_v46, %v1730_v28  ;;  %v1810_v30 = vadd.f32 %v5122_v19, %v1778_v27  ;;  %v3529_v27 = vld [vmem:[#allocation4 + $0x8] sm:$0xff] }
 0x2b1   : > { %2315 = vrot.lane.b32.xlu0 %v2303_v50, %s3686_s25  ;;  %2140 = vrot.lane.b32.xlu1 %v2132_v32, %s3689_s18  ;;  %v2307_v32 = vmul.f32 %v5153_v14, %v4775_v38 }
 0x2b2   : > { %v1794_v62 = vadd.f32 %v5105_v2, %v1762_v48 }
 0x2b3   : > { %v5171_v39 = vpop.permute.xlu0 %1871  ;;  %v5173_v5 = vpop.permute.xlu1 %1709 }
 0x2b4   : > { %7053 = vst [vmem:[#allocation190_spill] sm:$0xff] %v5171_v39  ;;  %7054 = vst [vmem:[#allocation191_spill] sm:$0xff] %v5173_v5  ;;  %v1826_v44 = vadd.f32 %v5131_v12, %v1794_v62  ;;  %v468_v62 = vmul.f32 %v3529_v27, %v4336_v1  ;;  %v1210_v12 = vmul.f32 %v3529_v27, %v4964_v59 }
 0x2b5   : > { %2319 = vrot.lane.b32.xlu0 %v2303_v50, %s3686_s25  ;;  %2161 = vrot.lane.b32.xlu1 %v2154_v37, %s3690_s22  ;;  %v2344_v50 = vmul.f32 %v4485_v3, %v5191_v25  ;;  %v476_v37 = vmul.f32 %v4571_v11, %v4321_v15 }
 0x2b6   : > { %v5183_v28 = vadd.f32 %v1826_v44, %v1810_v30  ;;  %v2178_v30 = vmul.f32 %v5069_v42, %v4927_v40  ;;  %v848_v42 = vmul.f32 %v4571_v11, %v4597_v16  ;;  %v1259_v18 = vadd.f32 %v4744_v57, %v1210_v12 }
 0x2b7   : > { %v5185_v48 = vpop.permute.xlu0 %1904  ;;  %v5187_v39 = vpop.permute.xlu1 %1725  ;;  %v559_v19 = vadd.f32 %v4111_v63, %v476_v37 }
 0x2b8   : > { %7055 = vst [vmem:[#allocation192_spill] sm:$0xff] %v5185_v48  ;;  %7056 = vst [vmem:[#allocation193_spill] sm:$0xff] %v5187_v39 }
 0x2b9   : > { %2323 = vrot.lane.b32.xlu0 %v2307_v32, %s3686_s25  ;;  %2182 = vrot.lane.b32.xlu1 %v2176_v33, %s3690_s22  ;;  %v840_v32 = vmul.f32 %v3529_v27, %v4625_v29  ;;  %v518_v33 = vadd.f32 %v4099_v60, %v468_v62  ;;  %v2348_v62 = vmul.f32 %v5191_v25, %v4813_v61 }
 0x2ba   : > { %v930_v27 = vadd.f32 %v4233_v7, %v848_v42 }
 0x2bb   : > { %v5202_v44 = vpop.permute.xlu0 %1908  ;;  %v5204_v48 = vpop.permute.xlu1 %1741  ;;  %v889_v46 = vadd.f32 %v4215_v26, %v840_v32  ;;  %v601_v41 = vadd.f32 %v4123_v31, %v518_v33  ;;  %v642_v32 = vadd.f32 %v4141_v10, %v559_v19  ;;  %v1588_v33 = vmul.f32 %v4806_v4, %v5127_v49 }
 0x2bc   : > { %7057 = vst [vmem:[#allocation194_spill] sm:$0xff] %v5202_v44  ;;  %7058 = vst [vmem:[#allocation195_spill] sm:$0xff] %v5204_v48  ;;  %v1012_v54 = vadd.f32 %v4525_v24, %v930_v27  ;;  %v1341_v19 = vadd.f32 %v4828_v36, %v1259_v18  ;;  %v2226_v27 = vmul.f32 %v5079_v58, %v4891_v56  ;;  %v7065_v18 = vld [vmem:[#allocation29_spill] sm:$0xff]  ;;  %v7066_v36 = vld [vmem:[#allocation27_spill] sm:$0xff] }
 0x2bd   : > { %2356 = vrot.lane.b32.xlu0 %v2344_v50, %s3686_s25  ;;  %2186 = vrot.lane.b32.xlu1 %v2178_v30, %s3690_s22  ;;  %v1218_v30 = vmul.f32 %v4571_v11, %v4943_v9  ;;  %v971_v37 = vadd.f32 %v4491_v47, %v889_v46  ;;  %v1582_v46 = vmul.f32 %v4791_v51, %v5099_v20  ;;  %v7067_v20 = vld [vmem:[#allocation141_spill] sm:$0xff] }
 0x2be   : > { %v1644_v13 = vadd.f32 %v5107_v45, %v1588_v33 }
 0x2bf   : > { %v5214_v2 = vpop.permute.xlu0 %1912  ;;  %v5216_v44 = vpop.permute.xlu1 %1757  ;;  %v1300_v42 = vadd.f32 %v4789_v0, %v1218_v30  ;;  %v7064_v0 = vld [vmem:[#allocation96_spill] sm:$0xff]  ;;  %v1616_v24 = vadd.f32 %v5089_v6, %v1582_v46  ;;  %v7072_v6 = vld [vmem:[#allocation149_spill] sm:$0xff] }
 0x2c0   : > { %7059 = vst [vmem:[#allocation196_spill] sm:$0xff] %v5214_v2  ;;  %7060 = vst [vmem:[#allocation197_spill] sm:$0xff] %v5216_v44  ;;  %v5229_v2 = vstv %s3381_s27  ;;  %v1058_v57 = vadd.f32 %v7064_v0, %v1012_v54  ;;  %v1700_v46 = vadd.f32 %v5164_v8, %v1644_v13  ;;  %v7071_v0 = vld [vmem:[#allocation126_spill] sm:$0xff]  ;;  %v7077_v8 = vld [vmem:[#allocation156_spill] sm:$0xff]  ;;  %s3351_s27 = sld [smem:[#allocation10 + $0x1c]] }
 0x2c1   : > { %2360 = vrot.lane.b32.xlu0 %v2344_v50, %s3686_s25  ;;  %2235 = vrot.lane.b32.xlu1 %v2222_v53, %s3685_s7  ;;  %v2224_v53 = vmul.f32 %v4791_v51, %v5079_v58  ;;  %v2591_v12 = vmul.f32 %v4485_v3, %v5229_v2  ;;  %v1382_v23 = vadd.f32 %v7067_v20, %v1300_v42  ;;  %v7070_v58 = vld [vmem:[#allocation103_spill] sm:$0xff]  ;;  %v7074_v42 = vld [vmem:[#allocation110_spill] sm:$0xff] }
 0x2c2   : > { %v1672_v54 = vadd.f32 %v5133_v35, %v1616_v24  ;;  %v1405_v33 = vadd.f32 %v7071_v0, %v1341_v19  ;;  %v7076_v35 = vld [vmem:[#allocation28_spill] sm:$0xff] }
 0x2c3   : > { %v5234_v11 = vpop.permute.xlu0 %1945  ;;  %v5236_v50 = vpop.permute.xlu1 %1773  ;;  %v1428_v45 = vadd.f32 %v7072_v6, %v1382_v23  ;;  %v7082_v0 = vld [vmem:[#allocation132_spill] sm:$0xff] }
 0x2c4   : > { %7061 = vst [vmem:[#allocation198_spill] sm:$0xff] %v5234_v11  ;;  %7062 = vst [vmem:[#allocation199_spill] sm:$0xff] %v5236_v50  ;;  %v7063_v11 = vld [vmem:[#allocation73_spill] sm:$0xff]  ;;  %v1716_v20 = vadd.f32 %v5173_v5, %v1672_v54 }
 0x2c5   : > { %2364 = vrot.lane.b32.xlu0 %v2348_v62, %s3686_s25  ;;  %2239 = vrot.lane.b32.xlu1 %v2224_v53, %s3685_s7  ;;  %v1035_v30 = vadd.f32 %v7063_v11, %v971_v37  ;;  %v688_v62 = vadd.f32 %v7065_v18, %v642_v32  ;;  %v665_v53 = vadd.f32 %v7066_v36, %v601_v41  ;;  %v7073_v41 = vld [vmem:[#allocation79_spill] sm:$0xff] }
 0x2c6   : > { %v1104_v37 = vadd.f32 %v7070_v58, %v1058_v57  ;;  %v1732_v57 = vadd.f32 %v5187_v39, %v1700_v46  ;;  %v7075_v58 = vld [vmem:[#allocation31_spill] sm:$0xff]  ;;  %v1474_v19 = vadd.f32 %v7077_v8, %v1428_v45  ;;  %v1748_v46 = vadd.f32 %v5204_v48, %v1716_v20 }
 0x2c7   : > { %v5262_v3 = vpop.permute.xlu0 %1949  ;;  %v5264_v9 = vpop.permute.xlu1 %1789  ;;  %v1081_v32 = vadd.f32 %v7073_v41, %v1035_v30  ;;  %v734_v24 = vadd.f32 %v7075_v58, %v688_v62  ;;  %v711_v13 = vadd.f32 %v7076_v35, %v665_v53  ;;  %v7080_v30 = vld [vmem:[#allocation85_spill] sm:$0xff]  ;;  %v1451_v53 = vadd.f32 %v7082_v0, %v1405_v33  ;;  %v7083_v8 = vld [vmem:[#allocation91_spill] sm:$0xff]  ;;  %v7085_v33 = vld [vmem:[#allocation138_spill] sm:$0xff] }
 0x2c8   : > { %7068 = vst [vmem:[#allocation29_spill] sm:$0xff] %v5262_v3  ;;  %7069 = vst [vmem:[#allocation27_spill] sm:$0xff] %v5264_v9  ;;  %v1150_v3 = vadd.f32 %v7074_v42, %v1104_v37  ;;  %v7081_v42 = vld [vmem:[#allocation117_spill] sm:$0xff]  ;;  %v1764_v62 = vadd.f32 %v5216_v44, %v1732_v57  ;;  %v1520_v45 = vadd.f32 %v4993_v43, %v1474_v19  ;;  %v5300_v20 = vstv %s5257_s28  ;;  %v7084_v57 = vld [vmem:[#allocation34_spill] sm:$0xff]  ;;  %s3376_s28 = sld [smem:[#allocation10 + $0x59]] }
 0x2c9   : > { %2603 = vrot.lane.b32.xlu0 %v2591_v12, %s3685_s7  ;;  %2243 = vrot.lane.b32.xlu1 %v2226_v27, %s3685_s7  ;;  %v2263_v27 = vmul.f32 %v4919_v17, %v5113_v34  ;;  %v1127_v37 = vadd.f32 %v7080_v30, %v1081_v32  ;;  %v1780_v32 = vadd.f32 %v5236_v50, %v1748_v46  ;;  %v5492_v44 = vstv %s3385_s4  ;;  %s3390_s4 = sld [smem:[#allocation10 + $0x60]] }
 0x2ca   : > { %v1196_v54 = vadd.f32 %v7081_v42, %v1150_v3  ;;  %v1796_v3 = vadd.f32 %v5264_v9, %v1764_v62  ;;  %v780_v42 = vadd.f32 %v7084_v57, %v734_v24  ;;  %v1497_v0 = vadd.f32 %v7085_v33, %v1451_v53  ;;  %v7089_v9 = vld [vmem:[#allocation144_spill] sm:$0xff] }
 0x2cb   : > { %v5280_v23 = vpop.permute.xlu0 %1953  ;;  %v5282_v6 = vpop.permute.xlu1 %1805  ;;  %v1173_v5 = vadd.f32 %v7083_v8, %v1127_v37  ;;  %v1566_v19 = vadd.f32 %v5046_v22, %v1520_v45  ;;  %v2265_v43 = vmul.f32 %v4806_v4, %v5113_v34  ;;  %v7088_v37 = vld [vmem:[#allocation30_spill] sm:$0xff]  ;;  %v2977_v53 = vrot.slane %v5183_v28, 1  ;;  %v5318_v45 = vld [vmem:[#allocation4] sm:$0xff] }
 0x2cc   : > { %7078 = vst [vmem:[#allocation31_spill] sm:$0xff] %v5280_v23  ;;  %7079 = vst [vmem:[#allocation200_spill] sm:$0xff] %v5282_v6  ;;  %v2595_v23 = vmul.f32 %v5229_v2, %v4775_v38  ;;  %v757_v48 = vadd.f32 %v7088_v37, %v711_v13  ;;  %v1812_v62 = vadd.f32 %v5282_v6, %v1780_v32 }
 0x2cd   : > { %2607 = vrot.lane.b32.xlu0 %v2591_v12, %s3685_s7  ;;  %2276 = vrot.lane.b32.xlu1 %v2263_v27, %s3685_s7  ;;  %v1202_v46 = vadd.f32 %v1196_v54, %v1173_v5  ;;  %v1543_v24 = vadd.f32 %v7089_v9, %v1497_v0  ;;  %v2267_v5 = vmul.f32 %v5113_v34, %v4927_v40 }
 0x2cf   : > { %v5305_v12 = vpop.permute.xlu0 %1986  ;;  %v5307_v27 = vpop.permute.xlu1 %1821  ;;  %v1572_v54 = vadd.f32 %v1566_v19, %v1543_v24  ;;  %v2953_v0 = vrot.slane %v1202_v46, 1  ;;  %v7096_v24 = vld [vmem:[#allocation115_spill] sm:$0xff] }
 0x2d0   : > { %7086 = vst [vmem:[#allocation201_spill] sm:$0xff] %v5305_v12  ;;  %7087 = vst [vmem:[#allocation202_spill] sm:$0xff] %v5307_v27  ;;  %v1828_v50 = vadd.f32 %v5307_v27, %v1796_v3  ;;  %v2632_v12 = vmul.f32 %v5318_v45, %v5300_v20 }
 0x2d1   : > { %2611 = vrot.lane.b32.xlu0 %v2595_v23, %s3685_s7  ;;  %2280 = vrot.lane.b32.xlu1 %v2265_v43, %s3685_s7  ;;  %v7092_v23 = vld [vmem:[#allocation36_spill] sm:$0xff]  ;;  %v2989_v33 = vadd.f32 %v2977_v53, %v1572_v54 }
 0x2d2   : > { %v1832_v13 = vadd.f32 %v1828_v50, %v1812_v62  ;;  %v826_v9 = vadd.f32 %v7092_v23, %v780_v42  ;;  %v7093_v43 = vld [vmem:[#allocation32_spill] sm:$0xff]  ;;  %v2304_v42 = vmul.f32 %v4730_v55, %v5153_v14 }
 0x2d3   : > { %v5324_v32 = vpop.permute.xlu0 %1990  ;;  %v5326_v3 = vpop.permute.xlu1 %1865  ;;  %v803_v22 = vadd.f32 %v7093_v43, %v757_v48  ;;  %v7097_v48 = vrot.slane %v7096_v24, 1 }
 0x2d4   : > { %7090 = vst [vmem:[#allocation203_spill] sm:$0xff] %v5324_v32  ;;  %7091 = vst [vmem:[#allocation204_spill] sm:$0xff] %v5326_v3  ;;  %v2980_v28 = vrot.slane %v1832_v13, 1  ;;  %v3032_v32 = vrot.slane %v2989_v33, 2  ;;  %v7102_v33 = vld [vmem:[#allocation123_spill] sm:$0xff] }
 0x2d5   : > { %2644 = vrot.lane.b32.xlu0 %v2632_v12, %s3685_s7  ;;  %2284 = vrot.lane.b32.xlu1 %v2267_v5, %s3685_s7  ;;  %v2955_v13 = vsel %vm2949_vm5, %v2953_v0, %v7097_v48  ;;  %v832_v5 = vadd.f32 %v826_v9, %v803_v22  ;;  %v2306_v9 = vmul.f32 %v4791_v51, %v5153_v14 }
 0x2d6   : > { %v2981_v34 = vsel %vm2949_vm5, %v2977_v53, %v2980_v28  ;;  %v2993_v50 = vadd.f32 %v2980_v28, %v5067_v52  ;;  %v7098_v52 = vld [vmem:[#allocation122_spill] sm:$0xff] }
 0x2d7   : > { %v2991_v19 = vadd.f32 %v2981_v34, %v5042_v21  ;;  %v5335_v62 = vpop.permute.xlu0 %1994  ;;  %v5337_v46 = vpop.permute.xlu1 %1869  ;;  %v2636_v21 = vmul.f32 %v5300_v20, %v4813_v61  ;;  %v2967_v34 = vadd.f32 %v2955_v13, %v832_v5 }
 0x2d8   : > { %7094 = vst [vmem:[#allocation205_spill] sm:$0xff] %v5335_v62  ;;  %7095 = vst [vmem:[#allocation206_spill] sm:$0xff] %v5337_v46  ;;  %v3037_v54 = vrot.slane %v2993_v50, 2  ;;  %v5362_v50 = vstv %s3383_s19  ;;  %s3387_s19 = sld [smem:[#allocation10 + $0x2e]] }
 0x2d9   : > { %v3033_v53 = vrot.slane %v2991_v19, 2  ;;  %2648 = vrot.lane.b32.xlu0 %v2632_v12, %s3685_s7  ;;  %2317 = vrot.lane.b32.xlu1 %v2304_v42, %s3686_s25  ;;  %v2673_v19 = vmul.f32 %v5318_v45, %v5362_v50  ;;  %v2308_v42 = vmul.f32 %v5153_v14, %v4891_v56  ;;  %v2677_v14 = vmul.f32 %v5362_v50, %v4775_v38 }
 0x2da   : > { %v5349_v28 = vadd.f32 %v3037_v54, %v7098_v52  ;;  %v2676_v27 = vmul.f32 %v4791_v51, %v5362_v50 }
 0x2db   : > { %v3038_v24 = vsel %vm3028_vm6, %v3033_v53, %v3037_v54  ;;  %v5352_v62 = vpop.permute.xlu0 %2021  ;;  %v5354_v0 = vpop.permute.xlu1 %1873  ;;  %v3034_v22 = vsel %vm3028_vm6, %v3032_v32, %v3033_v53  ;;  %v2345_v53 = vmul.f32 %v4919_v17, %v5191_v25 }
 0x2dc   : > { %7099 = vst [vmem:[#allocation115_spill] sm:$0xff] %v5349_v28  ;;  %7100 = vst [vmem:[#allocation122_spill] sm:$0xff] %v5352_v62  ;;  %v5360_v12 = vadd.f32 %v3038_v24, %v7102_v33  ;;  %v5370_v48 = vadd.f32 %v3034_v22, %v2967_v34  ;;  %v2347_v34 = vmul.f32 %v4806_v4, %v5191_v25  ;;  %v5394_v24 = vstv %s3384_s16  ;;  %s3377_s16 = sld [smem:[#allocation10 + $0x29]] }
 0x2dd   : > { %7101 = vst [vmem:[#allocation207_spill] sm:$0xff] %v5354_v0  ;;  %2652 = vrot.lane.b32.xlu0 %v2636_v21, %s3685_s7  ;;  %2321 = vrot.lane.b32.xlu1 %v2306_v9, %s3686_s25  ;;  %v2714_v9 = vmul.f32 %v5318_v45, %v5394_v24  ;;  %v2349_v22 = vmul.f32 %v5191_v25, %v4927_v40  ;;  %v5424_v28 = vstv %s3371_s23  ;;  %s3378_s23 = sld [smem:[#allocation10 + $0x5a]] }
 0x2de   : > { %7103 = vst [vmem:[#allocation123_spill] sm:$0xff] %v5360_v12  ;;  %7104 = vst [vmem:[#allocation208_spill] sm:$0xff] %v5370_v48  ;;  %v2718_v25 = vmul.f32 %v5394_v24, %v4813_v61  ;;  %v2385_v12 = vmul.f32 %v4730_v55, %v5424_v28  ;;  %v2715_v39 = vmul.f32 %v4919_v17, %v5394_v24 }
 0x2df   : > { %v5372_v13 = vpop.permute.xlu0 %2025  ;;  %v5374_v32 = vpop.permute.xlu1 %1906  ;;  %v2717_v49 = vmul.f32 %v4806_v4, %v5394_v24  ;;  %v2719_v43 = vmul.f32 %v5394_v24, %v4927_v40 }
 0x2e0   : > { %7105 = vst [vmem:[#allocation209_spill] sm:$0xff] %v5372_v13  ;;  %7106 = vst [vmem:[#allocation210_spill] sm:$0xff] %v5374_v32  ;;  %v2635_v13 = vmul.f32 %v4806_v4, %v5300_v20 }
 0x2e1   : > { %2685 = vrot.lane.b32.xlu0 %v2673_v19, %s3686_s25  ;;  %2325 = vrot.lane.b32.xlu1 %v2308_v42, %s3686_s25 }
 0x2e3   : > { %v5378_v54 = vpop.permute.xlu0 %2046  ;;  %v5380_v5 = vpop.permute.xlu1 %1910 }
 0x2e4   : > { %7107 = vst [vmem:[#allocation211_spill] sm:$0xff] %v5378_v54  ;;  %7108 = vst [vmem:[#allocation212_spill] sm:$0xff] %v5380_v5 }
 0x2e5   : > { %2689 = vrot.lane.b32.xlu0 %v2673_v19, %s3686_s25  ;;  %2358 = vrot.lane.b32.xlu1 %v2345_v53, %s3686_s25  ;;  %v2592_v53 = vmul.f32 %v4730_v55, %v5229_v2 }
 0x2e7   : > { %v5388_v21 = vpop.permute.xlu0 %2067  ;;  %v5390_v52 = vpop.permute.xlu1 %1914 }
 0x2e8   : > { %7109 = vst [vmem:[#allocation213_spill] sm:$0xff] %v5388_v21  ;;  %7110 = vst [vmem:[#allocation214_spill] sm:$0xff] %v5390_v52 }
 0x2e9   : > { %2693 = vrot.lane.b32.xlu0 %v2677_v14, %s3686_s25  ;;  %2362 = vrot.lane.b32.xlu1 %v2347_v34, %s3686_s25 }
 0x2eb   : > { %v5402_v38 = vpop.permute.xlu0 %2071  ;;  %v5404_v33 = vpop.permute.xlu1 %1947 }
 0x2ec   : > { %7111 = vst [vmem:[#allocation215_spill] sm:$0xff] %v5402_v38  ;;  %7112 = vst [vmem:[#allocation216_spill] sm:$0xff] %v5404_v33 }
 0x2ed   : > { %2726 = vrot.lane.b32.xlu0 %v2714_v9, %s3686_s25  ;;  %2366 = vrot.lane.b32.xlu1 %v2349_v22, %s3686_s25  ;;  %v2594_v22 = vmul.f32 %v4791_v51, %v5229_v2 }
 0x2ef   : > { %v5408_v19 = vpop.permute.xlu0 %2092  ;;  %v5410_v42 = vpop.permute.xlu1 %1951 }
 0x2f0   : > { %7113 = vst [vmem:[#allocation217_spill] sm:$0xff] %v5408_v19  ;;  %7114 = vst [vmem:[#allocation218_spill] sm:$0xff] %v5410_v42 }
 0x2f1   : > { %2730 = vrot.lane.b32.xlu0 %v2714_v9, %s3686_s25  ;;  %2605 = vrot.lane.b32.xlu1 %v2592_v53, %s3685_s7  ;;  %v2596_v9 = vmul.f32 %v5229_v2, %v4891_v56  ;;  %v2633_v2 = vmul.f32 %v4919_v17, %v5300_v20 }
 0x2f3   : > { %v5418_v14 = vpop.permute.xlu0 %2113  ;;  %v5420_v34 = vpop.permute.xlu1 %1955 }
 0x2f4   : > { %7115 = vst [vmem:[#allocation219_spill] sm:$0xff] %v5418_v14  ;;  %7116 = vst [vmem:[#allocation220_spill] sm:$0xff] %v5420_v34  ;;  %v5458_v34 = vstv %s3373_s30  ;;  %s3389_s30 = sld [smem:[#allocation10 + $0x2f]] }
 0x2f5   : > { %2734 = vrot.lane.b32.xlu0 %v2718_v25, %s3686_s25  ;;  %2609 = vrot.lane.b32.xlu1 %v2594_v22, %s3685_s7  ;;  %v2387_v25 = vmul.f32 %v5424_v28, %v4891_v56 }
 0x2f7   : > { %v5430_v53 = vpop.permute.xlu0 %2117  ;;  %v5432_v61 = vpop.permute.xlu1 %1988 }
 0x2f8   : > { %7117 = vst [vmem:[#allocation221_spill] sm:$0xff] %v5430_v53  ;;  %7118 = vst [vmem:[#allocation222_spill] sm:$0xff] %v5432_v61  ;;  %v5448_v53 = vstv %s3372_s29  ;;  %s3366_s29 = sld [smem:[#allocation10 + $0x54]] }
 0x2f9   : > { %2391 = vrot.lane.b32.xlu0 %v2385_v12, %s3687_s17  ;;  %2613 = vrot.lane.b32.xlu1 %v2596_v9, %s3685_s7  ;;  %v2409_v9 = vmul.f32 %v4806_v4, %v5448_v53 }
 0x2fb   : > { %v5440_v22 = vpop.permute.xlu0 %2138  ;;  %v5442_v48 = vpop.permute.xlu1 %1992 }
 0x2fc   : > { %7119 = vst [vmem:[#allocation223_spill] sm:$0xff] %v5440_v22  ;;  %7120 = vst [vmem:[#allocation224_spill] sm:$0xff] %v5442_v48 }
 0x2fd   : > { %2395 = vrot.lane.b32.xlu0 %v2387_v25, %s3687_s17  ;;  %2646 = vrot.lane.b32.xlu1 %v2633_v2, %s3685_s7  ;;  %v2637_v25 = vmul.f32 %v5300_v20, %v4927_v40  ;;  %v2674_v20 = vmul.f32 %v4730_v55, %v5362_v50 }
 0x2ff   : > { %v5450_v38 = vpop.permute.xlu0 %2159  ;;  %v5452_v12 = vpop.permute.xlu1 %1996 }
 0x300   : > { %7121 = vst [vmem:[#allocation225_spill] sm:$0xff] %v5450_v38  ;;  %7122 = vst [vmem:[#allocation226_spill] sm:$0xff] %v5452_v12  ;;  %v2431_v12 = vmul.f32 %v4730_v55, %v5458_v34  ;;  %v2678_v55 = vmul.f32 %v5362_v50, %v4891_v56 }
 0x301   : > { %2416 = vrot.lane.b32.xlu0 %v2409_v9, %s3687_s17  ;;  %2650 = vrot.lane.b32.xlu1 %v2635_v13, %s3685_s7  ;;  %v2433_v9 = vmul.f32 %v5458_v34, %v4891_v56 }
 0x303   : > { %v5464_v2 = vpop.permute.xlu0 %2163  ;;  %v5466_v52 = vpop.permute.xlu1 %2023 }
 0x304   : > { %7123 = vst [vmem:[#allocation227_spill] sm:$0xff] %v5464_v2  ;;  %7124 = vst [vmem:[#allocation228_spill] sm:$0xff] %v5466_v52  ;;  %v5482_v2 = vstv %s3374_s6  ;;  %s3365_s6 = sld [smem:[#allocation10 + $0x23]] }
 0x305   : > { %2437 = vrot.lane.b32.xlu0 %v2431_v12, %s3688_s24  ;;  %2654 = vrot.lane.b32.xlu1 %v2637_v25, %s3685_s7  ;;  %v2455_v25 = vmul.f32 %v4806_v4, %v5482_v2  ;;  %s3352_s7 = sld [smem:[#allocation10 + $0x4d]] }
 0x307   : > { %v5474_v13 = vpop.permute.xlu0 %2184  ;;  %v5476_v0 = vpop.permute.xlu1 %2044 }
 0x308   : > { %7125 = vst [vmem:[#allocation229_spill] sm:$0xff] %v5474_v13  ;;  %7126 = vst [vmem:[#allocation230_spill] sm:$0xff] %v5476_v0 }
 0x309   : > { %2441 = vrot.lane.b32.xlu0 %v2433_v9, %s3688_s24  ;;  %2687 = vrot.lane.b32.xlu1 %v2674_v20, %s3686_s25 }
 0x30b   : > { %v5484_v6 = vpop.permute.xlu0 %2233  ;;  %v5486_v12 = vpop.permute.xlu1 %2048  ;;  %v5516_v8 = vstv %s3352_s7  ;;  %s3391_s7 = sld [smem:[#allocation10 + $0x30]] }
 0x30c   : > { %7127 = vst [vmem:[#allocation231_spill] sm:$0xff] %v5486_v12  ;;  %v5502_v12 = vld [vmem:[#allocation4 + $0x18] sm:$0xff]  ;;  %7130 = vst [vmem:[#allocation234_spill] sm:$0xff] %v5516_v8 }
 0x30d   : > { %2462 = vrot.lane.b32.xlu0 %v2455_v25, %s3688_s24  ;;  %2691 = vrot.lane.b32.xlu1 %v2676_v27, %s3686_s25  ;;  %v2755_v51 = vmul.f32 %v5502_v12, %v5492_v44  ;;  %v2757_v27 = vmul.f32 %v5492_v44, %v4891_v56 }
 0x30f   : > { %v5498_v9 = vpop.permute.xlu0 %2237  ;;  %v5500_v20 = vpop.permute.xlu1 %2069 }
 0x310   : > { %7128 = vst [vmem:[#allocation232_spill] sm:$0xff] %v5500_v20 }
 0x311   : > { %2761 = vrot.lane.b32.xlu0 %v2755_v51, %s3687_s17  ;;  %2695 = vrot.lane.b32.xlu1 %v2678_v55, %s3686_s25  ;;  %v1846_v51 = vmul.f32 %v4806_v4, %v5516_v8  ;;  %v5522_v55 = vstv %s3386_s8  ;;  %s3379_s8 = sld [smem:[#allocation10 + $0x2a]] }
 0x312   : > { %v2779_v11 = vmul.f32 %v4806_v4, %v5522_v55 }
 0x313   : > { %v5510_v50 = vpop.permute.xlu0 %2241  ;;  %v5512_v25 = vpop.permute.xlu1 %2090  ;;  %v1928_v59 = vadd.f32 %v5380_v5, %v1846_v51  ;;  %v5550_v5 = vld [vmem:[#allocation4 + $0x28] sm:$0xff] }
 0x314   : > { %7129 = vst [vmem:[#allocation233_spill] sm:$0xff] %v5512_v25 }
 0x315   : > { %2765 = vrot.lane.b32.xlu0 %v2757_v27, %s3687_s17  ;;  %2728 = vrot.lane.b32.xlu1 %v2715_v39, %s3686_s25  ;;  %v5533_v27 = vstv %s3375_s15  ;;  %v5535_v39 = vstv %s3351_s27 }
 0x316   : > { %7132 = vst [vmem:[#allocation236_spill] sm:$0xff] %v5535_v39  ;;  %v2477_v4 = vmul.f32 %v5502_v12, %v5533_v27  ;;  %v1836_v51 = vmul.f32 %v5502_v12, %v5535_v39 }
 0x317   : > { %v5524_v30 = vpop.permute.xlu0 %2274  ;;  %v5526_v41 = vpop.permute.xlu1 %2094 }
 0x318   : > { %7131 = vst [vmem:[#allocation235_spill] sm:$0xff] %v5526_v41  ;;  %v2010_v41 = vadd.f32 %v5442_v48, %v1928_v59  ;;  %v2479_v59 = vmul.f32 %v5533_v27, %v4891_v56 }
 0x319   : > { %2786 = vrot.lane.b32.xlu0 %v2779_v11, %s3687_s17  ;;  %2732 = vrot.lane.b32.xlu1 %v2717_v49, %s3686_s25  ;;  %v1838_v49 = vmul.f32 %v5550_v5, %v5535_v39  ;;  %v1885_v11 = vadd.f32 %v5326_v3, %v1836_v51  ;;  %v2386_v39 = vmul.f32 %v5550_v5, %v5424_v28 }
 0x31a   : > { %v2056_v48 = vadd.f32 %v5378_v54, %v2010_v41  ;;  %v5576_v54 = vstv %s3376_s28  ;;  %s3405_s28 = sshll.u32 %s3663_s12, 8  ;;  %s3175_s12 = scalar_lea.sflag [#allocation8], %s3844_s21 }
 0x31b   : > { %v5542_v47 = vpop.permute.xlu0 %2278  ;;  %v5544_v7 = vpop.permute.xlu1 %2115  ;;  %v1887_v24 = vadd.f32 %v5337_v46, %v1838_v49 }
 0x31c   : > { %7133 = vst [vmem:[#allocation237_spill] sm:$0xff] %v5544_v7  ;;  %v2102_v49 = vadd.f32 %v5408_v19, %v2056_v48 }
 0x31d   : > { %2483 = vrot.lane.b32.xlu0 %v2477_v4, %s3689_s18  ;;  %2736 = vrot.lane.b32.xlu1 %v2719_v43, %s3686_s25  ;;  %v1844_v4 = vmul.f32 %v4919_v17, %v5516_v8  ;;  %v1967_v43 = vadd.f32 %v5404_v33, %v1885_v11  ;;  %v1969_v23 = vadd.f32 %v5410_v42, %v1887_v24  ;;  %v5582_v8 = vld [vmem:[#allocation5 + $0x28] sm:$0xff]  ;;  %v5591_v24 = vstv %s3387_s19  ;;  %s3388_s25 = sld [smem:[#allocation10 + $0x5f]]  ;;  %v5764_v33 = vld [vmem:[#allocation4 + $0x30] sm:$0x7] }
 0x31e   : > { %v2501_v11 = vmul.f32 %v5582_v8, %v5576_v54 }
 0x31f   : > { %v5561_v16 = vpop.permute.xlu0 %2282  ;;  %v5563_v37 = vpop.permute.xlu1 %2136  ;;  %v1926_v41 = vadd.f32 %v5374_v32, %v1844_v4  ;;  %v2033_v51 = vadd.f32 %v5466_v52, %v1969_v23  ;;  %v2410_v4 = vmul.f32 %v5448_v53, %v4927_v40 }
 0x320   : > { %7134 = vst [vmem:[#allocation238_spill] sm:$0xff] %v5563_v37 }
 0x321   : > { %2487 = vrot.lane.b32.xlu0 %v2479_v59, %s3689_s18  ;;  %2393 = vrot.lane.b32.xlu1 %v2386_v39, %s3687_s17  ;;  %v2408_v39 = vmul.f32 %v4919_v17, %v5448_v53  ;;  %v2031_v59 = vadd.f32 %v5352_v62, %v1967_v43  ;;  %v2008_v23 = vadd.f32 %v5432_v61, %v1926_v41 }
 0x322   : > { %v2079_v48 = vadd.f32 %v5500_v20, %v2033_v51  ;;  %v2801_v51 = vmul.f32 %v5502_v12, %v5591_v24 }
 0x323   : > { %v5578_v28 = vpop.permute.xlu0 %2315  ;;  %v5580_v46 = vpop.permute.xlu1 %2140  ;;  %v2054_v52 = vadd.f32 %v5476_v0, %v2008_v23  ;;  %v2803_v23 = vmul.f32 %v5591_v24, %v4891_v56 }
 0x324   : > { %7135 = vst [vmem:[#allocation239_spill] sm:$0xff] %v5580_v46  ;;  %v2148_v46 = vadd.f32 %v5440_v22, %v2102_v49  ;;  %v2125_v19 = vadd.f32 %v5544_v7, %v2079_v48 }
 0x325   : > { %2508 = vrot.lane.b32.xlu0 %v2501_v11, %s3689_s18  ;;  %2414 = vrot.lane.b32.xlu1 %v2408_v39, %s3687_s17  ;;  %v2077_v11 = vadd.f32 %v5388_v21, %v2031_v59  ;;  %v2100_v53 = vadd.f32 %v5512_v25, %v2054_v52  ;;  %v2432_v52 = vmul.f32 %v5550_v5, %v5458_v34 }
 0x326   : > { %v2194_v39 = vadd.f32 %v5474_v13, %v2148_v46  ;;  %v2454_v34 = vmul.f32 %v4919_v17, %v5482_v2  ;;  %v5654_v17 = vld [vmem:[#allocation4 + $0x38] sm:$0x7] }
 0x327   : > { %v5600_v43 = vpop.permute.xlu0 %2319  ;;  %v5602_v41 = vpop.permute.xlu1 %2161  ;;  %v2123_v48 = vadd.f32 %v5418_v14, %v2077_v11  ;;  %v2146_v7 = vadd.f32 %v5563_v37, %v2100_v53  ;;  %v5674_v13 = vld [vmem:[#allocation5 + $0x18] sm:$0xff] }
 0x328   : > { %7136 = vst [vmem:[#allocation240_spill] sm:$0xff] %v5602_v41  ;;  %v2171_v49 = vadd.f32 %v5602_v41, %v2125_v19  ;;  %v5689_v41 = vld [vmem:[#allocation5 + $0x38] sm:$0x7] }
 0x329   : > { %2807 = vrot.lane.b32.xlu0 %v2801_v51, %s3688_s24  ;;  %2418 = vrot.lane.b32.xlu1 %v2410_v4, %s3687_s17  ;;  %v2169_v19 = vadd.f32 %v5450_v38, %v2123_v48  ;;  %v5630_v51 = vstv %s3388_s25 }
 0x32a   : > { %v5616_v22 = vadd.f32 %v2194_v39, %v2171_v49  ;;  %v2825_v53 = vmul.f32 %v5582_v8, %v5630_v51  ;;  %v5640_v49 = vstv %s3377_s16  ;;  %s6610_s16 = scalar_lea.hbm %s6662_s2, %s3405_s28 }
 0x32b   : > { %v5618_v59 = vpop.permute.xlu0 %2323  ;;  %v5620_v46 = vpop.permute.xlu1 %2182 }
 0x32c   : > { %7137 = vst [vmem:[#allocation241_spill] sm:$0xff] %v5616_v22  ;;  %7138 = vst [vmem:[#allocation242_spill] sm:$0xff] %v5620_v46  ;;  %v2192_v4 = vadd.f32 %v5620_v46, %v2146_v7  ;;  %v2456_v7 = vmul.f32 %v5482_v2, %v4927_v40  ;;  %v2780_v22 = vmul.f32 %v5689_v41, %v5522_v55 }
 0x32d   : > { %2811 = vrot.lane.b32.xlu0 %v2803_v23, %s3688_s24  ;;  %2439 = vrot.lane.b32.xlu1 %v2432_v52, %s3688_s24  ;;  %v2523_v52 = vmul.f32 %v5502_v12, %v5640_v49 }
 0x32e   : > { %v5628_v56 = vadd.f32 %v2192_v4, %v2169_v19  ;;  %v2525_v19 = vmul.f32 %v5654_v17, %v5640_v49  ;;  %v2756_v4 = vmul.f32 %v5550_v5, %v5492_v44  ;;  %v5678_v44 = vstv %s3366_s29  ;;  %s3692_s29 = smov [#allocation11]  }
 0x32f   : > { %v5632_v11 = vpop.permute.xlu0 %2356  ;;  %v5634_v39 = vpop.permute.xlu1 %2186  ;;  %v2214_v46 = vmul.f32 %v5674_v13, %v5678_v44  ;;  %v2216_v37 = vmul.f32 %v5582_v8, %v5678_v44  ;;  %v2213_v35 = vmul.f32 %v5318_v45, %v5678_v44 }
 0x330   : > { %7139 = vst [vmem:[#allocation243_spill] sm:$0xff] %v5628_v56  ;;  %7140 = vst [vmem:[#allocation244_spill] sm:$0xff] %v5634_v39  ;;  %v2778_v39 = vmul.f32 %v5674_v13, %v5522_v55 }
 0x331   : > { %2832 = vrot.lane.b32.xlu0 %v2825_v53, %s3688_s24  ;;  %2460 = vrot.lane.b32.xlu1 %v2454_v34, %s3688_s24  ;;  %v5666_v53 = vstv %s3378_s23 }
 0x333   : > { %v5646_v23 = vpop.permute.xlu0 %2360  ;;  %v5648_v48 = vpop.permute.xlu1 %2235 }
 0x335   : > { %2529 = vrot.lane.b32.xlu0 %v2523_v52, %s3690_s22  ;;  %2464 = vrot.lane.b32.xlu1 %v2456_v7, %s3688_s24  ;;  %v2547_v52 = vmul.f32 %v5582_v8, %v5666_v53 }
 0x337   : > { %v5658_v40 = vpop.permute.xlu0 %2364  ;;  %v5660_v2 = vpop.permute.xlu1 %2239 }
 0x339   : > { %2533 = vrot.lane.b32.xlu0 %v2525_v19, %s3690_s22  ;;  %2763 = vrot.lane.b32.xlu1 %v2756_v4, %s3687_s17  ;;  %v5685_v4 = vstv %s3389_s30  ;;  %s3589_s30 = sshll.u32 %s3692_s29, 4  ;;  %s3590_s30 = int_to_ptr.vmem [resolvable:$false] %s3589_s30 }
 0x33a   : > { %v2847_v38 = vmul.f32 %v5502_v12, %v5685_v4  ;;  %v2849_v55 = vmul.f32 %v5654_v17, %v5685_v4 }
 0x33b   : > { %v5668_v34 = vpop.permute.xlu0 %2603  ;;  %v5670_v7 = vpop.permute.xlu1 %2243 }
 0x33c   : > { %v5683_v19 = vsel %vm507_vm7, %v5510_v50, %v5670_v7 }
 0x33d   : > { %2554 = vrot.lane.b32.xlu0 %v2547_v52, %s3690_s22  ;;  %2784 = vrot.lane.b32.xlu1 %v2778_v39, %s3687_s17 }
 0x33f   : > { %v5695_v20 = vpop.permute.xlu0 %2607  ;;  %v2277_v50 = vpop.permute.xlu1 %2276 }
 0x340   : > { %v5701_v52 = vsel %vm507_vm7, %v5524_v30, %v2277_v50  ;;  %v5703_v39 = vadd.f32 %v2277_v50, %v2214_v46  ;;  %v2478_v30 = vmul.f32 %v5550_v5, %v5533_v27 }
 0x341   : > { %2853 = vrot.lane.b32.xlu0 %v2847_v38, %s3689_s18  ;;  %2788 = vrot.lane.b32.xlu1 %v2780_v22, %s3687_s17  ;;  %v5719_v38 = vstv %s3365_s6  ;;  %v5723_v22 = vstv %s3390_s4  ;;  %s3392_s17 = sld [smem:[#allocation10 + $0x61]]  ;;  %s3591_s6 = scalar_lea.vmem %s3590_s30, 512 }
 0x342   : > { %v2871_v27 = vmul.f32 %v5582_v8, %v5723_v22  ;;  %v2210_v32 = vmul.f32 %v5654_v17, %v5719_v38 }
 0x343   : > { %v5711_v56 = vpop.permute.xlu0 %2611  ;;  %v2281_v25 = vpop.permute.xlu1 %2280 }
 0x344   : > { %v2287_v46 = vsel %vm507_vm7, %v5542_v47, %v2281_v25  ;;  %v5717_v50 = vadd.f32 %v2281_v25, %v2216_v37  ;;  %v2500_v47 = vmul.f32 %v5674_v13, %v5576_v54  ;;  %v2206_v37 = vmul.f32 %v5502_v12, %v5719_v38 }
 0x345   : > { %2857 = vrot.lane.b32.xlu0 %v2849_v55, %s3689_s18  ;;  %2485 = vrot.lane.b32.xlu1 %v2478_v30, %s3689_s18  ;;  %v5738_v55 = vstv %s3391_s7  ;;  %v2502_v30 = vmul.f32 %v5689_v41, %v5576_v54 }
 0x346   : > { %v2255_v21 = vadd.f32 %v5648_v48, %v2206_v37  ;;  %v2893_v62 = vmul.f32 %v5502_v12, %v5738_v55  ;;  %v2895_v54 = vmul.f32 %v5654_v17, %v5738_v55 }
 0x347   : > { %v5725_v14 = vpop.permute.xlu0 %2644  ;;  %v5727_v0 = vpop.permute.xlu1 %2284  ;;  %v5781_v26 = vstv %s3392_s17 }
 0x348   : > { %v2288_v25 = vsel %vm507_vm7, %v5561_v16, %v5727_v0  ;;  %v2208_v16 = vmul.f32 %v5550_v5, %v5719_v38 }
 0x349   : > { %2878 = vrot.lane.b32.xlu0 %v2871_v27, %s3689_s18  ;;  %2506 = vrot.lane.b32.xlu1 %v2500_v47, %s3689_s18 }
 0x34a   : > { %v2257_v37 = vadd.f32 %v5660_v2, %v2208_v16  ;;  %v2259_v16 = vadd.f32 %v5670_v7, %v2210_v32 }
 0x34b   : > { %v5745_v61 = vpop.permute.xlu0 %2648  ;;  %v2318_v42 = vpop.permute.xlu1 %2317 }
 0x34c   : > { %v5753_v27 = vsel %vm590_vm8, %v5578_v28, %v2318_v42  ;;  %v5755_v47 = vadd.f32 %v2318_v42, %v2255_v21  ;;  %v2209_v28 = vmul.f32 %v5764_v33, %v5719_v38 }
 0x34d   : > { %2899 = vrot.lane.b32.xlu0 %v2893_v62, %s3690_s22  ;;  %2510 = vrot.lane.b32.xlu1 %v2502_v30, %s3689_s18  ;;  %v2802_v62 = vmul.f32 %v5550_v5, %v5591_v24 }
 0x34e   : > { %v2258_v29 = vadd.f32 %v5683_v19, %v2209_v28  ;;  %v2826_v19 = vmul.f32 %v5689_v41, %v5630_v51  ;;  %v2295_v28 = vadd.f32 %v5701_v52, %v2213_v35 }
 0x34f   : > { %v5768_v3 = vpop.permute.xlu0 %2652  ;;  %v2322_v21 = vpop.permute.xlu1 %2321 }
 0x350   : > { %v5774_v42 = vsel %vm590_vm8, %v5600_v43, %v2322_v21  ;;  %v5776_v30 = vadd.f32 %v2322_v21, %v2257_v37  ;;  %v2917_v43 = vmul.f32 %v5582_v8, %v5781_v26 }
 0x351   : > { %2903 = vrot.lane.b32.xlu0 %v2895_v54, %s3690_s22  ;;  %2809 = vrot.lane.b32.xlu1 %v2802_v62, %s3688_s24  ;;  %v2824_v54 = vmul.f32 %v5674_v13, %v5630_v51  ;;  %v2297_v51 = vadd.f32 %v2287_v46, %v2213_v35 }
 0x353   : > { %v5786_v24 = vpop.permute.xlu0 %2685  ;;  %v2326_v57 = vpop.permute.xlu1 %2325 }
 0x354   : > { %v2329_v37 = vsel %vm590_vm8, %v5618_v59, %v2326_v57  ;;  %v5794_v32 = vadd.f32 %v2326_v57, %v2259_v16  ;;  %v2218_v16 = vmul.f32 %v5689_v41, %v5678_v44 }
 0x355   : > { %v5796_v7 = vadd.f32 %v2329_v37, %v2258_v29  ;;  %2924 = vrot.lane.b32.xlu0 %v2917_v43, %s3690_s22  ;;  %2830 = vrot.lane.b32.xlu1 %v2824_v54, %s3688_s24  ;;  %v5815_v43 = vld [vmem:[#allocation5 + $0x30] sm:$0x7] }
 0x356   : > { %v2217_v52 = vmul.f32 %v5815_v43, %v5678_v44  ;;  %v2300_v35 = vadd.f32 %v5727_v0, %v2218_v16  ;;  %v2548_v0 = vmul.f32 %v5689_v41, %v5666_v53 }
 0x357   : > { %v5803_v21 = vpop.permute.xlu0 %2689  ;;  %v2359_v62 = vpop.permute.xlu1 %2358 }
 0x358   : > { %v2368_v59 = vsel %vm590_vm8, %v5632_v11, %v2359_v62  ;;  %v5808_v57 = vadd.f32 %v2359_v62, %v5703_v39  ;;  %v2524_v11 = vmul.f32 %v5550_v5, %v5640_v49  ;;  %v2299_v46 = vadd.f32 %v2288_v25, %v2217_v52 }
 0x359   : > { %v5810_v29 = vadd.f32 %v2368_v59, %v2295_v28  ;;  %2834 = vrot.lane.b32.xlu1 %v2826_v19, %s3688_s24  ;;  %v2546_v59 = vmul.f32 %v5674_v13, %v5666_v53  ;;  %s3380_s24 = sld [smem:[#allocation10 + $0x5b]]  ;;  %v5849_v52 = vmul.f32 %v5318_v45, %v5719_v38  ;;  %v2848_v38 = vmul.f32 %v5550_v5, %v5685_v4 }
 0x35a   : > { %7141 = vst [vmem:[#allocation245_spill] sm:$0xff] %v5808_v57  ;;  %v5832_v57 = vstv %s3379_s8 }
 0x35b   : > { %v5819_v54 = vpop.permute.xlu0 %2693  ;;  %v2363_v37 = vpop.permute.xlu1 %2362  ;;  %v2576_v25 = vmul.f32 %v5502_v12, %v5832_v57  ;;  %v2578_v12 = vmul.f32 %v5550_v5, %v5832_v57 }
 0x35c   : > { %v2369_v39 = vsel %vm590_vm8, %v5646_v23, %v2363_v37  ;;  %v2380_v19 = vadd.f32 %v2363_v37, %v5717_v50 }
 0x35d   : > { %v2379_v28 = vadd.f32 %v2369_v39, %v2297_v51  ;;  %2531 = vrot.lane.b32.xlu1 %v2524_v11, %s3690_s22  ;;  %v2245_v11 = vsel %vm507_vm7, %v5484_v6, %v5648_v48 }
 0x35f   : > { %v5828_v62 = vpop.permute.xlu0 %2726  ;;  %v2367_v44 = vpop.permute.xlu1 %2366 }
 0x360   : > { %v2370_v49 = vsel %vm590_vm8, %v5658_v40, %v2367_v44  ;;  %v5836_v23 = vadd.f32 %v2367_v44, %v2300_v35  ;;  %v2254_v35 = vadd.f32 %v2245_v11, %v5849_v52 }
 0x361   : > { %v5838_v50 = vadd.f32 %v2370_v49, %v2299_v46  ;;  %2552 = vrot.lane.b32.xlu1 %v2546_v59, %s3690_s22  ;;  %v2870_v59 = vmul.f32 %v5674_v13, %v5723_v22  ;;  %v5870_v49 = vstv %s3380_s24 }
 0x362   : > { %v2336_v6 = vadd.f32 %v5753_v27, %v2254_v35  ;;  %v2584_v27 = vmul.f32 %v5674_v13, %v5870_v49 }
 0x363   : > { %v5845_v16 = vpop.permute.xlu0 %2730  ;;  %v2606_v51 = vpop.permute.xlu1 %2605 }
 0x364   : > { %v2615_v40 = vsel %vm507_vm7, %v5668_v34, %v2606_v51  ;;  %v2625_v37 = vadd.f32 %v2606_v51, %v2576_v25 }
 0x365   : > { %2556 = vrot.lane.b32.xlu1 %v2548_v0, %s3690_s22 }
 0x367   : > { %v5859_v53 = vpop.permute.xlu0 %2734  ;;  %v2610_v39 = vpop.permute.xlu1 %2609 }
 0x368   : > { %v2616_v34 = vsel %vm507_vm7, %v5695_v20, %v2610_v39  ;;  %v2627_v46 = vadd.f32 %v2610_v39, %v2578_v12  ;;  %v2872_v20 = vmul.f32 %v5689_v41, %v5723_v22 }
 0x369   : > { %2855 = vrot.lane.b32.xlu1 %v2848_v38, %s3689_s18 }
 0x36b   : > { %v2392_v48 = vpop.permute.xlu0 %2391  ;;  %v2614_v44 = vpop.permute.xlu1 %2613 }
 0x36c   : > { %v2400_v0 = vadd.f32 %v2392_v48, %v2336_v6  ;;  %v2401_v4 = vadd.f32 %v2392_v48, %v5755_v47  ;;  %v2617_v25 = vsel %vm507_vm7, %v5711_v56, %v2614_v44  ;;  %v2586_v56 = vmul.f32 %v5582_v8, %v5870_v49 }
 0x36d   : > { %2876 = vrot.lane.b32.xlu1 %v2870_v59, %s3689_s18  ;;  %v2894_v6 = vmul.f32 %v5550_v5, %v5738_v55  ;;  %v2916_v8 = vmul.f32 %v5674_v13, %v5781_v26  ;;  %v2918_v55 = vmul.f32 %v5689_v41, %v5781_v26  ;;  %v2580_v26 = vmul.f32 %v5654_v17, %v5832_v57 }
 0x36f   : > { %v2396_v51 = vpop.permute.xlu0 %2395  ;;  %v2647_v11 = vpop.permute.xlu1 %2646 }
 0x370   : > { %v2404_v12 = vadd.f32 %v2396_v51, %v5796_v7  ;;  %v2405_v39 = vadd.f32 %v2396_v51, %v5794_v32  ;;  %v2656_v47 = vsel %vm507_vm7, %v5725_v14, %v2647_v11  ;;  %v2666_v38 = vadd.f32 %v2647_v11, %v2584_v27 }
 0x371   : > { %2880 = vrot.lane.b32.xlu1 %v2872_v20, %s3689_s18  ;;  %v2575_v14 = vmul.f32 %v5318_v45, %v5832_v57  ;;  %s3691_s18 = smov 3  }
 0x373   : > { %v2417_v35 = vpop.permute.xlu0 %2416  ;;  %v2651_v22 = vpop.permute.xlu1 %2650 }
 0x374   : > { %v2425_v48 = vadd.f32 %v2417_v35, %v2379_v28  ;;  %v2426_v59 = vadd.f32 %v2417_v35, %v2380_v19  ;;  %v2657_v7 = vsel %vm507_vm7, %v5745_v61, %v2651_v22  ;;  %v5891_v32 = vadd.f32 %v2651_v22, %v2586_v56 }
 0x375   : > { %2901 = vrot.lane.b32.xlu1 %v2894_v6, %s3690_s22  ;;  %v2624_v19 = vadd.f32 %v2615_v40, %v2575_v14  ;;  %v7144_v40 = vld [vmem:[#allocation18_spill] sm:$0xff] }
 0x377   : > { %v2438_v20 = vpop.permute.xlu0 %2437  ;;  %v5896_v27 = vpop.permute.xlu1 %2654 }
 0x378   : > { %v5900_v51 = vadd.f32 %v2438_v20, %v2400_v0  ;;  %v5902_v5 = vadd.f32 %v2438_v20, %v2401_v4  ;;  %v5907_v61 = vsel %vm507_vm7, %v5768_v3, %v5896_v27  ;;  %v5925_v3 = vmul.f32 %v5318_v45, %v4321_v15 }
 0x379   : > { %2922 = vrot.lane.b32.xlu1 %v2916_v8, %s3690_s22 }
 0x37b   : > { %v2442_v28 = vpop.permute.xlu0 %2441  ;;  %v2688_v11 = vpop.permute.xlu1 %2687 }
 0x37c   : > { %v5912_v56 = vadd.f32 %v2442_v28, %v2404_v12  ;;  %v5914_v13 = vadd.f32 %v2442_v28, %v2405_v39  ;;  %v2697_v0 = vsel %vm590_vm8, %v5786_v24, %v2688_v11  ;;  %v5918_v4 = vadd.f32 %v2688_v11, %v2625_v37  ;;  %v7149_v28 = vld [vmem:[#allocation15_spill] sm:$0xff] }
 0x37d   : > { %v5920_v35 = vadd.f32 %v2697_v0, %v2624_v19  ;;  %2926 = vrot.lane.b32.xlu1 %v2918_v55, %s3690_s22  ;;  %v549_v12 = vsel %vm507_vm7, %v7144_v40, %v4111_v63  ;;  %v2626_v39 = vadd.f32 %v2616_v34, %v2575_v14  ;;  %v2579_v24 = vmul.f32 %v5764_v33, %v5832_v57  ;;  %v7147_v57 = vld [vmem:[#allocation24_spill] sm:$0xff]  ;;  %s3295_s22 = sshll.u32 %s3844_s21, 4 }
 0x37e   : > { %7142 = vst [vmem:[#allocation246_spill] sm:$0xff] %v5918_v4  ;;  %v558_v19 = vadd.f32 %v549_v12, %v5925_v3  ;;  %v2629_v63 = vadd.f32 %v2614_v44, %v2580_v26  ;;  %v5947_v34 = vmul.f32 %v5318_v45, %v4336_v1  ;;  %v2583_v14 = vmul.f32 %v5318_v45, %v5870_v49  ;;  %v7234_v4 = vld [vmem:[#allocation63_spill] sm:$0xff]  ;;  %s189_s15 = scalar_lea.vmem [#allocation11], %s3295_s22 }
 0x37f   : > { %7143 = vst [vmem:[#allocation247_spill] sm:$0xff] %v5920_v35  ;;  %v2463_v37 = vpop.permute.xlu0 %2462  ;;  %v2692_v22 = vpop.permute.xlu1 %2691  ;;  %v508_v11 = vsel %vm507_vm7, %v7149_v28, %v4099_v60  ;;  %v7162_v28 = vld [vmem:[#allocation19_spill] sm:$0xff]  ;;  %v7241_v35 = vld [vmem:[#allocation92_spill] sm:$0xff]  ;;  %s3188_s27 = sshll.u32 %s189_s15, 4  ;;  %s6605_s27 = int_to_ptr.vmem [resolvable:$true] %s3188_s27 }
 0x380   : > { %v5934_v6 = vadd.f32 %v2463_v37, %v2425_v48  ;;  %v5936_v20 = vadd.f32 %v2463_v37, %v2426_v59  ;;  %v2698_v15 = vsel %vm590_vm8, %v5803_v21, %v2692_v22  ;;  %v5940_v8 = vadd.f32 %v2692_v22, %v2627_v46  ;;  %s3585_s23 = scalar_lea.vmem %s6605_s27, 256  ;;  %p3592_p4 = scmp.lt.s32.totalorder %s6605_s27, %s3590_s30 }
 0x381   : > { %v5942_v55 = vadd.f32 %v2698_v15, %v2626_v39  ;;  %v632_v48 = vsel %vm590_vm8, %v7147_v57, %v4141_v10  ;;  %v2628_v59 = vadd.f32 %v2617_v25, %v2579_v24  ;;  %v517_v10 = vadd.f32 %v508_v11, %v5947_v34  ;;  %v7153_v39 = vld [vmem:[#allocation21_spill] sm:$0xff]  ;;  %p3586_p8 = scmp.ne.s32.totalorder %s6605_s27, %s3585_s23  ;;  %p3593_p9 = scmp.lt.s32.totalorder %s3591_s6, %s3585_s23 }
 0x382   : > { %7145 = vst [vmem:[#allocation18_spill] sm:$0xff] %v5940_v8  ;;  %v641_v26 = vadd.f32 %v632_v48, %v558_v19  ;;  %v2665_v25 = vadd.f32 %v2656_v47, %v2583_v14  ;;  %v591_v24 = vsel %vm590_vm8, %v7153_v39, %v4123_v31  ;;  %v2588_v15 = vmul.f32 %v5689_v41, %v5870_v49  ;;  %v7157_v48 = vld [vmem:[#allocation44_spill] sm:$0xff]  ;;  %v7166_v39 = vld [vmem:[#allocation25_spill] sm:$0xff]  ;;  %v7242_v8 = vld [vmem:[#allocation71_spill] sm:$0xff] }
 0x383   : > { %7146 = vst [vmem:[#allocation248_spill] sm:$0xff] %v5942_v55  ;;  %v5954_v21 = vpop.permute.xlu0 %2761  ;;  %v2696_v46 = vpop.permute.xlu1 %2695  ;;  %v600_v47 = vadd.f32 %v591_v24, %v517_v10  ;;  %v2667_v19 = vadd.f32 %v2657_v7, %v2583_v14  ;;  %v2246_v7 = vsel %vm507_vm7, %v5498_v9, %v5660_v2  ;;  %v7164_v10 = vld [vmem:[#allocation23_spill] sm:$0xff]  ;;  %v7286_v55 = vld [vmem:[#allocation113_spill] sm:$0xff]  ;;  %p3587_p12 = pnand %p3586_p8, %p7419_p2  ;;  %p3594_p13 = por %p3593_p9, %p3592_p4 }
 0x384   : > { %7148 = vst [vmem:[#allocation24_spill] sm:$0xff] %v5954_v21  ;;  %v2699_v44 = vsel %vm590_vm8, %v5819_v54, %v2696_v46  ;;  %v5961_v1 = vadd.f32 %v2696_v46, %v2629_v63  ;;  %v687_v22 = vadd.f32 %v7065_v18, %v641_v26  ;;  %v2587_v63 = vmul.f32 %v5815_v43, %v5870_v49  ;;  %v7161_v46 = vld [vmem:[#allocation46_spill] sm:$0xff]  ;;  %v7240_v21 = vld [vmem:[#allocation157_spill] sm:$0xff] }
 0x385   : > { %v5963_v0 = vadd.f32 %v2699_v44, %v2628_v59  ;;  %v7158_v59 = vld [vmem:[#allocation17_spill] sm:$0xff]  ;;  %v550_v11 = vsel %vm507_vm7, %v7162_v28, %v7161_v46  ;;  %v2670_v44 = vadd.f32 %v5896_v27, %v2588_v15  ;;  %v664_v26 = vadd.f32 %v7066_v36, %v600_v47  ;;  %v7172_v46 = vld [vmem:[#allocation42_spill] sm:$0xff]  ;;  %v7173_v28 = vld [vmem:[#allocation16_spill] sm:$0xff]  ;;  %p3588_p5 = pneg %p3587_p12 }
 0x386   : > { %7150 = vst [vmem:[#allocation15_spill] sm:$0xff] %v5961_v1  ;;  %v733_v49 = vadd.f32 %v7075_v58, %v687_v22  ;;  %v2669_v9 = vadd.f32 %v5907_v61, %v2587_v63  ;;  %v2256_v24 = vadd.f32 %v2246_v7, %v5849_v52  ;;  %v560_v22 = vadd.f32 %v550_v11, %v5925_v3  ;;  %v7171_v7 = vld [vmem:[#allocation106_spill] sm:$0xff] }
 0x387   : > { %7151 = vst [vmem:[#allocation249_spill] sm:$0xff] %v5963_v0  ;;  %v5966_v40 = vpop.permute.xlu0 %2765  ;;  %v2729_v12 = vpop.permute.xlu1 %2728  ;;  %v509_v11 = vsel %vm507_vm7, %v7173_v28, %v7172_v46  ;;  %v7186_v46 = vld [vmem:[#allocation40_spill] sm:$0xff]  ;;  %v7187_v28 = vld [vmem:[#allocation39_spill] sm:$0xff]  ;;  %p3595_p11 = pnand %p3594_p13, %p3588_p5 }
 0x388   : > { %7152 = vst [vmem:[#allocation250_spill] sm:$0xff] %v5966_v40  ;;  %v2738_v60 = vsel %vm590_vm8, %v5828_v62, %v2729_v12  ;;  %v5973_v37 = vadd.f32 %v2729_v12, %v2666_v38  ;;  %v510_v62 = vsel %vm507_vm7, %v7158_v59, %v7157_v48  ;;  %v7165_v12 = vld [vmem:[#allocation54_spill] sm:$0xff]  ;;  %v2338_v61 = vadd.f32 %v5774_v42, %v2256_v24  ;;  %v7232_v0 = vld [vmem:[#allocation160_spill] sm:$0xff] }
 0x389   : > { %v5975_v54 = vadd.f32 %v2738_v60, %v2665_v25  ;;  %v633_v58 = vsel %vm590_vm8, %v7166_v39, %v7165_v12  ;;  %v7180_v39 = vld [vmem:[#allocation45_spill] sm:$0xff]  ;;  %v7231_v40 = vld [vmem:[#allocation182_spill] sm:$0xff] }
 0x38a   : > { %7154 = vst [vmem:[#allocation21_spill] sm:$0xff] %v5973_v37  ;;  %v643_v59 = vadd.f32 %v633_v58, %v560_v22  ;;  %v7182_v22 = vld [vmem:[#allocation20_spill] sm:$0xff] }
 0x38b   : > { %7155 = vst [vmem:[#allocation251_spill] sm:$0xff] %v5975_v54  ;;  %v5982_v57 = vpop.permute.xlu0 %2786  ;;  %v2733_v31 = vpop.permute.xlu1 %2732  ;;  %v7223_v54 = vld [vmem:[#allocation173_spill] sm:$0xff] }
 0x38c   : > { %7156 = vst [vmem:[#allocation252_spill] sm:$0xff] %v5982_v57  ;;  %v2739_v38 = vsel %vm590_vm8, %v5845_v16, %v2733_v31  ;;  %v5990_v18 = vadd.f32 %v2733_v31, %v5891_v32  ;;  %v521_v16 = vadd.f32 %v510_v62, %v5947_v34  ;;  %v7163_v32 = vld [vmem:[#allocation52_spill] sm:$0xff]  ;;  %v689_v58 = vadd.f32 %v7180_v39, %v643_v59  ;;  %v7192_v39 = vld [vmem:[#allocation26_spill] sm:$0xff] }
 0x38d   : > { %v5995_v14 = vadd.f32 %v2739_v38, %v2667_v19  ;;  %v593_v25 = vsel %vm590_vm8, %v7164_v10, %v7163_v32  ;;  %v7169_v19 = vld [vmem:[#allocation34_spill] sm:$0xff]  ;;  %v7170_v31 = vld [vmem:[#allocation28_spill] sm:$0xff]  ;;  %v920_v59 = vsel %vm507_vm7, %v7187_v28, %v7186_v46 }
 0x38e   : > { %7159 = vst [vmem:[#allocation44_spill] sm:$0xff] %v5990_v18  ;;  %v604_v47 = vadd.f32 %v593_v25, %v521_v16  ;;  %v779_v63 = vadd.f32 %v7169_v19, %v733_v49  ;;  %v710_v48 = vadd.f32 %v7170_v31, %v664_v26  ;;  %v7175_v16 = vld [vmem:[#allocation33_spill] sm:$0xff]  ;;  %v7176_v49 = vld [vmem:[#allocation43_spill] sm:$0xff]  ;;  %v7177_v10 = vld [vmem:[#allocation36_spill] sm:$0xff] }
 0x38f   : > { %7160 = vst [vmem:[#allocation17_spill] sm:$0xff] %v5995_v14  ;;  %v2737_v2 = vpop.permute.xlu1 %2736  ;;  %v6012_v60 = vpop.permute.xlu0 %2483  ;;  %v7183_v19 = vld [vmem:[#allocation50_spill] sm:$0xff] }
 0x390   : > { %v2740_v36 = vsel %vm590_vm8, %v5859_v53, %v2737_v2  ;;  %v6016_v27 = vadd.f32 %v2737_v2, %v2670_v44  ;;  %v6027_v53 = vmul.f32 %v5318_v45, %v7171_v7  ;;  %v7174_v44 = vld [vmem:[#allocation38_spill] sm:$0xff]  ;;  %v668_v32 = vadd.f32 %v7176_v49, %v604_v47  ;;  %v7179_v2 = vld [vmem:[#allocation101_spill] sm:$0xff] }
 0x391   : > { %v6019_v15 = vadd.f32 %v2740_v36, %v2669_v9  ;;  %v879_v42 = vsel %vm507_vm7, %v7175_v16, %v7174_v44  ;;  %v6039_v25 = vadd.f32 %v7177_v10, %v779_v63  ;;  %v6044_v12 = vmul.f32 %v5318_v45, %v7179_v2  ;;  %v7181_v36 = vld [vmem:[#allocation48_spill] sm:$0xff]  ;;  %v7184_v47 = vld [vmem:[#allocation22_spill] sm:$0xff]  ;;  %v7189_v16 = vld [vmem:[#allocation37_spill] sm:$0xff] }
 0x392   : > { %7167 = vst [vmem:[#allocation46_spill] sm:$0xff] %v6016_v27  ;;  %v592_v31 = vsel %vm590_vm8, %v7184_v47, %v7183_v19  ;;  %v888_v45 = vadd.f32 %v879_v42, %v6027_v53  ;;  %v7188_v44 = vld [vmem:[#allocation76_spill] sm:$0xff]  ;;  %v7190_v10 = vld [vmem:[#allocation47_spill] sm:$0xff]  ;;  %v7196_v42 = vld [vmem:[#allocation61_spill] sm:$0xff] }
 0x393   : > { %7168 = vst [vmem:[#allocation19_spill] sm:$0xff] %v6019_v15  ;;  %v2394_v52 = vpop.permute.xlu1 %2393  ;;  %v6036_v26 = vpop.permute.xlu0 %2487  ;;  %v881_v49 = vsel %vm507_vm7, %v7189_v16, %v7188_v44  ;;  %v7191_v2 = vld [vmem:[#allocation56_spill] sm:$0xff]  ;;  %v7198_v28 = vld [vmem:[#allocation86_spill] sm:$0xff]  ;;  %v7199_v44 = vld [vmem:[#allocation65_spill] sm:$0xff] }
 0x394   : > { %v2402_v62 = vadd.f32 %v2394_v52, %v2338_v61  ;;  %v2403_v38 = vadd.f32 %v2394_v52, %v5776_v30  ;;  %v7178_v30 = vld [vmem:[#allocation30_spill] sm:$0xff]  ;;  %v551_v61 = vsel %vm507_vm7, %v7182_v22, %v7181_v36  ;;  %v7185_v52 = vld [vmem:[#allocation245_spill] sm:$0xff] }
 0x395   : > { %v756_v9 = vadd.f32 %v7178_v30, %v710_v48  ;;  %v519_v48 = vadd.f32 %v509_v11, %v5947_v34  ;;  %v714_v30 = vadd.f32 %v7190_v10, %v668_v32  ;;  %v7193_v36 = vld [vmem:[#allocation78_spill] sm:$0xff]  ;;  %v562_v19 = vadd.f32 %v551_v61, %v5925_v3  ;;  %v7202_v61 = vld [vmem:[#allocation32_spill] sm:$0xff]  ;;  %v7205_v27 = vld [vmem:[#allocation53_spill] sm:$0xff] }
 0x396   : > { %v7195_v11 = vld [vmem:[#allocation82_spill] sm:$0xff]  ;;  %v963_v32 = vsel %vm590_vm8, %v7199_v44, %v7198_v28  ;;  %v892_v10 = vadd.f32 %v881_v49, %v6027_v53  ;;  %v7203_v49 = vld [vmem:[#allocation51_spill] sm:$0xff] }
 0x397   : > { %v2415_v24 = vpop.permute.xlu1 %2414  ;;  %v961_v22 = vsel %vm590_vm8, %v7196_v42, %v7195_v11  ;;  %v602_v47 = vadd.f32 %v592_v31, %v519_v48  ;;  %v6087_v31 = vadd.f32 %v7202_v61, %v756_v9  ;;  %v6092_v28 = vadd.f32 %v7203_v49, %v714_v30  ;;  %v7204_v44 = vld [vmem:[#allocation58_spill] sm:$0xff]  ;;  %v6099_v9 = vld [vmem:[#allocation4] sm:$0xff]  ;;  %v7209_v30 = vld [vmem:[#allocation183_spill] sm:$0xff] }
 0x398   : > { %v2423_v63 = vadd.f32 %v2415_v24, %v5810_v29  ;;  %v2424_v7 = vadd.f32 %v2415_v24, %v7185_v52  ;;  %v634_v29 = vsel %vm590_vm8, %v7192_v39, %v7191_v2  ;;  %v7194_v24 = vld [vmem:[#allocation41_spill] sm:$0xff]  ;;  %v7200_v2 = vld [vmem:[#allocation90_spill] sm:$0xff]  ;;  %v970_v42 = vadd.f32 %v961_v22, %v888_v45  ;;  %v7214_v49 = vld [vmem:[#allocation155_spill] sm:$0xff] }
 0x399   : > { %v921_v34 = vsel %vm507_vm7, %v7194_v24, %v7193_v36  ;;  %v7197_v52 = vld [vmem:[#allocation49_spill] sm:$0xff]  ;;  %v6082_v24 = vpop.permute.xlu0 %2508  ;;  %v7212_v61 = vld [vmem:[#allocation154_spill] sm:$0xff] }
 0x39a   : > { %v735_v46 = vadd.f32 %v7197_v52, %v689_v58  ;;  %v7201_v39 = vld [vmem:[#allocation69_spill] sm:$0xff]  ;;  %v645_v58 = vadd.f32 %v634_v29, %v562_v19  ;;  %v931_v48 = vadd.f32 %v921_v34, %v6044_v12  ;;  %v929_v52 = vadd.f32 %v920_v59, %v6044_v12  ;;  %v7207_v29 = vld [vmem:[#allocation159_spill] sm:$0xff]  ;;  %v7208_v59 = vld [vmem:[#allocation62_spill] sm:$0xff] }
 0x39b   : > { %v2419_v16 = vpop.permute.xlu1 %2418  ;;  %v1003_v36 = vsel %vm590_vm8, %v7201_v39, %v7200_v2  ;;  %v666_v2 = vadd.f32 %v7204_v44, %v602_v47  ;;  %v974_v39 = vadd.f32 %v963_v32, %v892_v10  ;;  %v6103_v34 = vmul.f32 %v6099_v9, %v7207_v29  ;;  %v7211_v10 = vld [vmem:[#allocation73_spill] sm:$0xff]  ;;  %v7216_v29 = vld [vmem:[#allocation74_spill] sm:$0xff] }
 0x39c   : > { %v2427_v11 = vadd.f32 %v2419_v16, %v5838_v50  ;;  %v2428_v3 = vadd.f32 %v2419_v16, %v5836_v23  ;;  %v6096_v15 = vadd.f32 %v7205_v27, %v735_v46  ;;  %v7206_v50 = vld [vmem:[#allocation60_spill] sm:$0xff]  ;;  %v1013_v16 = vadd.f32 %v1003_v36, %v931_v48  ;;  %v7213_v48 = vld [vmem:[#allocation177_spill] sm:$0xff] }
 0x39d   : > { %v691_v23 = vadd.f32 %v7206_v50, %v645_v58  ;;  %v712_v22 = vadd.f32 %v7208_v59, %v666_v2  ;;  %v1585_v19 = vmul.f32 %v6099_v9, %v7209_v30  ;;  %v7210_v27 = vld [vmem:[#allocation64_spill] sm:$0xff]  ;;  %v1034_v36 = vadd.f32 %v7211_v10, %v970_v42  ;;  %v7215_v2 = vld [vmem:[#allocation66_spill] sm:$0xff]  ;;  %v7217_v59 = vld [vmem:[#allocation35_spill] sm:$0xff]  ;;  %v6128_v42 = vpop.permute.xlu0 %2807 }
 0x39e   : > { %v6116_v58 = vmul.f32 %v6099_v9, %v7212_v61  ;;  %v1635_v44 = vsel %vm507_vm7, %v7214_v49, %v7213_v48  ;;  %v7219_v30 = vld [vmem:[#allocation178_spill] sm:$0xff]  ;;  %7220 = vst [vmem:[#allocation52_spill] sm:$0xff] %v6128_v42  ;;  %v7222_v61 = vld [vmem:[#allocation77_spill] sm:$0xff]  ;;  %v7225_v49 = vld [vmem:[#allocation187_spill] sm:$0xff] }
 0x39f   : > { %v2440_v45 = vpop.permute.xlu1 %2439  ;;  %v737_v46 = vadd.f32 %v7210_v27, %v691_v23  ;;  %v758_v50 = vadd.f32 %v7215_v2, %v712_v22  ;;  %v1579_v23 = vmul.f32 %v6099_v9, %v7219_v30  ;;  %v7221_v27 = vld [vmem:[#allocation68_spill] sm:$0xff]  ;;  %v1059_v37 = vadd.f32 %v7222_v61, %v1013_v16  ;;  %v7224_v48 = vld [vmem:[#allocation150_spill] sm:$0xff] }
 0x3a0   : > { %v6108_v47 = vadd.f32 %v2440_v45, %v2402_v62  ;;  %v6110_v32 = vadd.f32 %v2440_v45, %v2403_v38  ;;  %v880_v62 = vsel %vm507_vm7, %v7217_v59, %v7216_v29  ;;  %v7218_v38 = vld [vmem:[#allocation75_spill] sm:$0xff]  ;;  %v1607_v22 = vsel %vm507_vm7, %v7224_v48, %v7223_v54  ;;  %v7226_v2 = vld [vmem:[#allocation164_spill] sm:$0xff] }
 0x3a1   : > { %v1038_v45 = vadd.f32 %v7218_v38, %v974_v39  ;;  %v6131_v10 = vadd.f32 %v7221_v27, %v737_v46  ;;  %v1691_v29 = vsel %vm590_vm8, %v7226_v2, %v7225_v49  ;;  %v7227_v39 = vld [vmem:[#allocation80_spill] sm:$0xff]  ;;  %v7228_v38 = vld [vmem:[#allocation59_spill] sm:$0xff]  ;;  %v1641_v1 = vadd.f32 %v1635_v44, %v1585_v19  ;;  %v7229_v27 = vld [vmem:[#allocation70_spill] sm:$0xff] }
 0x3a2   : > { %v922_v30 = vsel %vm507_vm7, %v7228_v38, %v7227_v39  ;;  %v6148_v16 = vadd.f32 %v7229_v27, %v758_v50  ;;  %v890_v61 = vadd.f32 %v880_v62, %v6027_v53  ;;  %v7230_v54 = vld [vmem:[#allocation79_spill] sm:$0xff]  ;;  %v1663_v49 = vsel %vm590_vm8, %v7232_v0, %v7231_v40  ;;  %v7233_v2 = vld [vmem:[#allocation84_spill] sm:$0xff]  ;;  %v7235_v44 = vld [vmem:[#allocation81_spill] sm:$0xff] }
 0x3a3   : > { %v2461_v59 = vpop.permute.xlu1 %2460  ;;  %v1080_v48 = vadd.f32 %v7230_v54, %v1034_v36  ;;  %v962_v39 = vsel %vm590_vm8, %v7234_v4, %v7233_v2  ;;  %v1613_v38 = vadd.f32 %v1607_v22, %v1579_v23  ;;  %v7236_v50 = vld [vmem:[#allocation88_spill] sm:$0xff]  ;;  %v7237_v27 = vld [vmem:[#allocation67_spill] sm:$0xff]  ;;  %v1004_v4 = vsel %vm590_vm8, %v7242_v8, %v7241_v35  ;;  %v6170_v22 = vpop.permute.xlu0 %2811 }
 0x3a4   : > { %v6143_v42 = vadd.f32 %v2461_v59, %v2423_v63  ;;  %v6145_v46 = vadd.f32 %v2461_v59, %v2424_v7  ;;  %v1084_v63 = vadd.f32 %v7235_v44, %v1038_v45  ;;  %v1697_v7 = vadd.f32 %v1691_v29, %v1641_v1  ;;  %v7238_v62 = vld [vmem:[#allocation83_spill] sm:$0xff]  ;;  %v7239_v54 = vld [vmem:[#allocation180_spill] sm:$0xff]  ;;  %7243 = vst [vmem:[#allocation23_spill] sm:$0xff] %v6170_v22 }
 0x3a5   : > { %v933_v59 = vadd.f32 %v922_v30, %v6044_v12  ;;  %v1002_v53 = vsel %vm590_vm8, %v7237_v27, %v7236_v50  ;;  %v1105_v36 = vadd.f32 %v7238_v62, %v1059_v37  ;;  %v1636_v0 = vsel %vm507_vm7, %v7240_v21, %v7239_v54  ;;  %v7246_v30 = vld [vmem:[#allocation85_spill] sm:$0xff]  ;;  %v7247_v37 = vld [vmem:[#allocation175_spill] sm:$0xff]  ;;  %v7248_v44 = vld [vmem:[#allocation152_spill] sm:$0xff] }
 0x3a6   : > { %v1669_v45 = vadd.f32 %v1663_v49, %v1613_v38  ;;  %v972_v29 = vadd.f32 %v962_v39, %v890_v61  ;;  %v1126_v2 = vadd.f32 %v7246_v30, %v1080_v48  ;;  %v1608_v50 = vsel %vm507_vm7, %v7248_v44, %v7247_v37  ;;  %v7249_v21 = vld [vmem:[#allocation189_spill] sm:$0xff]  ;;  %v7250_v27 = vld [vmem:[#allocation166_spill] sm:$0xff]  ;;  %v7251_v54 = vld [vmem:[#allocation87_spill] sm:$0xff] }
 0x3a7   : > { %v2465_v40 = vpop.permute.xlu1 %2464  ;;  %v1692_v62 = vsel %vm590_vm8, %v7250_v27, %v7249_v21  ;;  %v6184_v35 = vadd.f32 %v7251_v54, %v1084_v63  ;;  %v1011_v8 = vadd.f32 %v1002_v53, %v929_v52  ;;  %v1643_v49 = vadd.f32 %v1636_v0, %v1585_v19  ;;  %v7254_v48 = vld [vmem:[#allocation89_spill] sm:$0xff]  ;;  %v7256_v37 = vld [vmem:[#allocation162_spill] sm:$0xff]  ;;  %v7258_v21 = vld [vmem:[#allocation131_spill] sm:$0xff] }
 0x3a8   : > { %v6172_v1 = vadd.f32 %v2465_v40, %v2427_v11  ;;  %v6174_v12 = vadd.f32 %v2465_v40, %v2428_v3  ;;  %v7252_v11 = vld [vmem:[#allocation170_spill] sm:$0xff]  ;;  %v7253_v3 = vld [vmem:[#allocation91_spill] sm:$0xff]  ;;  %v1015_v61 = vadd.f32 %v1004_v4, %v933_v59  ;;  %v6191_v39 = vadd.f32 %v7254_v48, %v1105_v36  ;;  %v7255_v30 = vld [vmem:[#allocation185_spill] sm:$0xff] }
 0x3a9   : > { %v1729_v38 = vadd.f32 %v7252_v11, %v1697_v7  ;;  %v6188_v40 = vadd.f32 %v7253_v3, %v1126_v2  ;;  %v1664_v44 = vsel %vm590_vm8, %v7256_v37, %v7255_v30  ;;  %v7259_v63 = vld [vmem:[#allocation107_spill] sm:$0xff]  ;;  %v1615_v19 = vadd.f32 %v1608_v50, %v1579_v23  ;;  %v7260_v53 = vld [vmem:[#allocation168_spill] sm:$0xff]  ;;  %v7261_v2 = vld [vmem:[#allocation94_spill] sm:$0xff] }
 0x3aa   : > { %7244 = vst [vmem:[#allocation54_spill] sm:$0xff] %v6172_v1  ;;  %7245 = vst [vmem:[#allocation25_spill] sm:$0xff] %v6174_v12  ;;  %v1291_v52 = vsel %vm507_vm7, %v7259_v63, %v7258_v21  ;;  %v1713_v7 = vadd.f32 %v7260_v53, %v1669_v45  ;;  %v1699_v0 = vadd.f32 %v1692_v62, %v1643_v49  ;;  %v7262_v59 = vld [vmem:[#allocation96_spill] sm:$0xff]  ;;  %v7263_v36 = vld [vmem:[#allocation121_spill] sm:$0xff] }
 0x3ab   : > { %v6196_v22 = vpop.permute.xlu1 %2763  ;;  %v1036_v27 = vadd.f32 %v7261_v2, %v972_v29  ;;  %v1057_v4 = vadd.f32 %v7262_v59, %v1011_v8  ;;  %v7264_v54 = vld [vmem:[#allocation97_spill] sm:$0xff]  ;;  %v7265_v3 = vld [vmem:[#allocation127_spill] sm:$0xff]  ;;  %v7266_v48 = vld [vmem:[#allocation102_spill] sm:$0xff]  ;;  %v1671_v23 = vadd.f32 %v1664_v44, %v1615_v19  ;;  %v6215_v29 = vpop.permute.xlu0 %2832 }
 0x3ac   : > { %7257 = vst [vmem:[#allocation34_spill] sm:$0xff] %v6196_v22  ;;  %v1249_v11 = vsel %vm507_vm7, %v7264_v54, %v7263_v36  ;;  %v1251_v30 = vsel %vm507_vm7, %v7266_v48, %v7265_v3  ;;  %v7267_v37 = vld [vmem:[#allocation143_spill] sm:$0xff]  ;;  %v7268_v22 = vld [vmem:[#allocation120_spill] sm:$0xff]  ;;  %v7269_v50 = vld [vmem:[#allocation174_spill] sm:$0xff]  ;;  %v1301_v36 = vadd.f32 %v1291_v52, %v6116_v58 }
 0x3ad   : > { %v1373_v21 = vsel %vm590_vm8, %v7268_v22, %v7267_v37  ;;  %v1761_v45 = vadd.f32 %v7269_v50, %v1729_v38  ;;  %v7270_v62 = vld [vmem:[#allocation193_spill] sm:$0xff]  ;;  %7271 = vst [vmem:[#allocation28_spill] sm:$0xff] %v6215_v29  ;;  %v7272_v8 = vld [vmem:[#allocation98_spill] sm:$0xff]  ;;  %v7274_v2 = vld [vmem:[#allocation99_spill] sm:$0xff]  ;;  %v1262_v52 = vadd.f32 %v1251_v30, %v6103_v34 }
 0x3ae   : > { %v1731_v49 = vadd.f32 %v7270_v62, %v1699_v0  ;;  %v1061_v63 = vadd.f32 %v7272_v8, %v1015_v61  ;;  %v7273_v53 = vld [vmem:[#allocation125_spill] sm:$0xff]  ;;  %v7275_v54 = vld [vmem:[#allocation135_spill] sm:$0xff]  ;;  %v7279_v38 = vld [vmem:[#allocation116_spill] sm:$0xff] }
 0x3af   : > { %v1250_v59 = vsel %vm507_vm7, %v7274_v2, %v7273_v53  ;;  %v7276_v3 = vld [vmem:[#allocation111_spill] sm:$0xff]  ;;  %v6225_v22 = vpop.permute.xlu1 %2784  ;;  %v7280_v0 = vld [vmem:[#allocation172_spill] sm:$0xff]  ;;  %v7282_v62 = vld [vmem:[#allocation197_spill] sm:$0xff]  ;;  %v1258_v53 = vadd.f32 %v1249_v11, %v6103_v34 }
 0x3b0   : > { %v1331_v48 = vsel %vm590_vm8, %v7276_v3, %v7275_v54  ;;  %7277 = vst [vmem:[#allocation106_spill] sm:$0xff] %v6225_v22  ;;  %v7278_v44 = vld [vmem:[#allocation139_spill] sm:$0xff]  ;;  %v1745_v37 = vadd.f32 %v7280_v0, %v1713_v7  ;;  %v1763_v8 = vadd.f32 %v7282_v62, %v1731_v49  ;;  %v7283_v2 = vld [vmem:[#allocation129_spill] sm:$0xff]  ;;  %v7284_v29 = vld [vmem:[#allocation104_spill] sm:$0xff]  ;;  %v1383_v3 = vadd.f32 %v1373_v21, %v1301_v36 }
 0x3b1   : > { %v1333_v19 = vsel %vm590_vm8, %v7279_v38, %v7278_v44  ;;  %v7281_v50 = vld [vmem:[#allocation191_spill] sm:$0xff]  ;;  %v1290_v54 = vsel %vm507_vm7, %v7284_v29, %v7283_v2  ;;  %v7285_v22 = vld [vmem:[#allocation137_spill] sm:$0xff]  ;;  %v1260_v49 = vadd.f32 %v1250_v59, %v6103_v34  ;;  %v1340_v57 = vadd.f32 %v1331_v48, %v1258_v53  ;;  %v7294_v36 = vld [vmem:[#allocation118_spill] sm:$0xff] }
 0x3b2   : > { %v1715_v61 = vadd.f32 %v7281_v50, %v1671_v23  ;;  %v1332_v18 = vsel %vm590_vm8, %v7286_v55, %v7285_v22  ;;  %v7287_v44 = vld [vmem:[#allocation179_spill] sm:$0xff]  ;;  %v7290_v11 = vld [vmem:[#allocation133_spill] sm:$0xff]  ;;  %v1344_v14 = vadd.f32 %v1333_v19, %v1262_v52  ;;  %v7295_v22 = vld [vmem:[#allocation176_spill] sm:$0xff] }
 0x3b3   : > { %v1793_v38 = vadd.f32 %v7287_v44, %v1761_v45  ;;  %v7288_v7 = vld [vmem:[#allocation195_spill] sm:$0xff]  ;;  %v7291_v62 = vld [vmem:[#allocation109_spill] sm:$0xff]  ;;  %v6248_v29 = vpop.permute.xlu1 %2788  ;;  %v1777_v45 = vadd.f32 %v7295_v22, %v1745_v37  ;;  %v7297_v44 = vld [vmem:[#allocation202_spill] sm:$0xff]  ;;  %v1342_v48 = vadd.f32 %v1332_v18, %v1260_v49 }
 0x3b4   : > { %v1747_v0 = vadd.f32 %v7288_v7, %v1715_v61  ;;  %v7289_v23 = vld [vmem:[#allocation27_spill] sm:$0xff]  ;;  %v1292_v30 = vsel %vm507_vm7, %v7291_v62, %v7290_v11  ;;  %7292 = vst [vmem:[#allocation42_spill] sm:$0xff] %v6248_v29  ;;  %v7293_v21 = vld [vmem:[#allocation141_spill] sm:$0xff]  ;;  %v6256_v7 = vpop.permute.xlu0 %2529  ;;  %v7298_v34 = vld [vmem:[#allocation100_spill] sm:$0xff] }
 0x3b5   : > { %v1795_v50 = vadd.f32 %v7289_v23, %v1763_v8  ;;  %v1372_v55 = vsel %vm590_vm8, %v7294_v36, %v7293_v21  ;;  %v7296_v2 = vld [vmem:[#allocation199_spill] sm:$0xff]  ;;  %v1082_v59 = vadd.f32 %v7298_v34, %v1036_v27  ;;  %v1299_v23 = vadd.f32 %v1290_v54, %v6116_v58  ;;  %v7299_v19 = vld [vmem:[#allocation130_spill] sm:$0xff]  ;;  %v7301_v62 = vld [vmem:[#allocation145_spill] sm:$0xff] }
 0x3b6   : > { %v1779_v61 = vadd.f32 %v7296_v2, %v1747_v0  ;;  %v1429_v53 = vadd.f32 %v7299_v19, %v1383_v3  ;;  %v7300_v52 = vld [vmem:[#allocation103_spill] sm:$0xff]  ;;  %v7302_v29 = vld [vmem:[#allocation124_spill] sm:$0xff]  ;;  %v7305_v2 = vld [vmem:[#allocation126_spill] sm:$0xff] }
 0x3b7   : > { %v1827_v8 = vadd.f32 %v7297_v44, %v1795_v50  ;;  %v1103_v11 = vadd.f32 %v7300_v52, %v1057_v4  ;;  %v1374_v21 = vsel %vm590_vm8, %v7302_v29, %v7301_v62  ;;  %v7303_v37 = vld [vmem:[#allocation184_spill] sm:$0xff]  ;;  %v1303_v50 = vadd.f32 %v1292_v30, %v6116_v58  ;;  %v7306_v34 = vld [vmem:[#allocation147_spill] sm:$0xff]  ;;  %v6270_v18 = vpop.permute.xlu1 %2485  ;;  %v7307_v3 = vld [vmem:[#allocation110_spill] sm:$0xff] }
 0x3b8   : > { %v1825_v36 = vadd.f32 %v7303_v37, %v1793_v38  ;;  %v7304_v0 = vld [vmem:[#allocation200_spill] sm:$0xff]  ;;  %v1404_v44 = vadd.f32 %v7305_v2, %v1340_v57  ;;  %v1381_v27 = vadd.f32 %v1372_v55, %v1299_v23  ;;  %v1406_v54 = vadd.f32 %v7306_v34, %v1342_v48  ;;  %v7309_v52 = vld [vmem:[#allocation181_spill] sm:$0xff] }
 0x3b9   : > { %v1811_v22 = vadd.f32 %v7304_v0, %v1779_v61  ;;  %v1149_v49 = vadd.f32 %v7307_v3, %v1103_v11  ;;  %v7308_v4 = vld [vmem:[#allocation128_spill] sm:$0xff]  ;;  %v1809_v12 = vadd.f32 %v7309_v52, %v1777_v45  ;;  %v1385_v62 = vadd.f32 %v1374_v21, %v1303_v50  ;;  %v7311_v61 = vld [vmem:[#allocation149_spill] sm:$0xff]  ;;  %v6281_v11 = vpop.permute.xlu0 %2533  ;;  %v7317_v45 = vld [vmem:[#allocation151_spill] sm:$0xff] }
 0x3ba   : > { %v1408_v19 = vadd.f32 %v7308_v4, %v1344_v14  ;;  %v7310_v38 = vld [vmem:[#allocation136_spill] sm:$0xff]  ;;  %v1427_v0 = vadd.f32 %v7311_v61, %v1381_v27  ;;  %v7312_v58 = vld [vmem:[#allocation153_spill] sm:$0xff]  ;;  %v7324_v61 = vld [vmem:[#allocation158_spill] sm:$0xff] }
 0x3bb   : > { %v1831_v29 = vadd.f32 %v1827_v8, %v1811_v22  ;;  %v1475_v37 = vadd.f32 %v7310_v38, %v1429_v53  ;;  %v1452_v30 = vadd.f32 %v7312_v58, %v1406_v54  ;;  %v7313_v57 = vld [vmem:[#allocation105_spill] sm:$0xff]  ;;  %v7314_v23 = vld [vmem:[#allocation108_spill] sm:$0xff]  ;;  %v1829_v1 = vadd.f32 %v1825_v36, %v1809_v12  ;;  %v6287_v27 = vpop.permute.xlu1 %2506  ;;  %v7323_v12 = vld [vmem:[#allocation142_spill] sm:$0xff] }
 0x3bc   : > { %v1107_v55 = vadd.f32 %v7313_v57, %v1061_v63  ;;  %v1128_v48 = vadd.f32 %v7314_v23, %v1082_v59  ;;  %v7315_v2 = vld [vmem:[#allocation117_spill] sm:$0xff]  ;;  %v7316_v14 = vld [vmem:[#allocation132_spill] sm:$0xff]  ;;  %v1431_v8 = vadd.f32 %v7317_v45, %v1385_v62  ;;  %v7321_v63 = vld [vmem:[#allocation114_spill] sm:$0xff] }
 0x3bd   : > { %v1195_v34 = vadd.f32 %v7315_v2, %v1149_v49  ;;  %v1450_v3 = vadd.f32 %v7316_v14, %v1404_v44  ;;  %v7318_v21 = vld [vmem:[#allocation156_spill] sm:$0xff]  ;;  %v7319_v53 = vld [vmem:[#allocation161_spill] sm:$0xff]  ;;  %v7322_v59 = vld [vmem:[#allocation134_spill] sm:$0xff]  ;;  %v2978_v49 = vrot.slane %v1831_v29, 1  ;;  %v1521_v36 = vadd.f32 %v7323_v12, %v1475_v37 }
 0x3be   : > { %v1473_v22 = vadd.f32 %v7318_v21, %v1427_v0  ;;  %v1498_v50 = vadd.f32 %v7319_v53, %v1452_v30  ;;  %v7320_v54 = vld [vmem:[#allocation112_spill] sm:$0xff]  ;;  %v1174_v52 = vadd.f32 %v7321_v63, %v1128_v48  ;;  %v1454_v38 = vadd.f32 %v7322_v59, %v1408_v19  ;;  %v7325_v44 = vld [vmem:[#allocation163_spill] sm:$0xff]  ;;  %v7329_v48 = vld [vmem:[#allocation138_spill] sm:$0xff] }
 0x3bf   : > { %v1153_v4 = vadd.f32 %v7320_v54, %v1107_v55  ;;  %v1477_v58 = vadd.f32 %v7324_v61, %v1431_v8  ;;  %v7326_v62 = vld [vmem:[#allocation167_spill] sm:$0xff]  ;;  %v1201_v2 = vadd.f32 %v1195_v34, %v6188_v40  ;;  %v2976_v45 = vrot.slane %v1829_v1, 1  ;;  %v7330_v19 = vld [vmem:[#allocation148_spill] sm:$0xff]  ;;  %v7331_v53 = vld [vmem:[#allocation165_spill] sm:$0xff]  ;;  %v6304_v63 = vpop.permute.xlu1 %2510  ;;  %v6311_v1 = vpop.permute.xlu0 %2554 }
 0x3c0   : > { %v1519_v57 = vadd.f32 %v7325_v44, %v1473_v22  ;;  %v1544_v23 = vadd.f32 %v7326_v62, %v1498_v50  ;;  %v7327_v0 = vld [vmem:[#allocation95_spill] sm:$0xff]  ;;  %v1496_v21 = vadd.f32 %v7329_v48, %v1450_v3  ;;  %v1567_v29 = vadd.f32 %v7330_v19, %v1521_v36  ;;  %v7332_v54 = vld [vmem:[#allocation169_spill] sm:$0xff]  ;;  %v7333_v22 = vld [vmem:[#allocation72_spill] sm:$0xff] }
 0x3c1   : > { %v1197_v30 = vadd.f32 %v7327_v0, %v6191_v39  ;;  %v7328_v14 = vld [vmem:[#allocation119_spill] sm:$0xff]  ;;  %v1523_v37 = vadd.f32 %v7331_v53, %v1477_v58  ;;  %v829_v50 = vadd.f32 %v7333_v22, %v6131_v10  ;;  %v7334_v39 = vld [vmem:[#allocation93_spill] sm:$0xff]  ;;  %v2979_v34 = vsel %vm2949_vm5, %v2976_v45, %v2978_v49  ;;  %v7335_v3 = vld [vmem:[#allocation140_spill] sm:$0xff] }
 0x3c2   : > { %v1199_v55 = vadd.f32 %v7328_v14, %v1153_v4  ;;  %v1565_v8 = vadd.f32 %v7332_v54, %v1519_v57  ;;  %v1176_v59 = vadd.f32 %v7334_v39, %v6184_v35  ;;  %v1500_v4 = vadd.f32 %v7335_v3, %v1454_v38  ;;  %v7336_v12 = vld [vmem:[#allocation144_spill] sm:$0xff]  ;;  %v7337_v58 = vld [vmem:[#allocation171_spill] sm:$0xff]  ;;  %v7338_v57 = vld [vmem:[#allocation57_spill] sm:$0xff] }
 0x3c3   : > { %v1203_v40 = vadd.f32 %v1197_v30, %v1174_v52  ;;  %v1542_v36 = vadd.f32 %v7336_v12, %v1496_v21  ;;  %v1573_v61 = vadd.f32 %v1567_v29, %v1544_v23  ;;  %v1569_v44 = vadd.f32 %v7337_v58, %v1523_v37  ;;  %v7339_v35 = vld [vmem:[#allocation55_spill] sm:$0xff]  ;;  %v7340_v30 = vld [vmem:[#allocation146_spill] sm:$0xff]  ;;  %v6325_v38 = vpop.permute.xlu1 %2809  ;;  %v7341_v53 = vld [vmem:[#allocation236_spill] sm:$0xff] }
 0x3c4   : > { %v827_v62 = vadd.f32 %v7338_v57, %v6096_v15  ;;  %v2950_v0 = vrot.slane %v1201_v2, 1  ;;  %v6318_v10 = vadd.f32 %v1199_v55, %v1176_v59  ;;  %v806_v52 = vadd.f32 %v7339_v35, %v6092_v28  ;;  %v7343_v22 = vld [vmem:[#allocation186_spill] sm:$0xff]  ;;  %v7349_v57 = vld [vmem:[#allocation207_spill] sm:$0xff]  ;;  %v7352_v35 = vld [vmem:[#allocation192_spill] sm:$0xff] }
 0x3c5   : > { %v1546_v14 = vadd.f32 %v7340_v30, %v1500_v4  ;;  %v1571_v48 = vadd.f32 %v1565_v8, %v1542_v36  ;;  %v6323_v19 = vadd.f32 %v2979_v34, %v1573_v61  ;;  %v831_v23 = vadd.f32 %v6039_v25, %v6087_v31  ;;  %v7342_v8 = vld [vmem:[#allocation204_spill] sm:$0xff]  ;;  %v6343_v31 = vpop.permute.xlu0 %2853  ;;  %v7344_v59 = vld [vmem:[#allocation234_spill] sm:$0xff] }
 0x3c6   : > { %v6330_v21 = vadd.f32 %v827_v62, %v6148_v16  ;;  %v2951_v15 = vrot.slane %v1203_v40, 1  ;;  %v6332_v2 = vadd.f32 %v829_v50, %v806_v52  ;;  %v1835_v28 = vmul.f32 %v6099_v9, %v7341_v53  ;;  %v7345_v3 = vld [vmem:[#allocation206_spill] sm:$0xff]  ;;  %v7346_v4 = vld [vmem:[#allocation188_spill] sm:$0xff] }
 0x3c7   : > { %v1575_v55 = vadd.f32 %v1569_v44, %v1546_v14  ;;  %v2988_v29 = vadd.f32 %v2976_v45, %v1571_v48  ;;  %v2956_v54 = vrot.slane %v6318_v10, 1  ;;  %v1875_v39 = vsel %vm507_vm7, %v7343_v22, %v7342_v8  ;;  %v6352_v34 = vpop.permute.xlu1 %2830  ;;  %v7347_v36 = vld [vmem:[#allocation216_spill] sm:$0xff]  ;;  %v7348_v61 = vld [vmem:[#allocation198_spill] sm:$0xff] }
 0x3c8   : > { %v2952_v37 = vsel %vm2949_vm5, %v2950_v0, %v2951_v15  ;;  %v1839_v25 = vmul.f32 %v5764_v33, %v7341_v53  ;;  %v3030_v45 = vrot.slane %v6323_v19, 2  ;;  %v1840_v50 = vmul.f32 %v5654_v17, %v7341_v53  ;;  %v7351_v0 = vld [vmem:[#allocation210_spill] sm:$0xff] }
 0x3c9   : > { %v6345_v16 = vadd.f32 %v2978_v49, %v1575_v55  ;;  %v1843_v40 = vmul.f32 %v6099_v9, %v7344_v59  ;;  %v1876_v12 = vsel %vm507_vm7, %v7346_v4, %v7345_v3  ;;  %v1847_v33 = vmul.f32 %v5815_v43, %v7344_v59  ;;  %v7350_v9 = vld [vmem:[#allocation190_spill] sm:$0xff]  ;;  %v7353_v43 = vld [vmem:[#allocation212_spill] sm:$0xff] }
 0x3ca   : > { %v1848_v49 = vmul.f32 %v5689_v41, %v7344_v59  ;;  %v1957_v58 = vsel %vm590_vm8, %v7348_v61, %v7347_v36  ;;  %v3029_v17 = vrot.slane %v2988_v29, 2  ;;  %v1884_v44 = vadd.f32 %v1875_v39, %v1835_v28  ;;  %v7354_v14 = vld [vmem:[#allocation194_spill] sm:$0xff]  ;;  %v7356_v29 = vld [vmem:[#allocation196_spill] sm:$0xff]  ;;  %v7358_v36 = vld [vmem:[#allocation31_spill] sm:$0xff] }
 0x3cb   : > { %v1877_v62 = vsel %vm507_vm7, %v7350_v9, %v7349_v57  ;;  %v1916_v52 = vsel %vm507_vm7, %v7352_v35, %v7351_v0  ;;  %v6370_v30 = vadd.f32 %v2952_v37, %v831_v23  ;;  %v6375_v41 = vsel %vm2949_vm5, %v2951_v15, %v2956_v54  ;;  %v7355_v55 = vld [vmem:[#allocation214_spill] sm:$0xff]  ;;  %v6384_v59 = vpop.permute.xlu1 %2834  ;;  %v7357_v4 = vld [vmem:[#allocation220_spill] sm:$0xff]  ;;  %v6395_v9 = vpop.permute.xlu0 %2857 }
 0x3cc   : > { %v1917_v48 = vsel %vm507_vm7, %v7354_v14, %v7353_v43  ;;  %v1918_v53 = vsel %vm507_vm7, %v7356_v29, %v7355_v55  ;;  %v3035_v8 = vrot.slane %v6345_v16, 2  ;;  %v1886_v22 = vadd.f32 %v1876_v12, %v1835_v28  ;;  %v7362_v35 = vld [vmem:[#allocation218_spill] sm:$0xff]  ;;  %v7365_v29 = vld [vmem:[#allocation201_spill] sm:$0xff] }
 0x3cd   : > { %v1966_v39 = vadd.f32 %v1957_v58, %v1884_v44  ;;  %v6389_v23 = vsel %vm3028_vm6, %v3029_v17, %v3030_v45  ;;  %v1888_v15 = vadd.f32 %v1877_v62, %v1839_v25  ;;  %v1889_v37 = vadd.f32 %v7349_v57, %v1840_v50  ;;  %v7359_v58 = vld [vmem:[#allocation224_spill] sm:$0xff]  ;;  %v7360_v44 = vld [vmem:[#allocation203_spill] sm:$0xff] }
 0x3ce   : > { %v1925_v3 = vadd.f32 %v1916_v52, %v1843_v40  ;;  %v1959_v61 = vsel %vm590_vm8, %v7358_v36, %v7357_v4  ;;  %v1927_v0 = vadd.f32 %v1917_v48, %v1843_v40  ;;  %v6397_v28 = vadd.f32 %v1918_v53, %v1847_v33  ;;  %v7361_v33 = vld [vmem:[#allocation122_spill] sm:$0xff] }
 0x3cf   : > { %v1930_v12 = vadd.f32 %v7355_v55, %v1848_v49  ;;  %v1999_v17 = vsel %vm590_vm8, %v7360_v44, %v7359_v58  ;;  %v2517_v25 = vadd.f32 %v6082_v24, %v5934_v6  ;;  %v2518_v50 = vadd.f32 %v6082_v24, %v5936_v20  ;;  %v7363_v49 = vld [vmem:[#allocation29_spill] sm:$0xff]  ;;  %v2532_v48 = vpop.permute.xlu1 %2531 }
 0x3d0   : > { %v2494_v57 = vadd.f32 %v6270_v18, %v6108_v47  ;;  %v2495_v40 = vadd.f32 %v6270_v18, %v6110_v32  ;;  %v2030_v62 = vadd.f32 %v7361_v33, %v1966_v39  ;;  %v1958_v52 = vsel %vm590_vm8, %v7363_v49, %v7362_v35  ;;  %v7364_v47 = vld [vmem:[#allocation222_spill] sm:$0xff]  ;;  %v7366_v58 = vld [vmem:[#allocation213_spill] sm:$0xff] }
 0x3d1   : > { %v1970_v43 = vadd.f32 %v1959_v61, %v1888_v15  ;;  %v1971_v14 = vadd.f32 %v7357_v4, %v1889_v37  ;;  %v2563_v6 = vadd.f32 %v6311_v1, %v2517_v25  ;;  %v2564_v20 = vadd.f32 %v6311_v1, %v2518_v50  ;;  %v6425_v15 = vpop.permute.xlu0 %2878  ;;  %v7370_v35 = vld [vmem:[#allocation25_spill] sm:$0xff] }
 0x3d2   : > { %v2540_v24 = vadd.f32 %v2532_v48, %v2494_v57  ;;  %v2541_v55 = vadd.f32 %v2532_v48, %v2495_v40  ;;  %v1998_v32 = vsel %vm590_vm8, %v7365_v29, %v7364_v47  ;;  %v2009_v18 = vadd.f32 %v1999_v17, %v1927_v0  ;;  %v7367_v0 = vld [vmem:[#allocation209_spill] sm:$0xff]  ;;  %v7368_v40 = vld [vmem:[#allocation211_spill] sm:$0xff] }
 0x3d3   : > { %v2492_v53 = vadd.f32 %v6012_v60, %v5900_v51  ;;  %v2493_v39 = vadd.f32 %v6012_v60, %v5902_v5  ;;  %v2515_v37 = vadd.f32 %v6287_v27, %v6143_v42  ;;  %v2516_v1 = vadd.f32 %v6287_v27, %v6145_v46  ;;  %v2553_v25 = vpop.permute.xlu1 %2552 }
 0x3d4   : > { %v2569_v4 = vadd.f32 %v2563_v6, %v2540_v24  ;;  %v2570_v36 = vadd.f32 %v2564_v20, %v2541_v55  ;;  %v1968_v61 = vadd.f32 %v1958_v52, %v1886_v22  ;;  %v2076_v44 = vadd.f32 %v7366_v58, %v2030_v62  ;;  %v7369_v22 = vld [vmem:[#allocation54_spill] sm:$0xff]  ;;  %v7371_v55 = vld [vmem:[#allocation215_spill] sm:$0xff] }
 0x3d5   : > { %v2034_v17 = vadd.f32 %v7367_v0, %v1970_v43  ;;  %v2035_v51 = vadd.f32 %v7367_v0, %v1971_v14  ;;  %v2538_v5 = vadd.f32 %v6256_v7, %v2492_v53  ;;  %v2539_v60 = vadd.f32 %v6256_v7, %v2493_v39  ;;  %v6447_v20 = vpop.permute.xlu0 %2899  ;;  %v7374_v53 = vld [vmem:[#allocation230_spill] sm:$0xff] }
 0x3d6   : > { %v2561_v50 = vadd.f32 %v2553_v25, %v2515_v37  ;;  %v2562_v57 = vadd.f32 %v2553_v25, %v2516_v1  ;;  %v2007_v42 = vadd.f32 %v1998_v32, %v1925_v3  ;;  %v2055_v33 = vadd.f32 %v7368_v40, %v2009_v18  ;;  %v7373_v32 = vld [vmem:[#allocation205_spill] sm:$0xff]  ;;  %v7377_v25 = vld [vmem:[#allocation243_spill] sm:$0xff] }
 0x3d7   : > { %v2496_v46 = vadd.f32 %v6036_v26, %v5912_v56  ;;  %v2497_v27 = vadd.f32 %v6036_v26, %v5914_v13  ;;  %v2519_v62 = vadd.f32 %v6304_v63, %v7369_v22  ;;  %v2520_v49 = vadd.f32 %v6304_v63, %v7370_v35  ;;  %v2557_v6 = vpop.permute.xlu1 %2556  ;;  %v7372_v63 = vld [vmem:[#allocation226_spill] sm:$0xff] }
 0x3d8   : > { %v2567_v52 = vadd.f32 %v2561_v50, %v2538_v5  ;;  %v2568_v43 = vadd.f32 %v2562_v57, %v2539_v60  ;;  %v3001_v14 = vrot.slane %v2569_v4, 1  ;;  %v3004_v48 = vrot.slane %v2570_v36, 1  ;;  %v7375_v36 = vld [vmem:[#allocation219_spill] sm:$0xff]  ;;  %v7378_v57 = vld [vmem:[#allocation217_spill] sm:$0xff]  ;;  %v7381_v35 = vld [vmem:[#allocation238_spill] sm:$0xff] }
 0x3d9   : > { %v2542_v7 = vadd.f32 %v6281_v11, %v2496_v46  ;;  %v2543_v3 = vadd.f32 %v6281_v11, %v2497_v27  ;;  %v2565_v13 = vadd.f32 %v2557_v6, %v2519_v62  ;;  %v2566_v26 = vadd.f32 %v2557_v6, %v2520_v49  ;;  %v7379_v27 = vld [vmem:[#allocation221_spill] sm:$0xff]  ;;  %v7380_v62 = vld [vmem:[#allocation228_spill] sm:$0xff] }
 0x3da   : > { %v3000_v56 = vrot.slane %v2567_v52, 1  ;;  %v3003_v24 = vrot.slane %v2568_v43, 1  ;;  %v2080_v47 = vadd.f32 %v7371_v55, %v2034_v17  ;;  %v2081_v29 = vadd.f32 %v7371_v55, %v2035_v51  ;;  %v7376_v17 = vld [vmem:[#allocation233_spill] sm:$0xff]  ;;  %v7382_v52 = vld [vmem:[#allocation231_spill] sm:$0xff] }
 0x3db   : > { %v2000_v18 = vsel %vm590_vm8, %v7373_v32, %v7372_v63  ;;  %v2053_v39 = vadd.f32 %v7374_v53, %v2007_v42  ;;  %v6459_v1 = vadd.f32 %v2565_v13, %v2542_v7  ;;  %v6461_v4 = vadd.f32 %v2566_v26, %v2543_v3  ;;  %v2856_v60 = vpop.permute.xlu1 %2855  ;;  %v6479_v3 = vpop.permute.xlu0 %2903  ;;  %v7383_v6 = vld [vmem:[#allocation225_spill] sm:$0xff]  ;;  %v7385_v13 = vld [vmem:[#allocation242_spill] sm:$0xff]  ;;  %v7389_v53 = vld [vmem:[#allocation235_spill] sm:$0xff] }
 0x3dc   : > { %v6456_v11 = vsel %vm2949_vm5, %v3000_v56, %v3001_v14  ;;  %v3005_v37 = vsel %vm2949_vm5, %v3003_v24, %v3004_v48  ;;  %v2122_v58 = vadd.f32 %v7375_v36, %v2076_v44  ;;  %v2012_v0 = vadd.f32 %v7372_v63, %v1930_v12  ;;  %v7386_v55 = vld [vmem:[#allocation241_spill] sm:$0xff]  ;;  %v7387_v63 = vld [vmem:[#allocation227_spill] sm:$0xff] }
 0x3dd   : > { %v2099_v51 = vadd.f32 %v7376_v17, %v2053_v39  ;;  %v6467_v5 = vadd.f32 %v3005_v37, %v7377_v25  ;;  %v2011_v50 = vadd.f32 %v2000_v18, %v6397_v28  ;;  %v2101_v42 = vadd.f32 %v7378_v57, %v2055_v33  ;;  %v7388_v18 = vld [vmem:[#allocation223_spill] sm:$0xff]  ;;  %v7390_v36 = vld [vmem:[#allocation237_spill] sm:$0xff]  ;;  %v7392_v17 = vld [vmem:[#allocation252_spill] sm:$0xff] }
 0x3de   : > { %v3006_v40 = vrot.slane %v6459_v1, 1  ;;  %v3008_v46 = vrot.slane %v6461_v4, 1  ;;  %v2126_v22 = vadd.f32 %v7379_v27, %v2080_v47  ;;  %v2127_v44 = vadd.f32 %v7379_v27, %v2081_v29  ;;  %v7393_v25 = vld [vmem:[#allocation44_spill] sm:$0xff]  ;;  %v7394_v57 = vld [vmem:[#allocation239_spill] sm:$0xff] }
 0x3df   : > { %v2032_v12 = vadd.f32 %v7380_v62, %v1968_v61  ;;  %v2145_v49 = vadd.f32 %v7381_v35, %v2099_v51  ;;  %v2057_v43 = vadd.f32 %v7382_v52, %v2011_v50  ;;  %v2058_v7 = vadd.f32 %v7382_v52, %v2012_v0  ;;  %v7384_v61 = vld [vmem:[#allocation232_spill] sm:$0xff]  ;;  %v2877_v29 = vpop.permute.xlu1 %2876  ;;  %v7391_v0 = vld [vmem:[#allocation17_spill] sm:$0xff]  ;;  %v7396_v62 = vld [vmem:[#allocation34_spill] sm:$0xff] }
 0x3e0   : > { %v6484_v28 = vsel %vm2949_vm5, %v3001_v14, %v3006_v40  ;;  %v3009_v33 = vsel %vm2949_vm5, %v3004_v48, %v3008_v46  ;;  %v2168_v56 = vadd.f32 %v7383_v6, %v2122_v58  ;;  %v6496_v32 = vadd.f32 %v7387_v63, %v2126_v22  ;;  %v7395_v22 = vld [vmem:[#allocation248_spill] sm:$0xff]  ;;  %v7397_v35 = vld [vmem:[#allocation18_spill] sm:$0xff] }
 0x3e1   : > { %v2078_v24 = vadd.f32 %v7384_v61, %v2032_v12  ;;  %v2191_v26 = vadd.f32 %v7385_v13, %v2145_v49  ;;  %v6493_v47 = vadd.f32 %v3009_v33, %v7386_v55  ;;  %v6499_v14 = vadd.f32 %v7388_v18, %v2101_v42  ;;  %v7401_v13 = vld [vmem:[#allocation24_spill] sm:$0xff] }
 0x3e2   : > { %v2103_v39 = vadd.f32 %v7389_v53, %v2057_v43  ;;  %v2104_v48 = vadd.f32 %v7389_v53, %v2058_v7  ;;  %v6504_v37 = vadd.f32 %v7387_v63, %v2127_v44  ;;  %v2795_v51 = vadd.f32 %v7392_v17, %v7391_v0  ;;  %v7398_v44 = vld [vmem:[#allocation240_spill] sm:$0xff]  ;;  %v7402_v63 = vld [vmem:[#allocation246_spill] sm:$0xff] }
 0x3e3   : > { %v2124_v58 = vadd.f32 %v7390_v36, %v2078_v24  ;;  %v2796_v50 = vadd.f32 %v7392_v17, %v7393_v25  ;;  %v2772_v12 = vadd.f32 %v7396_v62, %v7395_v22  ;;  %v2773_v49 = vadd.f32 %v7396_v62, %v7397_v35  ;;  %v7399_v7 = vld [vmem:[#allocation28_spill] sm:$0xff]  ;;  %v2881_v61 = vpop.permute.xlu1 %2880  ;;  %v7400_v24 = vld [vmem:[#allocation247_spill] sm:$0xff]  ;;  %v7403_v36 = vld [vmem:[#allocation249_spill] sm:$0xff] }
 0x3e4   : > { %v2149_v27 = vadd.f32 %v7394_v57, %v2103_v39  ;;  %v2150_v42 = vadd.f32 %v7394_v57, %v2104_v48  ;;  %v6520_v43 = vadd.f32 %v2191_v26, %v2168_v56  ;;  %v2841_v33 = vadd.f32 %v7399_v7, %v2795_v51  ;;  %v2925_v48 = vpop.permute.xlu0 %2924  ;;  %v7405_v26 = vld [vmem:[#allocation15_spill] sm:$0xff]  ;;  %v7408_v22 = vld [vmem:[#allocation21_spill] sm:$0xff] }
 0x3e5   : > { %v6518_v52 = vadd.f32 %v7398_v44, %v2124_v58  ;;  %v2842_v6 = vadd.f32 %v7399_v7, %v2796_v50  ;;  %v2770_v55 = vadd.f32 %v7401_v13, %v7400_v24  ;;  %v2771_v18 = vadd.f32 %v7401_v13, %v7402_v63  ;;  %v7404_v58 = vld [vmem:[#allocation250_spill] sm:$0xff]  ;;  %v7406_v25 = vld [vmem:[#allocation251_spill] sm:$0xff] }
 0x3e6   : > { %v2818_v53 = vadd.f32 %v6325_v38, %v2772_v12  ;;  %v2819_v39 = vadd.f32 %v6325_v38, %v2773_v49  ;;  %v2774_v56 = vadd.f32 %v7404_v58, %v7403_v36  ;;  %v2775_v0 = vadd.f32 %v7404_v58, %v7405_v26  ;;  %v7407_v50 = vld [vmem:[#allocation106_spill] sm:$0xff]  ;;  %v7409_v38 = vld [vmem:[#allocation52_spill] sm:$0xff]  ;;  %v7410_v26 = vld [vmem:[#allocation19_spill] sm:$0xff] }
 0x3e7   : > { %v2887_v17 = vadd.f32 %v6425_v15, %v2841_v33  ;;  %v2888_v51 = vadd.f32 %v6425_v15, %v2842_v6  ;;  %v2793_v57 = vadd.f32 %v7407_v50, %v7406_v25  ;;  %v2794_v62 = vadd.f32 %v7407_v50, %v7408_v22  ;;  %v2902_v13 = vpop.permute.xlu1 %2901  ;;  %v7413_v25 = vld [vmem:[#allocation23_spill] sm:$0xff] }
 0x3e8   : > { %v2864_v12 = vadd.f32 %v2856_v60, %v2818_v53  ;;  %v2865_v35 = vadd.f32 %v2856_v60, %v2819_v39  ;;  %v2816_v49 = vadd.f32 %v7409_v38, %v2770_v55  ;;  %v2817_v44 = vadd.f32 %v7409_v38, %v2771_v18  ;;  %v7411_v53 = vld [vmem:[#allocation42_spill] sm:$0xff] }
 0x3e9   : > { %v2933_v7 = vadd.f32 %v2925_v48, %v2887_v17  ;;  %v2934_v24 = vadd.f32 %v2925_v48, %v2888_v51  ;;  %v2839_v63 = vadd.f32 %v6352_v34, %v2793_v57  ;;  %v2840_v33 = vadd.f32 %v6352_v34, %v2794_v62  ;;  %v7412_v39 = vld [vmem:[#allocation46_spill] sm:$0xff] }
 0x3ea   : > { %v2910_v15 = vadd.f32 %v2902_v13, %v2864_v12  ;;  %v2911_v6 = vadd.f32 %v2902_v13, %v2865_v35  ;;  %v2862_v36 = vadd.f32 %v6343_v31, %v2816_v49  ;;  %v2863_v58 = vadd.f32 %v6343_v31, %v2817_v44  ;;  %v7414_v49 = vld [vmem:[#allocation244_spill] sm:$0xff] }
 0x3eb   : > { %v2797_v60 = vadd.f32 %v7411_v53, %v7410_v26  ;;  %v2798_v55 = vadd.f32 %v7411_v53, %v7412_v39  ;;  %v2885_v18 = vadd.f32 %v2877_v29, %v2839_v63  ;;  %v2886_v17 = vadd.f32 %v2877_v29, %v2840_v33  ;;  %v2923_v62 = vpop.permute.xlu1 %2922 }
 0x3ec   : > { %v2939_v48 = vadd.f32 %v2933_v7, %v2910_v15  ;;  %v2940_v51 = vadd.f32 %v2934_v24, %v2911_v6  ;;  %v2820_v50 = vadd.f32 %v7413_v25, %v2774_v56  ;;  %v2821_v34 = vadd.f32 %v7413_v25, %v2775_v0 }
 0x3ed   : > { %v2908_v57 = vadd.f32 %v6447_v20, %v2862_v36  ;;  %v2909_v22 = vadd.f32 %v6447_v20, %v2863_v58  ;;  %v2843_v31 = vadd.f32 %v6384_v59, %v2797_v60  ;;  %v2844_v12 = vadd.f32 %v6384_v59, %v2798_v55 }
 0x3ee   : > { %v2931_v35 = vadd.f32 %v2923_v62, %v2885_v18  ;;  %v2932_v38 = vadd.f32 %v2923_v62, %v2886_v17  ;;  %v2195_v44 = vadd.f32 %v7414_v49, %v2149_v27  ;;  %v2196_v29 = vadd.f32 %v7414_v49, %v2150_v42  ;;  %v7415_v42 = vld [vmem:[#allocation229_spill] sm:$0xff] }
 0x3ef   : > { %v2866_v7 = vadd.f32 %v6395_v9, %v2820_v50  ;;  %v2867_v56 = vadd.f32 %v6395_v9, %v2821_v34  ;;  %v2889_v0 = vadd.f32 %v2881_v61, %v2843_v31  ;;  %v2890_v24 = vadd.f32 %v2881_v61, %v2844_v12  ;;  %v2927_v6 = vpop.permute.xlu1 %2926 }
 0x3f0   : > { %v2937_v13 = vadd.f32 %v2931_v35, %v2908_v57  ;;  %v2938_v63 = vadd.f32 %v2932_v38, %v2909_v22  ;;  %v3058_v15 = vrot.slane %v2939_v48, 2  ;;  %v3061_v59 = vrot.slane %v2940_v51, 2 }
 0x3f1   : > { %v2912_v20 = vadd.f32 %v6479_v3, %v2866_v7  ;;  %v2913_v33 = vadd.f32 %v6479_v3, %v2867_v56  ;;  %v2935_v27 = vadd.f32 %v2927_v6, %v2889_v0  ;;  %v2936_v26 = vadd.f32 %v2927_v6, %v2890_v24  ;;  %v7418_v56 = vld [vmem:[#allocation115_spill] sm:$0xff] }
 0x3f2   : > { %v3057_v36 = vrot.slane %v2937_v13, 2  ;;  %v3060_v58 = vrot.slane %v2938_v63, 2  ;;  %v2193_v53 = vadd.f32 %v7415_v42, %v6499_v14  ;;  %v2201_v9 = vadd.f32 %v2195_v44, %v6496_v32 }
 0x3f3   : > { %v2202_v61 = vadd.f32 %v2196_v29, %v6504_v37  ;;  %v3016_v60 = vadd.f32 %v6456_v11, %v6520_v43  ;;  %v2941_v55 = vadd.f32 %v2935_v27, %v2912_v20  ;;  %v2942_v18 = vadd.f32 %v2936_v26, %v2913_v33 }
 0x3f4   : > { %v3059_v39 = vsel %vm3028_vm6, %v3057_v36, %v3058_v15  ;;  %v3062_v3 = vsel %vm3028_vm6, %v3060_v58, %v3061_v59  ;;  %v3036_v17 = vsel %vm3028_vm6, %v3030_v45, %v3035_v8  ;;  %v2199_v14 = vadd.f32 %v2193_v53, %v6518_v52 }
 0x3f5   : > { %v3073_v32 = vadd.f32 %v3059_v39, %v3016_v60  ;;  %v3074_v37 = vadd.f32 %v3062_v3, %v6467_v5  ;;  %v3020_v11 = vadd.f32 %v3006_v40, %v2201_v9  ;;  %v3021_v43 = vadd.f32 %v3008_v46, %v2202_v61  ;;  %v7416_v40 = vld [vmem:[#allocation208_spill] sm:$0xff] }
 0x3f6   : > { %v3063_v48 = vrot.slane %v2941_v55, 2  ;;  %v3065_v51 = vrot.slane %v2942_v18, 2  ;;  %v3018_v25 = vadd.f32 %v6484_v28, %v2199_v14  ;;  %v3045_v19 = vadd.f32 %v6389_v23, %v6370_v30 }
 0x3f7   : > { %v3085_v50 = vrot.slane %v3073_v32, 4  ;;  %v3086_v45 = vrot.slane %v3074_v37, 4  ;;  %v2968_v28 = vadd.f32 %v6375_v41, %v6330_v21  ;;  %v2970_v30 = vadd.f32 %v2956_v54, %v6332_v2  ;;  %v7417_v54 = vld [vmem:[#allocation123_spill] sm:$0xff] }
 0x3f8   : > { %v3064_v52 = vsel %vm3028_vm6, %v3058_v15, %v3063_v48  ;;  %v3066_v34 = vsel %vm3028_vm6, %v3061_v59, %v3065_v51  ;;  %v3077_v5 = vadd.f32 %v3063_v48, %v3020_v11  ;;  %v3078_v57 = vadd.f32 %v3065_v51, %v3021_v43 }
 0x3f9   : > { %v3101_v1 = vadd.f32 %v3085_v50, %v3045_v19  ;;  %v3102_v22 = vadd.f32 %v3086_v45, %v7416_v40  ;;  %v3075_v4 = vadd.f32 %v3064_v52, %v3018_v25  ;;  %v3076_v46 = vadd.f32 %v3066_v34, %v6493_v47 }
 0x3fa   : > { %v3091_v23 = vrot.slane %v3077_v5, 4  ;;  %v3093_v62 = vrot.slane %v3078_v57, 4  ;;  %v3047_v49 = vadd.f32 %v3036_v17, %v2968_v28  ;;  %v3049_v44 = vadd.f32 %v3035_v8, %v2970_v30 }
 0x3fb   : > { %v3393_v31 = vmul.f32 -1.442695, %v3101_v1  ;;  %v3394_v12 = vmul.f32 -1.442695, %v3102_v22  ;;  %v3087_v35 = vrot.slane %v3075_v4, 4  ;;  %v3089_v38 = vrot.slane %v3076_v46, 4 }
 0x3fd   : > { %3499 = vpow2.f32 %v3393_v31  ;;  %v3088_v47 = vsel %vm203_vm0, %v3085_v50, %v3087_v35  ;;  %v3090_v29 = vsel %vm203_vm0, %v3086_v45, %v3089_v38  ;;  %v3092_v21 = vsel %vm203_vm0, %v3087_v35, %v3091_v23 }
 0x3fe   : > { %3501 = vpow2.f32 %v3394_v12  ;;  %v3094_v10 = vsel %vm203_vm0, %v3089_v38, %v3093_v62  ;;  %v3103_v2 = vadd.f32 %v3088_v47, %v3047_v49  ;;  %v3104_v41 = vadd.f32 %v3090_v29, %v7417_v54 }
 0x3ff   : > { %v3105_v7 = vadd.f32 %v3092_v21, %v3049_v44  ;;  %v3106_v0 = vadd.f32 %v3094_v10, %v7418_v56 }
 0x400   : > { %v3395_v24 = vmul.f32 -1.442695, %v3103_v2  ;;  %v3396_v13 = vmul.f32 -1.442695, %v3104_v41 }
 0x401   : > { %v3397_v16 = vmul.f32 -1.442695, %v3105_v7  ;;  %v3398_v8 = vmul.f32 -1.442695, %v3106_v0 }
 0x402   : > { %3503 = vpow2.f32 %v3395_v24 }
 0x403   : > { %3505 = vpow2.f32 %v3396_v13 }
 0x404   : > { %3507 = vpow2.f32 %v3397_v16 }
 0x405   : > { %3509 = vpow2.f32 %v3398_v8 }
 0x407   : > { %v3500_v63 = vpop.eup %3499 }
 0x408   : > { %v3502_v20 = vpop.eup %3501  ;;  %v3125_v33 = vadd.f32 1.0, %v3500_v63 }
 0x409   : > { %v3126_v15 = vadd.f32 1.0, %v3502_v20 }
 0x40a   : > { %3511 = vrcp.f32 %v3125_v33 }
 0x40b   : > { %3513 = vrcp.f32 %v3126_v15 }
 0x40c   : > { %v3504_v59 = vpop.eup %3503 }
 0x40d   : > { %v3506_v6 = vpop.eup %3505  ;;  %v3127_v36 = vadd.f32 1.0, %v3504_v59 }
 0x40e   : > { %v3508_v58 = vpop.eup %3507  ;;  %v3128_v27 = vadd.f32 1.0, %v3506_v6 }
 0x40f   : > { %v3510_v26 = vpop.eup %3509  ;;  %v3129_v42 = vadd.f32 1.0, %v3508_v58  ;;  %3515 = vrcp.f32 %v3127_v36 }
 0x410   : > { %v3130_v53 = vadd.f32 1.0, %v3510_v26  ;;  %3517 = vrcp.f32 %v3128_v27 }
 0x411   : > { %3519 = vrcp.f32 %v3129_v42 }
 0x412   : > { %3521 = vrcp.f32 %v3130_v53 }
 0x414   : > { %v3512_v9 = vpop.eup %3511 }
 0x415   : > { %v3514_v61 = vpop.eup %3513  ;;  %3149 = vrot.lane.b32.xlu0 %v3512_v9, %s3691_s18 }
 0x416   : > { %3151 = vrot.lane.b32.xlu1 %v3514_v61, %s3691_s18 }
 0x419   : > { %v3516_v60 = vpop.eup %3515 }
 0x41a   : > { %v3518_v39 = vpop.eup %3517  ;;  %3153 = vrot.lane.b32.xlu0 %v3516_v60, %s3691_s18 }
 0x41b   : > { %3155 = vrot.lane.b32.xlu1 %v3518_v39, %s3691_s18  ;;  %v3520_v3 = vpop.eup %3519 }
 0x41c   : > { %v3522_v55 = vpop.eup %3521 }
 0x41e   : > { %3157 = vrot.lane.b32.xlu0 %v3520_v3, %s3691_s18 }
 0x41f   : > { %3159 = vrot.lane.b32.xlu1 %v3522_v55, %s3691_s18 }
 0x487   : > { %v3150_v18 = vpop.permute.xlu0 %3149 }
 0x488   : > { %v3152_v17 = vpop.permute.xlu1 %3151 }
 0x489   : > { %v3162_v14 = vsel %vm3161_vm9, %v3150_v18, %v3152_v17 }
 0x48a   : > { %3169 = vst.msk [vmem:[%s189_s15 - $0x5] sm:$0xe0] %vm3168_vm10, %v3162_v14 }
 0x48c   : > { %v3154_v32 = vpop.permute.xlu0 %3153 }
 0x48d   : > { %v3156_v37 = vpop.permute.xlu1 %3155 }
 0x48e   : > { %v3163_v11 = vsel %vm3161_vm9, %v3154_v32, %v3156_v37 }
 0x48f   : > { %3171 = vst.msk [vmem:[%s189_s15 + $0x3] sm:$0xff] %vm3170_vm11, %v3163_v11 }
 0x490   : > { %v3158_v43 = vpop.permute.xlu0 %3157 }
 0x491   : > { %v3160_v48 = vpop.permute.xlu1 %3159 }
 0x492   : > { %v3164_v51 = vsel %vm3161_vm9, %v3158_v43, %v3160_v48 }
 0x493   : > { %3173 = vst.msk [vmem:[%s189_s15 + $0xb] sm:$0x1f] %vm3172_vm12, %v3164_v51 }
 0x494   : > { %3598 = shalt.err (!%p3595_p11)
}
 0x495   : > { %s3599_s4 = scalar_lea.hbm %s6610_s16, 256  ;;  %s3603_s8 = scalar_lea.hbm %s6662_s2, 512 }
 0x496   : > { %p3600_p3 = scmp.ne.s32.totalorder %s6610_s16, %s3599_s4  ;;  %p3604_p6 = scmp.lt.u32.totalorder %s6610_s16, %s6662_s2 }
 0x497   : > { %p3605_p1 = scmp.lt.u32.totalorder %s3603_s8, %s3599_s4  ;;  %p3607_p8 = scmp.lt.u32.totalorder %s3599_s4, %s6610_s16 }
 0x498   : > { %p3601_p7 = pnand %p3600_p3, %p7419_p2 }
 0x499   : > { %p3606_p0 = por %p3605_p1, %p3604_p6 }
 0x49a   : > { %p3602_p10 = pneg %p3601_p7 }
 0x49b   : > { %p3608_p12 = por %p3607_p8, %p3606_p0 }
 0x49d   : > { %p3609_p5 = pnand %p3608_p12, %p3602_p10 }
 0x49f   : > { %3612 = shalt.err (!%p3609_p5)
}
 0x4a0   : > { %s3693_s22 = smov 128   ;;  %s3694_s15 = smov 8  }
 0x4a1   : > { %3412 = dma.vmem_to_hbm [thread:$0]  (%p7419_p2), %s6605_s27, 256, %s6610_s16, %s3175_s12, %s3693_s22, %s3693_s22, %s3694_s15  }
 0x4a2 PF: > { %s3203_s28 = sand.u32 1, %s3651_s9   ;;  %p7420_p4 = scmp.ne.s32.totalorder %s6863_s20, 0 }
 0x4a3   : > { %p7421_p9 = scmp.ge.s32.totalorder %s3671_s14, 2  ;;  %s3204_s19 = scalar_lea.sflag [#allocation8], %s3203_s28 }
 0x4a5   : > { %p3423_p13 = pnand %p7421_p9, %p7420_p4 }
 0x4a7   : > { %3646 = dma.done.wait (!%p3423_p13), %s3204_s19, 256  }
 0x4a8   : > { %3648 = vsyncadd (!%p3423_p13), %s3204_s19, 4294967040  ;;  %s19_s14 = sadd.s32 1, %s3671_s14   ;;  %s7422_s9 = smov %s3655_s10 }
 0x4a9   : > { %p16_p11 = scmp.ge.s32.totalorder %s19_s14, 4   ;;  %s7423_s10 = smov %s3659_s11 }
 0x4aa   : > { %s7424_s11 = smov %s3802_s5  ;;  %s7425_s12 = smov %s3667_s13 }
 0x4ab   : > { %s7426_s13 = smov %s7428_s26  ;;  %18 = sbr.rel (!%p16_p11) target bundleno = 7 (0x7), region = 86 }
 0x4b2   :  { %3209 = vsyncpa [#allocation7], 1 }
 0x4b3   :  { %3211 = vsyncpa [#allocation7 + $0x1], 1 }
 0x4b4   :  { %3212 = vsyncpa [#allocation8], 1 }
 0x4b5   :  { %3214 = vsyncpa [#allocation8 + $0x1], 1 }
 0x4b6   :  { %3215 = vsyncpa [#allocation9], 1 }
 0x4b7   :  { %3217 = vsyncpa [#allocation9 + $0x1], 1 }

</bundles_post_ra>
